<compile_context>
chip_gen: v7x
topology: tpu7x:2x2x1
jax: 0.10.0
libtpu: 0.0.40
codegen_flags: <defaults>
</compile_context>

<pallas_src>
import jax
import jax.numpy as jnp
from jax.experimental import pallas as pl
from jax.experimental.pallas import tpu as pltpu

SEQ_LENGTH = 350
EMB_DIM = 16
NUM_CLASSES = 2          # len(CLASS_NAMES)
LEAKY_SLOPE = 0.15
LN_EPS = 1e-5


def _output_layer_kernel(x_ref, p_ref, w2_ref, o_ref):
    """Fused linear1 -> LayerNorm -> LeakyReLU -> (flatten) -> linear2.

    x:  (B*S_pad, E)  all batch rows stacked in S_pad-aligned slabs
    p:  (E+3, E)      rows [0:E] = w1 (= torch linear1.weight.T),
                      row E = b1, row E+1 = gamma, row E+2 = beta
    w2: (C, S_pad, E) torch linear2.weight reshaped (flat idx = s*E + e),
                      padded S rows are zero
    o:  (B, C)
    """
    B, C = o_ref.shape
    S_pad = w2_ref.shape[1]
    E = x_ref.shape[1]

    # Hoist every parameter load once, outside the (unrolled) batch loop.
    p = p_ref[...]
    w1 = p[0:E, :]               # (E, E)   aligned prefix slice
    b1 = p[E:E + 1, :]           # (1, E)
    g = p[E + 1:E + 2, :]        # (1, E)
    beta = p[E + 2:E + 3, :]     # (1, E)
    w2 = w2_ref[...]             # (C, S_pad, E)

    # linear1 for ALL batch rows in a single MXU call, + bias.
    h = jnp.dot(x_ref[...], w1, preferred_element_type=jnp.float32) + b1

    # LayerNorm over the feature axis (biased variance, eps inside rsqrt).
    mean = jnp.mean(h, axis=-1, keepdims=True)
    var = jnp.mean(jnp.square(h - mean), axis=-1, keepdims=True)
    hn = (h - mean) * jax.lax.rsqrt(var + LN_EPS)
    hn = hn * g + beta

    # LeakyReLU(0.15).  nn.Dropout(p=0.2) is identity in eval mode.
    act = jnp.where(hn >= 0, hn, LEAKY_SLOPE * hn)       # (B*S_pad, E)

    # Head: out[b, c] = sum_{s,e} act[b*S_pad + s, e] * w2[c, s, e]
    # (== Flatten(1) + Linear(S*E -> C, bias=False)).  Both classes at once,
    # sublane (S) reduction first on the VPU, one lane reduce at the very end,
    # and a single (B, C) store.
    partials = []
    for b in range(B):                                    # B tiny & static
        a_b = act[b * S_pad:(b + 1) * S_pad, :]           # aligned static slice
        prod = a_b[None, :, :] * w2                       # (C, S_pad, E)
        partials.append(jnp.sum(prod, axis=1))            # (C, E)  VPU adds
    p3 = jnp.stack(partials, axis=0)                      # (B, C, E)
    o_ref[...] = jnp.sum(p3, axis=-1)                     # (B, C), one store


def output_layer_forward(x, params):
    B, S, E = x.shape
    w2 = params["w2"]                          # (C, S, E) == torch weight.reshape
    C = w2.shape[0]
    S_pad = ((S + 7) // 8) * 8                 # 350 -> 352 (sublane multiple)
    pad = S_pad - S

    # Zero-pad S; padded w2 rows are zero so they contribute nothing.
    x_p = jnp.pad(x, ((0, 0), (0, pad), (0, 0))).reshape(B * S_pad, E)
    w2_p = jnp.pad(w2, ((0, 0), (0, pad), (0, 0)))

    # Pack all small parameters into one block: one DMA instead of four.
    p_pack = jnp.concatenate(
        [params["w1"],
         params["b1"].reshape(1, E),
         params["gamma"].reshape(1, E),
         params["beta"].reshape(1, E)], axis=0)           # (E+3, E)

    return pl.pallas_call(
        _output_layer_kernel,
        out_shape=jax.ShapeDtypeStruct((B, C), jnp.float32),
        in_specs=[pl.BlockSpec(memory_space=pltpu.MemorySpace.VMEM)] * 3,
        out_specs=pl.BlockSpec(memory_space=pltpu.MemorySpace.VMEM),
    )(x_p, p_pack, w2_p)


def _reference(x, params):
    """Pure-JAX reference matching the PyTorch forward (eval mode)."""
    B, S, E = x.shape
    h = x @ params["w1"] + params["b1"]
    mean = jnp.mean(h, axis=-1, keepdims=True)
    var = jnp.mean(jnp.square(h - mean), axis=-1, keepdims=True)
    h = (h - mean) * jax.lax.rsqrt(var + LN_EPS)
    h = h * params["gamma"] + params["beta"]
    h = jnp.where(h >= 0, h, LEAKY_SLOPE * h)
    flat = h.reshape(B, S * E)                              # nn.Flatten(1)
    w2_flat = params["w2"].reshape(NUM_CLASSES, S * E)      # torch weight
    return flat @ w2_flat.T


if __name__ == "__main__":
    key = jax.random.PRNGKey(0)
    kx, kw1, kb1, kw2 = jax.random.split(key, 4)

    B = 2
    x = jax.random.normal(kx, (B, SEQ_LENGTH, EMB_DIM), jnp.float32)

    # Deterministic synthetic parameters (shapes from __init__):
    #   linear1: weight (16,16), bias (16,)       -> w1 = weight.T
    #   norm1:   gamma/beta (16,)
    #   linear2: weight (2, 350*16), no bias      -> w2 = weight.reshape(2,350,16)
    params = {
        "w1": jax.random.normal(kw1, (EMB_DIM, EMB_DIM), jnp.float32) * 0.1,
        "b1": jax.random.normal(kb1, (EMB_DIM,), jnp.float32) * 0.1,
        "gamma": jnp.ones((EMB_DIM,), jnp.float32),
        "beta": jnp.zeros((EMB_DIM,), jnp.float32),
        "w2": jax.random.normal(kw2, (NUM_CLASSES, SEQ_LENGTH, EMB_DIM),
                                jnp.float32) * 0.02,
    }

    out = jax.block_until_ready(output_layer_forward(x, params))
    ref = _reference(x, params)

    assert out.shape == (B, NUM_CLASSES), out.shape
    assert jnp.allclose(out, ref, atol=1e-3, rtol=1e-3), (out, ref)
    print("KERNEL_OK")
</pallas_src>

<mosaic_0001>
module attributes {stable_mosaic.version = 11 : i64} {
  func.func @_output_layer_kernel(%arg0: memref<704x16xf32, #tpu.memory_space<vmem>>, %arg1: memref<19x16xf32, #tpu.memory_space<vmem>>, %arg2: memref<2x352x16xf32, #tpu.memory_space<vmem>>, %arg3: memref<2x2xf32, #tpu.memory_space<vmem>>) attributes {dimension_semantics = [], scalar_prefetch = 0 : i64, scratch_operands = 0 : i64, tpu.core_type = #tpu.core_type<tc>} {
    %c0 = arith.constant 0 : index
    %c0_0 = arith.constant 0 : index
    %0 = vector.load %arg1[%c0, %c0_0] : memref<19x16xf32, #tpu.memory_space<vmem>>, vector<19x16xf32>
    %1 = vector.extract_strided_slice %0 {offsets = [0, 0], sizes = [16, 16], strides = [1, 1]} : vector<19x16xf32> to vector<16x16xf32>
    %2 = vector.extract_strided_slice %0 {offsets = [16, 0], sizes = [1, 16], strides = [1, 1]} : vector<19x16xf32> to vector<1x16xf32>
    %3 = vector.extract_strided_slice %0 {offsets = [17, 0], sizes = [1, 16], strides = [1, 1]} : vector<19x16xf32> to vector<1x16xf32>
    %4 = vector.extract_strided_slice %0 {offsets = [18, 0], sizes = [1, 16], strides = [1, 1]} : vector<19x16xf32> to vector<1x16xf32>
    %c0_1 = arith.constant 0 : index
    %c0_2 = arith.constant 0 : index
    %c0_3 = arith.constant 0 : index
    %5 = vector.load %arg2[%c0_1, %c0_2, %c0_3] : memref<2x352x16xf32, #tpu.memory_space<vmem>>, vector<2x352x16xf32>
    %c0_4 = arith.constant 0 : index
    %c0_5 = arith.constant 0 : index
    %6 = vector.load %arg0[%c0_4, %c0_5] : memref<704x16xf32, #tpu.memory_space<vmem>>, vector<704x16xf32>
    %cst = arith.constant dense<0.000000e+00> : vector<704x16xf32>
    %7 = tpu.matmul %6, %1, %cst {dimension_numbers = #tpu.dot_dimension_numbers<[1], [0], [0], [1], [0, 0, 1, 1], [], []>} : vector<704x16xf32>, vector<16x16xf32>, vector<704x16xf32> -> vector<704x16xf32>
    %8 = vector.broadcast %2 : vector<1x16xf32> to vector<704x16xf32>
    %9 = arith.addf %7, %8 : vector<704x16xf32>
    %cst_6 = arith.constant dense<0.000000e+00> : vector<704xf32>
    %10 = vector.multi_reduction <add>, %9, %cst_6 [1] : vector<704x16xf32> to vector<704xf32>
    %11 = vector.shape_cast %10 : vector<704xf32> to vector<704x1xf32>
    %cst_7 = arith.constant 1.600000e+01 : f32
    %12 = vector.broadcast %cst_7 : f32 to vector<704x1xf32>
    %13 = arith.divf %11, %12 : vector<704x1xf32>
    %14 = vector.broadcast %13 : vector<704x1xf32> to vector<704x16xf32>
    %15 = arith.subf %9, %14 : vector<704x16xf32>
    %16 = arith.mulf %15, %15 : vector<704x16xf32>
    %cst_8 = arith.constant dense<0.000000e+00> : vector<704xf32>
    %17 = vector.multi_reduction <add>, %16, %cst_8 [1] : vector<704x16xf32> to vector<704xf32>
    %18 = vector.shape_cast %17 : vector<704xf32> to vector<704x1xf32>
    %cst_9 = arith.constant 1.600000e+01 : f32
    %19 = vector.broadcast %cst_9 : f32 to vector<704x1xf32>
    %20 = arith.divf %18, %19 : vector<704x1xf32>
    %21 = vector.broadcast %13 : vector<704x1xf32> to vector<704x16xf32>
    %22 = arith.subf %9, %21 : vector<704x16xf32>
    %cst_10 = arith.constant 9.99999974E-6 : f32
    %23 = vector.broadcast %cst_10 : f32 to vector<704x1xf32>
    %24 = arith.addf %20, %23 : vector<704x1xf32>
    %25 = math.rsqrt %24 : vector<704x1xf32>
    %26 = vector.broadcast %25 : vector<704x1xf32> to vector<704x16xf32>
    %27 = arith.mulf %22, %26 : vector<704x16xf32>
    %28 = vector.broadcast %3 : vector<1x16xf32> to vector<704x16xf32>
    %29 = arith.mulf %27, %28 : vector<704x16xf32>
    %30 = vector.broadcast %4 : vector<1x16xf32> to vector<704x16xf32>
    %31 = arith.addf %29, %30 : vector<704x16xf32>
    %cst_11 = arith.constant 0.000000e+00 : f32
    %32 = vector.broadcast %cst_11 : f32 to vector<704x16xf32>
    %33 = arith.cmpf oge, %31, %32 : vector<704x16xf32>
    %cst_12 = arith.constant 1.500000e-01 : f32
    %34 = vector.broadcast %cst_12 : f32 to vector<704x16xf32>
    %35 = arith.mulf %34, %31 : vector<704x16xf32>
    %36 = arith.select %33, %31, %35 : vector<704x16xi1>, vector<704x16xf32>
    %37 = vector.extract_strided_slice %36 {offsets = [0, 0], sizes = [352, 16], strides = [1, 1]} : vector<704x16xf32> to vector<352x16xf32>
    %38 = vector.shape_cast %37 : vector<352x16xf32> to vector<1x352x16xf32>
    %39 = vector.broadcast %38 : vector<1x352x16xf32> to vector<2x352x16xf32>
    %40 = arith.mulf %39, %5 : vector<2x352x16xf32>
    %cst_13 = arith.constant dense<0.000000e+00> : vector<2x16xf32>
    %41 = vector.multi_reduction <add>, %40, %cst_13 [1] : vector<2x352x16xf32> to vector<2x16xf32>
    %42 = vector.extract_strided_slice %36 {offsets = [352, 0], sizes = [352, 16], strides = [1, 1]} : vector<704x16xf32> to vector<352x16xf32>
    %43 = vector.shape_cast %42 : vector<352x16xf32> to vector<1x352x16xf32>
    %44 = vector.broadcast %43 : vector<1x352x16xf32> to vector<2x352x16xf32>
    %45 = arith.mulf %44, %5 : vector<2x352x16xf32>
    %cst_14 = arith.constant dense<0.000000e+00> : vector<2x16xf32>
    %46 = vector.multi_reduction <add>, %45, %cst_14 [1] : vector<2x352x16xf32> to vector<2x16xf32>
    %47 = vector.shape_cast %41 : vector<2x16xf32> to vector<1x2x16xf32>
    %48 = vector.shape_cast %46 : vector<2x16xf32> to vector<1x2x16xf32>
    %49 = tpu.concatenate %47, %48 in 0 : vector<1x2x16xf32>, vector<1x2x16xf32> -> vector<2x2x16xf32>
    %cst_15 = arith.constant dense<0.000000e+00> : vector<2x2xf32>
    %50 = vector.multi_reduction <add>, %49, %cst_15 [2] : vector<2x2x16xf32> to vector<2x2xf32>
    %c0_16 = arith.constant 0 : index
    %c0_17 = arith.constant 0 : index
    %51 = vector.load %arg3[%c0_16, %c0_17] : memref<2x2xf32, #tpu.memory_space<vmem>>, vector<2x2xf32>
    tpu.vector_store %arg3[%c0_16, %c0_17], %50 {strides = array<i32>} : memref<2x2xf32, #tpu.memory_space<vmem>>, vector<2x2xf32>,
    return
  }
}

</mosaic_0001>

<bundles_post_ra>
// kernel: tpu_custom_call.1
= control target key start
LH: loop header
LB: loop body
LE: loop exit
PB: predicated region body
PF: predicated region fallthrough
CT: control target
= control target key end

     0   :  { %vm198_vm0 = vcmask 130048   ;;  %s6424_s0 = inlined_call_operand.vmem [shape: f32[704,16], index: 0, kind: input, shape index: {}]   ;;  %s6425_s1 = inlined_call_operand.vmem [shape: f32[19,16], index: 1, kind: input, shape index: {}]   ;;  %s6426_s2 = inlined_call_operand.vmem [shape: f32[2,352,16], index: 2, kind: input, shape index: {}]   ;;  %s6427_s3 = inlined_call_operand.hbm [shape: f32[2,2], index: 3, kind: output, shape index: {}]  }
   0x1   :  { %v15_v0 = vld [vmem:[%s6425_s1] sm:$0xff]  ;;  %v16_v1 = vld [vmem:[%s6425_s1 + $0x8] sm:$0xff]  ;;  %v108_v7 = vld [vmem:[%s6424_s0 + $0x10] sm:$0xff] }
   0x2   :  { %v106_v2 = vld [vmem:[%s6424_s0] sm:$0xff]  ;;  %v3471_v3 = vpack.c.bf16 %v16_v1, %v15_v0  ;;  %v107_v5 = vld [vmem:[%s6424_s0 + $0x8] sm:$0xff]  ;;  %v152_v8 = vld [vmem:[%s6424_s0 + $0x170] sm:$0xff] }
   0x3   :  { %3339 = vmatprep.mubr.msk.f32.mxu0 %vm198_vm0, %v106_v2  ;;  %v150_v4 = vld [vmem:[%s6424_s0 + $0x160] sm:$0xff]  ;;  %v151_v6 = vld [vmem:[%s6424_s0 + $0x168] sm:$0xff]  ;;  %v109_v9 = vld [vmem:[%s6424_s0 + $0x18] sm:$0xff] }
   0x4   :  { %3405 = vmatprep.mubr.msk.f32.mxu1 %vm198_vm0, %v150_v4  ;;  %3472 = vmatprep.subr.bf16.mxu0 %v3471_v3  ;;  %v153_v10 = vld [vmem:[%s6424_s0 + $0x178] sm:$0xff]  ;;  %v110_v11 = vld [vmem:[%s6424_s0 + $0x20] sm:$0xff]  ;;  %v111_v13 = vld [vmem:[%s6424_s0 + $0x28] sm:$0xff] }
   0x5   :  { %3475 = vmatprep.subr.bf16.mxu1 %v3471_v3  ;;  %3474 = vmatpush3.bf16.msra.mxu0 %v3471_v3  ;;  %v154_v12 = vld [vmem:[%s6424_s0 + $0x180] sm:$0xff]  ;;  %v155_v14 = vld [vmem:[%s6424_s0 + $0x188] sm:$0xff]  ;;  %v112_v15 = vld [vmem:[%s6424_s0 + $0x30] sm:$0xff] }
   0x6   :  { %3476 = vmatpush3.bf16.msra.mxu1 %v3471_v3  ;;  %v156_v16 = vld [vmem:[%s6424_s0 + $0x190] sm:$0xff]  ;;  %v113_v17 = vld [vmem:[%s6424_s0 + $0x38] sm:$0xff]  ;;  %v114_v19 = vld [vmem:[%s6424_s0 + $0x40] sm:$0xff] }
   0x7   :  { %v157_v18 = vld [vmem:[%s6424_s0 + $0x198] sm:$0xff]  ;;  %v158_v20 = vld [vmem:[%s6424_s0 + $0x1a0] sm:$0xff]  ;;  %v115_v21 = vld [vmem:[%s6424_s0 + $0x48] sm:$0xff] }
   0x8   :  { %3340 = vmatmul.mubr.msk.f32.vlgmr.msra.gmra.mrb[0].mxu0 %vm198_vm0, %v107_v5  ;;  %v159_v22 = vld [vmem:[%s6424_s0 + $0x1a8] sm:$0xff]  ;;  %v116_v23 = vld [vmem:[%s6424_s0 + $0x50] sm:$0xff]  ;;  %v117_v25 = vld [vmem:[%s6424_s0 + $0x58] sm:$0xff] }
   0x9   :  { %3406 = vmatmul.mubr.msk.f32.vlgmr.msra.gmra.mrb[0].mxu1 %vm198_vm0, %v151_v6  ;;  %3342 = vmatprep.mubr.msk.f32.mxu0 %vm198_vm0, %v108_v7  ;;  %v160_v24 = vld [vmem:[%s6424_s0 + $0x1b0] sm:$0xff]  ;;  %v161_v26 = vld [vmem:[%s6424_s0 + $0x1b8] sm:$0xff]  ;;  %v118_v27 = vld [vmem:[%s6424_s0 + $0x60] sm:$0xff] }
   0xa   :  { %3408 = vmatprep.mubr.msk.f32.mxu1 %vm198_vm0, %v152_v8  ;;  %v162_v28 = vld [vmem:[%s6424_s0 + $0x1c0] sm:$0xff]  ;;  %v119_v29 = vld [vmem:[%s6424_s0 + $0x68] sm:$0xff]  ;;  %v120_v31 = vld [vmem:[%s6424_s0 + $0x70] sm:$0xff] }
   0xb   :  { %v163_v30 = vld [vmem:[%s6424_s0 + $0x1c8] sm:$0xff]  ;;  %v164_v32 = vld [vmem:[%s6424_s0 + $0x1d0] sm:$0xff] }
   0xc   :  { %3343 = vmatmul.mubr.msk.f32.gmra.mrb[2].mxu0 %vm198_vm0, %v109_v9 }
   0xd   :  { %3409 = vmatmul.mubr.msk.f32.gmra.mrb[2].mxu1 %vm198_vm0, %v153_v10  ;;  %3345 = vmatprep.mubr.msk.f32.mxu0 %vm198_vm0, %v110_v11 }
   0xe   :  { %3411 = vmatprep.mubr.msk.f32.mxu1 %vm198_vm0, %v154_v12 }
  0x10   :  { %3346 = vmatmul.mubr.msk.f32.gmra.mrb[4].mxu0 %vm198_vm0, %v111_v13 }
  0x11   :  { %3412 = vmatmul.mubr.msk.f32.gmra.mrb[4].mxu1 %vm198_vm0, %v155_v14  ;;  %3348 = vmatprep.mubr.msk.f32.mxu0 %vm198_vm0, %v112_v15 }
  0x12   :  { %3414 = vmatprep.mubr.msk.f32.mxu1 %vm198_vm0, %v156_v16 }
  0x14   :  { %3349 = vmatmul.mubr.msk.f32.gmra.mrb[6].mxu0 %vm198_vm0, %v113_v17 }
  0x15   :  { %3415 = vmatmul.mubr.msk.f32.gmra.mrb[6].mxu1 %vm198_vm0, %v157_v18  ;;  %3351 = vmatprep.mubr.msk.f32.mxu0 %vm198_vm0, %v114_v19 }
  0x16   :  { %3417 = vmatprep.mubr.msk.f32.mxu1 %vm198_vm0, %v158_v20 }
  0x18   :  { %3352 = vmatmul.mubr.msk.f32.gmra.mrb[8].mxu0 %vm198_vm0, %v115_v21 }
  0x19   :  { %3418 = vmatmul.mubr.msk.f32.gmra.mrb[8].mxu1 %vm198_vm0, %v159_v22  ;;  %3354 = vmatprep.mubr.msk.f32.mxu0 %vm198_vm0, %v116_v23 }
  0x1a   :  { %3420 = vmatprep.mubr.msk.f32.mxu1 %vm198_vm0, %v160_v24 }
  0x1c   :  { %3355 = vmatmul.mubr.msk.f32.gmra.mrb[10].mxu0 %vm198_vm0, %v117_v25 }
  0x1d   :  { %3421 = vmatmul.mubr.msk.f32.gmra.mrb[10].mxu1 %vm198_vm0, %v161_v26  ;;  %3357 = vmatprep.mubr.msk.f32.mxu0 %vm198_vm0, %v118_v27 }
  0x1e   :  { %3423 = vmatprep.mubr.msk.f32.mxu1 %vm198_vm0, %v162_v28 }
  0x1f   :  { %8 = vsyncpa [#allocation3], 0  ;;  %v121_v33 = vld [vmem:[%s6424_s0 + $0x78] sm:$0xff]  ;;  %v122_v35 = vld [vmem:[%s6424_s0 + $0x80] sm:$0xff]  ;;  %v6428_v27 = vlaneseq }
  0x20   :  { %3358 = vmatmul.mubr.msk.f32.gmra.mrb[12].mxu0 %vm198_vm0, %v119_v29  ;;  %v165_v34 = vld [vmem:[%s6424_s0 + $0x1d8] sm:$0xff]  ;;  %v166_v36 = vld [vmem:[%s6424_s0 + $0x1e0] sm:$0xff]  ;;  %v123_v37 = vld [vmem:[%s6424_s0 + $0x88] sm:$0xff] }
  0x21   :  { %3424 = vmatmul.mubr.msk.f32.gmra.mrb[12].mxu1 %vm198_vm0, %v163_v30  ;;  %3360 = vmatprep.mubr.msk.f32.mxu0 %vm198_vm0, %v120_v31  ;;  %v167_v38 = vld [vmem:[%s6424_s0 + $0x1e8] sm:$0xff]  ;;  %v124_v39 = vld [vmem:[%s6424_s0 + $0x90] sm:$0xff]  ;;  %v125_v41 = vld [vmem:[%s6424_s0 + $0x98] sm:$0xff]  ;;  %v4059_v28 = vshrl.u32 %v6428_v27, 7 }
  0x22   :  { %3426 = vmatprep.mubr.msk.f32.mxu1 %vm198_vm0, %v164_v32  ;;  %v168_v40 = vld [vmem:[%s6424_s0 + $0x1f0] sm:$0xff]  ;;  %v169_v42 = vld [vmem:[%s6424_s0 + $0x1f8] sm:$0xff]  ;;  %v126_v43 = vld [vmem:[%s6424_s0 + $0xa0] sm:$0xff] }
  0x23   :  { %v170_v44 = vld [vmem:[%s6424_s0 + $0x200] sm:$0xff]  ;;  %v127_v45 = vld [vmem:[%s6424_s0 + $0xa8] sm:$0xff]  ;;  %v128_v47 = vld [vmem:[%s6424_s0 + $0xb0] sm:$0xff]  ;;  %6549 = vst [vmem:[#allocation5_spill] sm:$0xff] %v4059_v28  ;;  %v196_v29 = vsub.s32 0, %v4059_v28 }
  0x24   :  { %3361 = vmatmul.mubr.msk.f32.gmra.mrb[14].mxu0 %vm198_vm0, %v121_v33  ;;  %v171_v46 = vld [vmem:[%s6424_s0 + $0x208] sm:$0xff]  ;;  %v172_v48 = vld [vmem:[%s6424_s0 + $0x210] sm:$0xff]  ;;  %v129_v49 = vld [vmem:[%s6424_s0 + $0xb8] sm:$0xff] }
  0x25   :  { %3427 = vmatmul.mubr.msk.f32.gmra.mrb[14].mxu1 %vm198_vm0, %v165_v34  ;;  %3363 = vmatprep.mubr.msk.f32.mxu0 %vm198_vm0, %v122_v35  ;;  %v173_v50 = vld [vmem:[%s6424_s0 + $0x218] sm:$0xff]  ;;  %v130_v51 = vld [vmem:[%s6424_s0 + $0xc0] sm:$0xff]  ;;  %v131_v53 = vld [vmem:[%s6424_s0 + $0xc8] sm:$0xff] }
  0x26   :  { %3429 = vmatprep.mubr.msk.f32.mxu1 %vm198_vm0, %v166_v36  ;;  %v174_v52 = vld [vmem:[%s6424_s0 + $0x220] sm:$0xff]  ;;  %v175_v54 = vld [vmem:[%s6424_s0 + $0x228] sm:$0xff]  ;;  %v132_v55 = vld [vmem:[%s6424_s0 + $0xd0] sm:$0xff] }
  0x27   :  { %v176_v56 = vld [vmem:[%s6424_s0 + $0x230] sm:$0xff]  ;;  %v133_v57 = vld [vmem:[%s6424_s0 + $0xd8] sm:$0xff]  ;;  %v134_v59 = vld [vmem:[%s6424_s0 + $0xe0] sm:$0xff] }
  0x28   :  { %3364 = vmatmul.mubr.msk.f32.gmra.mrb[16].mxu0 %vm198_vm0, %v123_v37  ;;  %v177_v58 = vld [vmem:[%s6424_s0 + $0x238] sm:$0xff]  ;;  %v178_v60 = vld [vmem:[%s6424_s0 + $0x240] sm:$0xff]  ;;  %v135_v61 = vld [vmem:[%s6424_s0 + $0xe8] sm:$0xff] }
  0x29   :  { %3430 = vmatmul.mubr.msk.f32.gmra.mrb[16].mxu1 %vm198_vm0, %v167_v38  ;;  %3366 = vmatprep.mubr.msk.f32.mxu0 %vm198_vm0, %v124_v39  ;;  %v179_v62 = vld [vmem:[%s6424_s0 + $0x248] sm:$0xff]  ;;  %v136_v63 = vld [vmem:[%s6424_s0 + $0xf0] sm:$0xff]  ;;  %v137_v1 = vld [vmem:[%s6424_s0 + $0xf8] sm:$0xff] }
  0x2a   :  { %3432 = vmatprep.mubr.msk.f32.mxu1 %vm198_vm0, %v168_v40  ;;  %v180_v0 = vld [vmem:[%s6424_s0 + $0x250] sm:$0xff]  ;;  %v181_v2 = vld [vmem:[%s6424_s0 + $0x258] sm:$0xff]  ;;  %v138_v3 = vld [vmem:[%s6424_s0 + $0x100] sm:$0xff] }
  0x2b   :  { %v182_v4 = vld [vmem:[%s6424_s0 + $0x260] sm:$0xff]  ;;  %v139_v5 = vld [vmem:[%s6424_s0 + $0x108] sm:$0xff]  ;;  %v140_v7 = vld [vmem:[%s6424_s0 + $0x110] sm:$0xff] }
  0x2c   :  { %3367 = vmatmul.mubr.msk.f32.gmra.mrb[18].mxu0 %vm198_vm0, %v125_v41  ;;  %v183_v6 = vld [vmem:[%s6424_s0 + $0x268] sm:$0xff]  ;;  %v184_v8 = vld [vmem:[%s6424_s0 + $0x270] sm:$0xff]  ;;  %v141_v9 = vld [vmem:[%s6424_s0 + $0x118] sm:$0xff] }
  0x2d   :  { %3433 = vmatmul.mubr.msk.f32.gmra.mrb[18].mxu1 %vm198_vm0, %v169_v42  ;;  %3369 = vmatprep.mubr.msk.f32.mxu0 %vm198_vm0, %v126_v43  ;;  %v185_v10 = vld [vmem:[%s6424_s0 + $0x278] sm:$0xff]  ;;  %v142_v11 = vld [vmem:[%s6424_s0 + $0x120] sm:$0xff]  ;;  %v143_v13 = vld [vmem:[%s6424_s0 + $0x128] sm:$0xff] }
  0x2e   :  { %3435 = vmatprep.mubr.msk.f32.mxu1 %vm198_vm0, %v170_v44  ;;  %v186_v12 = vld [vmem:[%s6424_s0 + $0x280] sm:$0xff]  ;;  %v187_v14 = vld [vmem:[%s6424_s0 + $0x288] sm:$0xff]  ;;  %v144_v15 = vld [vmem:[%s6424_s0 + $0x130] sm:$0xff] }
  0x2f   :  { %v188_v16 = vld [vmem:[%s6424_s0 + $0x290] sm:$0xff]  ;;  %v145_v17 = vld [vmem:[%s6424_s0 + $0x138] sm:$0xff]  ;;  %v146_v19 = vld [vmem:[%s6424_s0 + $0x140] sm:$0xff] }
  0x30   :  { %3370 = vmatmul.mubr.msk.f32.gmra.mrb[20].mxu0 %vm198_vm0, %v127_v45  ;;  %v189_v18 = vld [vmem:[%s6424_s0 + $0x298] sm:$0xff]  ;;  %v190_v20 = vld [vmem:[%s6424_s0 + $0x2a0] sm:$0xff]  ;;  %v147_v21 = vld [vmem:[%s6424_s0 + $0x148] sm:$0xff] }
  0x31   :  { %3436 = vmatmul.mubr.msk.f32.gmra.mrb[20].mxu1 %vm198_vm0, %v171_v46  ;;  %3372 = vmatprep.mubr.msk.f32.mxu0 %vm198_vm0, %v128_v47  ;;  %v191_v22 = vld [vmem:[%s6424_s0 + $0x2a8] sm:$0xff]  ;;  %v148_v23 = vld [vmem:[%s6424_s0 + $0x150] sm:$0xff]  ;;  %v149_v25 = vld [vmem:[%s6424_s0 + $0x158] sm:$0xff] }
  0x32   :  { %3438 = vmatprep.mubr.msk.f32.mxu1 %vm198_vm0, %v172_v48  ;;  %v192_v24 = vld [vmem:[%s6424_s0 + $0x2b0] sm:$0xff]  ;;  %v193_v26 = vld [vmem:[%s6424_s0 + $0x2b8] sm:$0xff] }
  0x33   :  { %v17_v30 = vld [vmem:[%s6425_s1 + $0x10] sm:$0x7] }
  0x34   :  { %3373 = vmatmul.mubr.msk.f32.gmra.mrb[22].mxu0 %vm198_vm0, %v129_v49  ;;  %v4065_v31 = vrot.slane %v17_v30, %v196_v29 }
  0x35   :  { %3439 = vmatmul.mubr.msk.f32.gmra.mrb[22].mxu1 %vm198_vm0, %v173_v50  ;;  %3375 = vmatprep.mubr.msk.f32.mxu0 %vm198_vm0, %v130_v51 }
  0x36   :  { %3441 = vmatprep.mubr.msk.f32.mxu1 %vm198_vm0, %v174_v52 }
  0x38   :  { %3376 = vmatmul.mubr.msk.f32.gmra.mrb[24].mxu0 %vm198_vm0, %v131_v53 }
  0x39   :  { %3442 = vmatmul.mubr.msk.f32.gmra.mrb[24].mxu1 %vm198_vm0, %v175_v54  ;;  %3378 = vmatprep.mubr.msk.f32.mxu0 %vm198_vm0, %v132_v55 }
  0x3a   :  { %3444 = vmatprep.mubr.msk.f32.mxu1 %vm198_vm0, %v176_v56 }
  0x3c   :  { %3379 = vmatmul.mubr.msk.f32.gmra.mrb[26].mxu0 %vm198_vm0, %v133_v57 }
  0x3d   :  { %3445 = vmatmul.mubr.msk.f32.gmra.mrb[26].mxu1 %vm198_vm0, %v177_v58  ;;  %3381 = vmatprep.mubr.msk.f32.mxu0 %vm198_vm0, %v134_v59 }
  0x3e   :  { %3447 = vmatprep.mubr.msk.f32.mxu1 %vm198_vm0, %v178_v60 }
  0x40   :  { %3382 = vmatmul.mubr.msk.f32.gmra.mrb[28].mxu0 %vm198_vm0, %v135_v61 }
  0x41   :  { %3448 = vmatmul.mubr.msk.f32.gmra.mrb[28].mxu1 %vm198_vm0, %v179_v62  ;;  %3384 = vmatprep.mubr.msk.f32.mxu0 %vm198_vm0, %v136_v63 }
  0x42   :  { %3450 = vmatprep.mubr.msk.f32.mxu1 %vm198_vm0, %v180_v0 }
  0x44   :  { %3385 = vmatmul.mubr.msk.f32.gmra.mrb[30].mxu0 %vm198_vm0, %v137_v1 }
  0x45   :  { %3451 = vmatmul.mubr.msk.f32.gmra.mrb[30].mxu1 %vm198_vm0, %v181_v2  ;;  %3387 = vmatprep.mubr.msk.f32.mxu0 %vm198_vm0, %v138_v3 }
  0x46   :  { %3453 = vmatprep.mubr.msk.f32.mxu1 %vm198_vm0, %v182_v4 }
  0x48   :  { %3388 = vmatmul.mubr.msk.f32.gmra.mrb[32].mxu0 %vm198_vm0, %v139_v5 }
  0x49   :  { %3454 = vmatmul.mubr.msk.f32.gmra.mrb[32].mxu1 %vm198_vm0, %v183_v6  ;;  %3390 = vmatprep.mubr.msk.f32.mxu0 %vm198_vm0, %v140_v7 }
  0x4a   :  { %3456 = vmatprep.mubr.msk.f32.mxu1 %vm198_vm0, %v184_v8 }
  0x4c   :  { %3391 = vmatmul.mubr.msk.f32.gmra.mrb[34].mxu0 %vm198_vm0, %v141_v9 }
  0x4d   :  { %3457 = vmatmul.mubr.msk.f32.gmra.mrb[34].mxu1 %vm198_vm0, %v185_v10  ;;  %3393 = vmatprep.mubr.msk.f32.mxu0 %vm198_vm0, %v142_v11 }
  0x4e   :  { %3459 = vmatprep.mubr.msk.f32.mxu1 %vm198_vm0, %v186_v12 }
  0x50   :  { %3394 = vmatmul.mubr.msk.f32.gmra.mrb[36].mxu0 %vm198_vm0, %v143_v13 }
  0x51   :  { %3460 = vmatmul.mubr.msk.f32.gmra.mrb[36].mxu1 %vm198_vm0, %v187_v14  ;;  %3396 = vmatprep.mubr.msk.f32.mxu0 %vm198_vm0, %v144_v15 }
  0x52   :  { %3462 = vmatprep.mubr.msk.f32.mxu1 %vm198_vm0, %v188_v16 }
  0x54   :  { %3397 = vmatmul.mubr.msk.f32.gmra.mrb[38].mxu0 %vm198_vm0, %v145_v17 }
  0x55   :  { %3463 = vmatmul.mubr.msk.f32.gmra.mrb[38].mxu1 %vm198_vm0, %v189_v18  ;;  %3399 = vmatprep.mubr.msk.f32.mxu0 %vm198_vm0, %v146_v19 }
  0x56   :  { %3465 = vmatprep.mubr.msk.f32.mxu1 %vm198_vm0, %v190_v20 }
  0x58   :  { %3400 = vmatmul.mubr.msk.f32.gmra.mrb[40].mxu0 %vm198_vm0, %v147_v21 }
  0x59   :  { %3466 = vmatmul.mubr.msk.f32.gmra.mrb[40].mxu1 %vm198_vm0, %v191_v22  ;;  %3402 = vmatprep.mubr.msk.f32.mxu0 %vm198_vm0, %v148_v23 }
  0x5a   :  { %3468 = vmatprep.mubr.msk.f32.mxu1 %vm198_vm0, %v192_v24 }
  0x5c   :  { %3403 = vmatmul.mubr.msk.f32.gmra.mrb[42].mxu0 %vm198_vm0, %v149_v25 }
  0x5d   :  { %3469 = vmatmul.mubr.msk.f32.gmra.mrb[42].mxu1 %vm198_vm0, %v193_v26 }
  0xdb   :  { %v3341_v32 = vpop.f32.mrb[0].mxu0 }
  0xdc   :  { %v3407_v33 = vpop.f32.mrb[0].mxu1  ;;  %v4068_v34 = vadd.f32 %v3341_v32, %v4065_v31  ;;  %v529_v36 = vpop.f32.mrb[1].mxu0 }
  0xdd   :  { %v4071_v35 = vadd.f32 %v3407_v33, %v4065_v31  ;;  %v749_v37 = vpop.f32.mrb[1].mxu1  ;;  %v4074_v38 = vadd.f32 %v529_v36, %v4065_v31 }
  0xde   :  { %v4077_v39 = vadd.f32 %v749_v37, %v4065_v31  ;;  %v971_v41 = vsel %vm198_vm0, %v4068_v34, 0.0 }
  0xdf   :  { %v1103_v40 = vsel %vm198_vm0, %v4071_v35, 0.0  ;;  %972 = vadd.xlane.f32.xlu0 %v971_v41  ;;  %v3344_v42 = vpop.f32.mrb[2].mxu0  ;;  %v968_v49 = vsel %vm198_vm0, %v4074_v38, 0.0 }
  0xe0   :  { %1104 = vadd.xlane.f32.xlu1 %v1103_v40  ;;  %v3410_v43 = vpop.f32.mrb[2].mxu1  ;;  %v4084_v44 = vadd.f32 %v3344_v42, %v4065_v31  ;;  %v539_v47 = vpop.f32.mrb[3].mxu0  ;;  %v1100_v48 = vsel %vm198_vm0, %v4077_v39, 0.0 }
  0xe1   :  { %v4087_v45 = vadd.f32 %v3410_v43, %v4065_v31  ;;  %v759_v46 = vpop.f32.mrb[3].mxu1  ;;  %v4101_v57 = vadd.f32 %v539_v47, %v4065_v31 }
  0xe2   :  { %v977_v53 = vsel %vm198_vm0, %v4084_v44, 0.0  ;;  %v4098_v56 = vadd.f32 %v759_v46, %v4065_v31 }
  0xe3   :  { %969 = vadd.xlane.f32.xlu0 %v968_v49  ;;  %v3347_v50 = vpop.f32.mrb[4].mxu0  ;;  %v1109_v52 = vsel %vm198_vm0, %v4087_v45, 0.0  ;;  %v974_v1 = vsel %vm198_vm0, %v4101_v57, 0.0 }
  0xe4   :  { %1101 = vadd.xlane.f32.xlu1 %v1100_v48  ;;  %v3413_v51 = vpop.f32.mrb[4].mxu1  ;;  %v549_v55 = vpop.f32.mrb[5].mxu0  ;;  %v4104_v60 = vadd.f32 %v3347_v50, %v4065_v31  ;;  %v1106_v0 = vsel %vm198_vm0, %v4098_v56, 0.0 }
  0xe5   :  { %v769_v54 = vpop.f32.mrb[5].mxu1  ;;  %v4107_v61 = vadd.f32 %v3413_v51, %v4065_v31  ;;  %v4121_v9 = vadd.f32 %v549_v55, %v4065_v31 }
  0xe6   :  { %v983_v5 = vsel %vm198_vm0, %v4104_v60, 0.0  ;;  %v4118_v8 = vadd.f32 %v769_v54, %v4065_v31 }
  0xe7   :  { %978 = vadd.xlane.f32.xlu0 %v977_v53  ;;  %v3350_v58 = vpop.f32.mrb[6].mxu0  ;;  %v1115_v4 = vsel %vm198_vm0, %v4107_v61, 0.0  ;;  %6550 = vst [vmem:[#allocation6_spill] sm:$0xff] %v4121_v9  ;;  %v980_v17 = vsel %vm198_vm0, %v4121_v9, 0.0 }
  0xe8   :  { %1110 = vadd.xlane.f32.xlu1 %v1109_v52  ;;  %v3416_v59 = vpop.f32.mrb[6].mxu1  ;;  %v559_v63 = vpop.f32.mrb[7].mxu0  ;;  %v4124_v12 = vadd.f32 %v3350_v58, %v4065_v31  ;;  %v1112_v16 = vsel %vm198_vm0, %v4118_v8, 0.0 }
  0xe9   :  { %v779_v62 = vpop.f32.mrb[7].mxu1  ;;  %v4127_v13 = vadd.f32 %v3416_v59, %v4065_v31  ;;  %v4141_v25 = vadd.f32 %v559_v63, %v4065_v31 }
  0xea   :  { %6551 = vst [vmem:[#allocation7_spill] sm:$0xff] %v4124_v12  ;;  %v989_v21 = vsel %vm198_vm0, %v4124_v12, 0.0  ;;  %v4138_v24 = vadd.f32 %v779_v62, %v4065_v31 }
  0xeb   :  { %975 = vadd.xlane.f32.xlu0 %v974_v1  ;;  %v3353_v2 = vpop.f32.mrb[8].mxu0  ;;  %6552 = vst [vmem:[#allocation8_spill] sm:$0xff] %v4127_v13  ;;  %v1121_v20 = vsel %vm198_vm0, %v4127_v13, 0.0  ;;  %6554 = vst [vmem:[#allocation10_spill] sm:$0xff] %v4141_v25  ;;  %v986_v40 = vsel %vm198_vm0, %v4141_v25, 0.0 }
  0xec   :  { %1107 = vadd.xlane.f32.xlu1 %v1106_v0  ;;  %v3419_v3 = vpop.f32.mrb[8].mxu1  ;;  %v569_v7 = vpop.f32.mrb[9].mxu0  ;;  %6553 = vst [vmem:[#allocation9_spill] sm:$0xff] %v4138_v24  ;;  %v4144_v30 = vadd.f32 %v3353_v2, %v4065_v31  ;;  %v1118_v37 = vsel %vm198_vm0, %v4138_v24, 0.0 }
  0xed   :  { %v789_v6 = vpop.f32.mrb[9].mxu1  ;;  %v4147_v32 = vadd.f32 %v3419_v3, %v4065_v31  ;;  %v4173_v50 = vadd.f32 %v569_v7, %v4065_v31 }
  0xee   :  { %6555 = vst [vmem:[#allocation11_spill] sm:$0xff] %v4144_v30  ;;  %v995_v46 = vsel %vm198_vm0, %v4144_v30, 0.0  ;;  %v4170_v49 = vadd.f32 %v789_v6, %v4065_v31 }
  0xef   :  { %984 = vadd.xlane.f32.xlu0 %v983_v5  ;;  %v3356_v10 = vpop.f32.mrb[10].mxu0  ;;  %6556 = vst [vmem:[#allocation12_spill] sm:$0xff] %v4147_v32  ;;  %v1127_v43 = vsel %vm198_vm0, %v4147_v32, 0.0  ;;  %6558 = vst [vmem:[#allocation14_spill] sm:$0xff] %v4173_v50  ;;  %v992_v62 = vsel %vm198_vm0, %v4173_v50, 0.0 }
  0xf0   :  { %1116 = vadd.xlane.f32.xlu1 %v1115_v4  ;;  %v3422_v11 = vpop.f32.mrb[10].mxu1  ;;  %v579_v15 = vpop.f32.mrb[11].mxu0  ;;  %6557 = vst [vmem:[#allocation13_spill] sm:$0xff] %v4170_v49  ;;  %v4180_v53 = vadd.f32 %v3356_v10, %v4065_v31  ;;  %v1124_v59 = vsel %vm198_vm0, %v4170_v49, 0.0 }
  0xf1   :  { %v799_v14 = vpop.f32.mrb[11].mxu1  ;;  %v4183_v54 = vadd.f32 %v3422_v11, %v4065_v31  ;;  %v4209_v6 = vadd.f32 %v579_v15, %v4065_v31 }
  0xf2   :  { %6559 = vst [vmem:[#allocation15_spill] sm:$0xff] %v4180_v53  ;;  %v1001_v2 = vsel %vm198_vm0, %v4180_v53, 0.0  ;;  %v4206_v5 = vadd.f32 %v799_v14, %v4065_v31 }
  0xf3   :  { %981 = vadd.xlane.f32.xlu0 %v980_v17  ;;  %v3359_v18 = vpop.f32.mrb[12].mxu0  ;;  %6560 = vst [vmem:[#allocation16_spill] sm:$0xff] %v4183_v54  ;;  %v1133_v1 = vsel %vm198_vm0, %v4183_v54, 0.0  ;;  %6562 = vst [vmem:[#allocation18_spill] sm:$0xff] %v4209_v6  ;;  %v998_v15 = vsel %vm198_vm0, %v4209_v6, 0.0 }
  0xf4   :  { %1113 = vadd.xlane.f32.xlu1 %v1112_v16  ;;  %v3425_v19 = vpop.f32.mrb[12].mxu1  ;;  %v589_v23 = vpop.f32.mrb[13].mxu0  ;;  %6561 = vst [vmem:[#allocation17_spill] sm:$0xff] %v4206_v5  ;;  %v4216_v11 = vadd.f32 %v3359_v18, %v4065_v31  ;;  %v1130_v14 = vsel %vm198_vm0, %v4206_v5, 0.0 }
  0xf5   :  { %v809_v22 = vpop.f32.mrb[13].mxu1  ;;  %v4219_v16 = vadd.f32 %v3425_v19, %v4065_v31 }
  0xf6   :  { %6563 = vst [vmem:[#allocation19_spill] sm:$0xff] %v4216_v11  ;;  %v1007_v19 = vsel %vm198_vm0, %v4216_v11, 0.0 }
  0xf7   :  { %990 = vadd.xlane.f32.xlu0 %v989_v21  ;;  %v3362_v26 = vpop.f32.mrb[14].mxu0  ;;  %6564 = vst [vmem:[#allocation20_spill] sm:$0xff] %v4219_v16  ;;  %v1139_v18 = vsel %vm198_vm0, %v4219_v16, 0.0 }
  0xf8   :  { %1122 = vadd.xlane.f32.xlu1 %v1121_v20  ;;  %v3428_v29 = vpop.f32.mrb[14].mxu1  ;;  %v4151_v36 = vpop.f32.mrb[15].mxu0 }
  0xf9   :  { %v4149_v33 = vpop.f32.mrb[15].mxu1 }
  0xfb   :  { %987 = vadd.xlane.f32.xlu0 %v986_v40  ;;  %v4157_v41 = vpop.f32.mrb[16].mxu0 }
  0xfc   :  { %1119 = vadd.xlane.f32.xlu1 %v1118_v37  ;;  %v4159_v42 = vpop.f32.mrb[16].mxu1  ;;  %v4167_v48 = vpop.f32.mrb[17].mxu0 }
  0xfd   :  { %v4165_v47 = vpop.f32.mrb[17].mxu1 }
  0xff   :  { %996 = vadd.xlane.f32.xlu0 %v995_v46  ;;  %v4175_v51 = vpop.f32.mrb[18].mxu0  ;;  %v4242_v46 = vadd.f32 %v809_v22, %v4065_v31 }
 0x100   :  { %1128 = vadd.xlane.f32.xlu1 %v1127_v43  ;;  %v4177_v52 = vpop.f32.mrb[18].mxu1  ;;  %v4187_v58 = vpop.f32.mrb[19].mxu0 }
 0x101   :  { %v4185_v55 = vpop.f32.mrb[19].mxu1  ;;  %6565 = vst [vmem:[#allocation21_spill] sm:$0xff] %v4242_v46  ;;  %v1136_v22 = vsel %vm198_vm0, %v4242_v46, 0.0  ;;  %v4279_v46 = vadd.f32 %v4149_v33, %v4065_v31 }
 0x103   :  { %993 = vadd.xlane.f32.xlu0 %v992_v62  ;;  %v4193_v63 = vpop.f32.mrb[20].mxu0  ;;  %6569 = vst [vmem:[#allocation25_spill] sm:$0xff] %v4279_v46 }
 0x104   :  { %1125 = vadd.xlane.f32.xlu1 %v1124_v59  ;;  %v4195_v0 = vpop.f32.mrb[20].mxu1  ;;  %v4203_v4 = vpop.f32.mrb[21].mxu0  ;;  %v4245_v59 = vadd.f32 %v589_v23, %v4065_v31 }
 0x105   :  { %v4201_v3 = vpop.f32.mrb[21].mxu1 }
 0x106   :  { %6566 = vst [vmem:[#allocation22_spill] sm:$0xff] %v4245_v59  ;;  %v1004_v23 = vsel %vm198_vm0, %v4245_v59, 0.0  ;;  %v4295_v59 = vadd.f32 %v4159_v42, %v4065_v31 }
 0x107   :  { %1002 = vadd.xlane.f32.xlu0 %v1001_v2  ;;  %v4211_v7 = vpop.f32.mrb[22].mxu0  ;;  %v4252_v2 = vadd.f32 %v3362_v26, %v4065_v31 }
 0x108   :  { %1134 = vadd.xlane.f32.xlu1 %v1133_v1  ;;  %v4213_v10 = vpop.f32.mrb[22].mxu1  ;;  %v4223_v20 = vpop.f32.mrb[23].mxu0  ;;  %6572 = vst [vmem:[#allocation28_spill] sm:$0xff] %v4295_v59  ;;  %v1151_v42 = vsel %vm198_vm0, %v4295_v59, 0.0 }
 0x109   :  { %v4221_v17 = vpop.f32.mrb[23].mxu1  ;;  %6567 = vst [vmem:[#allocation23_spill] sm:$0xff] %v4252_v2  ;;  %v4435_v9 = vadd.f32 %v4223_v20, %v4065_v31 }
 0x10b   :  { %999 = vadd.xlane.f32.xlu0 %v998_v15  ;;  %v4229_v21 = vpop.f32.mrb[24].mxu0 }
 0x10c   :  { %1131 = vadd.xlane.f32.xlu1 %v1130_v14  ;;  %v4231_v37 = vpop.f32.mrb[24].mxu1  ;;  %v4239_v43 = vpop.f32.mrb[25].mxu0  ;;  %v4255_v14 = vadd.f32 %v3428_v29, %v4065_v31  ;;  %v1013_v29 = vsel %vm198_vm0, %v4252_v2, 0.0  ;;  %v4291_v2 = vadd.f32 %v4157_v41, %v4065_v31 }
 0x10d   :  { %v4237_v40 = vpop.f32.mrb[25].mxu1 }
 0x10e   :  { %6568 = vst [vmem:[#allocation24_spill] sm:$0xff] %v4255_v14  ;;  %v1145_v26 = vsel %vm198_vm0, %v4255_v14, 0.0  ;;  %6571 = vst [vmem:[#allocation27_spill] sm:$0xff] %v4291_v2  ;;  %v1019_v6 = vsel %vm198_vm0, %v4291_v2, 0.0  ;;  %v4331_v2 = vadd.f32 %v4175_v51, %v4065_v31 }
 0x10f   :  { %1008 = vadd.xlane.f32.xlu0 %v1007_v19  ;;  %v4247_v62 = vpop.f32.mrb[26].mxu0 }
 0x110   :  { %1140 = vadd.xlane.f32.xlu1 %v1139_v18  ;;  %v4249_v1 = vpop.f32.mrb[26].mxu1  ;;  %v4259_v27 = vpop.f32.mrb[27].mxu0  ;;  %6575 = vst [vmem:[#allocation31_spill] sm:$0xff] %v4331_v2  ;;  %v1025_v50 = vsel %vm198_vm0, %v4331_v2, 0.0  ;;  %v4371_v2 = vadd.f32 %v4193_v63, %v4065_v31 }
 0x111   :  { %v4257_v15 = vpop.f32.mrb[27].mxu1 }
 0x112   :  { %6579 = vst [vmem:[#allocation35_spill] sm:$0xff] %v4371_v2  ;;  %v1031_v25 = vsel %vm198_vm0, %v4371_v2, 0.0  ;;  %v4411_v2 = vadd.f32 %v4211_v7, %v4065_v31 }
 0x113   :  { %1005 = vadd.xlane.f32.xlu0 %v1004_v23  ;;  %v4265_v18 = vpop.f32.mrb[28].mxu0 }
 0x114   :  { %1137 = vadd.xlane.f32.xlu1 %v1136_v22  ;;  %v4267_v19 = vpop.f32.mrb[28].mxu1  ;;  %v4275_v11 = vpop.f32.mrb[29].mxu0  ;;  %v4283_v22 = vadd.f32 %v4151_v36, %v4065_v31  ;;  %v1142_v36 = vsel %vm198_vm0, %v4279_v46, 0.0  ;;  %v4319_v46 = vadd.f32 %v4165_v47, %v4065_v31  ;;  %6581 = vst [vmem:[#allocation37_spill] sm:$0xff] %v4411_v2 }
 0x115   :  { %v4273_v28 = vpop.f32.mrb[29].mxu1 }
 0x116   :  { %6570 = vst [vmem:[#allocation26_spill] sm:$0xff] %v4283_v22  ;;  %6573 = vst [vmem:[#allocation29_spill] sm:$0xff] %v4319_v46 }
 0x117   :  { %1014 = vadd.xlane.f32.xlu0 %v1013_v29  ;;  %v4285_v23 = vpop.f32.mrb[30].mxu0 }
 0x118   :  { %1146 = vadd.xlane.f32.xlu1 %v1145_v26  ;;  %v4287_v14 = vpop.f32.mrb[30].mxu1  ;;  %v4299_v16 = vpop.f32.mrb[31].mxu0  ;;  %v1010_v26 = vsel %vm198_vm0, %v4283_v22, 0.0  ;;  %v4335_v22 = vadd.f32 %v4177_v52, %v4065_v31 }
 0x119   :  { %v4297_v33 = vpop.f32.mrb[31].mxu1 }
 0x11a   :  { %6576 = vst [vmem:[#allocation32_spill] sm:$0xff] %v4335_v22  ;;  %v1157_v52 = vsel %vm198_vm0, %v4335_v22, 0.0 }
 0x11b   :  { %1011 = vadd.xlane.f32.xlu0 %v1010_v26  ;;  %v4305_v29 = vpop.f32.mrb[32].mxu0 }
 0x11c   :  { %1143 = vadd.xlane.f32.xlu1 %v1142_v36  ;;  %v4307_v41 = vpop.f32.mrb[32].mxu1  ;;  %v4315_v53 = vpop.f32.mrb[33].mxu0  ;;  %v4323_v36 = vadd.f32 %v4167_v48, %v4065_v31  ;;  %v1148_v48 = vsel %vm198_vm0, %v4319_v46, 0.0  ;;  %v4359_v46 = vadd.f32 %v4185_v55, %v4065_v31 }
 0x11d   :  { %v4313_v5 = vpop.f32.mrb[33].mxu1 }
 0x11e   :  { %6574 = vst [vmem:[#allocation30_spill] sm:$0xff] %v4323_v36  ;;  %6577 = vst [vmem:[#allocation33_spill] sm:$0xff] %v4359_v46 }
 0x11f   :  { %1020 = vadd.xlane.f32.xlu0 %v1019_v6  ;;  %v4325_v26 = vpop.f32.mrb[34].mxu0  ;;  %v1016_v6 = vsel %vm198_vm0, %v4323_v36, 0.0  ;;  %v4375_v36 = vadd.f32 %v4195_v0, %v4065_v31 }
 0x120   :  { %1152 = vadd.xlane.f32.xlu1 %v1151_v42  ;;  %v4327_v59 = vpop.f32.mrb[34].mxu1  ;;  %v4339_v54 = vpop.f32.mrb[35].mxu0 }
 0x121   :  { %v4337_v47 = vpop.f32.mrb[35].mxu1  ;;  %6580 = vst [vmem:[#allocation36_spill] sm:$0xff] %v4375_v36  ;;  %v1163_v0 = vsel %vm198_vm0, %v4375_v36, 0.0 }
 0x123   :  { %1017 = vadd.xlane.f32.xlu0 %v1016_v6  ;;  %v4345_v42 = vpop.f32.mrb[36].mxu0 }
 0x124   :  { %1149 = vadd.xlane.f32.xlu1 %v1148_v48  ;;  %v4347_v51 = vpop.f32.mrb[36].mxu1  ;;  %v4355_v30 = vpop.f32.mrb[37].mxu0  ;;  %v4363_v48 = vadd.f32 %v4187_v58, %v4065_v31  ;;  %v1154_v58 = vsel %vm198_vm0, %v4359_v46, 0.0  ;;  %v4399_v46 = vadd.f32 %v4201_v3, %v4065_v31 }
 0x125   :  { %v4353_v49 = vpop.f32.mrb[37].mxu1 }
 0x126   :  { %6578 = vst [vmem:[#allocation34_spill] sm:$0xff] %v4363_v48 }
 0x127   :  { %1026 = vadd.xlane.f32.xlu0 %v1025_v50  ;;  %v4365_v6 = vpop.f32.mrb[38].mxu0  ;;  %v1022_v50 = vsel %vm198_vm0, %v4363_v48, 0.0  ;;  %v4415_v48 = vadd.f32 %v4213_v10, %v4065_v31  ;;  %v4431_v10 = vadd.f32 %v4221_v17, %v4065_v31  ;;  %v1034_v17 = vsel %vm198_vm0, %v4435_v9, 0.0 }
 0x128   :  { %1158 = vadd.xlane.f32.xlu1 %v1157_v52  ;;  %v4367_v22 = vpop.f32.mrb[38].mxu1  ;;  %v4379_v32 = vpop.f32.mrb[39].mxu0 }
 0x129   :  { %v4377_v55 = vpop.f32.mrb[39].mxu1  ;;  %v1169_v7 = vsel %vm198_vm0, %v4415_v48, 0.0 }
 0x12b   :  { %1023 = vadd.xlane.f32.xlu0 %v1022_v50  ;;  %v4385_v52 = vpop.f32.mrb[40].mxu0 }
 0x12c   :  { %1155 = vadd.xlane.f32.xlu1 %v1154_v58  ;;  %v4387_v63 = vpop.f32.mrb[40].mxu1  ;;  %v4395_v12 = vpop.f32.mrb[41].mxu0  ;;  %v4403_v58 = vadd.f32 %v4203_v4, %v4065_v31  ;;  %v1160_v4 = vsel %vm198_vm0, %v4399_v46, 0.0 }
 0x12d   :  { %v4393_v24 = vpop.f32.mrb[41].mxu1 }
 0x12f   :  { %1032 = vadd.xlane.f32.xlu0 %v1031_v25  ;;  %v4405_v50 = vpop.f32.mrb[42].mxu0  ;;  %v1028_v25 = vsel %vm198_vm0, %v4403_v58, 0.0 }
 0x130   :  { %1164 = vadd.xlane.f32.xlu1 %v1163_v0  ;;  %v4407_v36 = vpop.f32.mrb[42].mxu1  ;;  %v4419_v13 = vpop.f32.mrb[43].mxu0  ;;  %v1037_v0 = vsel %vm198_vm0, %v4411_v2, 0.0  ;;  %v1166_v2 = vsel %vm198_vm0, %v4431_v10, 0.0 }
 0x131   :  { %v4417_v3 = vpop.f32.mrb[43].mxu1 }
 0x133   :  { %1029 = vadd.xlane.f32.xlu0 %v1028_v25  ;;  %v4443_v25 = vadd.f32 %v4231_v37, %v4065_v31  ;;  %v4459_v37 = vadd.f32 %v4239_v43, %v4065_v31 }
 0x134   :  { %1161 = vadd.xlane.f32.xlu1 %v1160_v4  ;;  %v4439_v4 = vadd.f32 %v4229_v21, %v4065_v31  ;;  %v4455_v21 = vadd.f32 %v4237_v40, %v4065_v31 }
 0x135   :  { %v1175_v20 = vsel %vm198_vm0, %v4443_v25, 0.0  ;;  %v1040_v40 = vsel %vm198_vm0, %v4459_v37, 0.0 }
 0x137   :  { %1038 = vadd.xlane.f32.xlu0 %v1037_v0  ;;  %v4467_v0 = vadd.f32 %v4249_v1, %v4065_v31  ;;  %v4483_v1 = vadd.f32 %v4259_v27, %v4065_v31 }
 0x138   :  { %1170 = vadd.xlane.f32.xlu1 %v1169_v7  ;;  %v1043_v7 = vsel %vm198_vm0, %v4439_v4, 0.0 }
 0x139   :  { %v1181_v43 = vsel %vm198_vm0, %v4467_v0, 0.0 }
 0x13b   :  { %1035 = vadd.xlane.f32.xlu0 %v1034_v17  ;;  %v1172_v17 = vsel %vm198_vm0, %v4455_v21, 0.0 }
 0x13c   :  { %1167 = vadd.xlane.f32.xlu1 %v1166_v2  ;;  %v4463_v2 = vadd.f32 %v4247_v62, %v4065_v31  ;;  %v4479_v62 = vadd.f32 %v4257_v15, %v4065_v31  ;;  %v1046_v15 = vsel %vm198_vm0, %v4483_v1, 0.0 }
 0x13f   :  { %1044 = vadd.xlane.f32.xlu0 %v1043_v7  ;;  %v4487_v7 = vadd.f32 %v4265_v18, %v4065_v31  ;;  %v4503_v18 = vadd.f32 %v4273_v28, %v4065_v31 }
 0x140   :  { %1176 = vadd.xlane.f32.xlu1 %v1175_v20  ;;  %v1049_v20 = vsel %vm198_vm0, %v4463_v2, 0.0 }
 0x143   :  { %1041 = vadd.xlane.f32.xlu0 %v1040_v40  ;;  %v1178_v40 = vsel %vm198_vm0, %v4479_v62, 0.0 }
 0x144   :  { %1173 = vadd.xlane.f32.xlu1 %v1172_v17  ;;  %v4491_v17 = vadd.f32 %v4267_v19, %v4065_v31  ;;  %v4507_v19 = vadd.f32 %v4275_v11, %v4065_v31 }
 0x146   :  { %v1187_v27 = vsel %vm198_vm0, %v4491_v17, 0.0  ;;  %v1052_v28 = vsel %vm198_vm0, %v4507_v19, 0.0 }
 0x147   :  { %1050 = vadd.xlane.f32.xlu0 %v1049_v20  ;;  %v4511_v20 = vadd.f32 %v4285_v23, %v4065_v31  ;;  %v4527_v23 = vadd.f32 %v4297_v33, %v4065_v31 }
 0x148   :  { %1182 = vadd.xlane.f32.xlu1 %v1181_v43  ;;  %v1055_v43 = vsel %vm198_vm0, %v4487_v7, 0.0 }
 0x14b   :  { %1047 = vadd.xlane.f32.xlu0 %v1046_v15  ;;  %v1184_v15 = vsel %vm198_vm0, %v4503_v18, 0.0 }
 0x14c   :  { %1179 = vadd.xlane.f32.xlu1 %v1178_v40  ;;  %v4515_v40 = vadd.f32 %v4287_v14, %v4065_v31  ;;  %v4531_v14 = vadd.f32 %v4299_v16, %v4065_v31 }
 0x14e   :  { %v1193_v11 = vsel %vm198_vm0, %v4515_v40, 0.0  ;;  %v1058_v33 = vsel %vm198_vm0, %v4531_v14, 0.0 }
 0x14f   :  { %1056 = vadd.xlane.f32.xlu0 %v1055_v43  ;;  %v4535_v43 = vadd.f32 %v4305_v29, %v4065_v31  ;;  %v4551_v29 = vadd.f32 %v4313_v5, %v4065_v31 }
 0x150   :  { %1188 = vadd.xlane.f32.xlu1 %v1187_v27  ;;  %v1061_v27 = vsel %vm198_vm0, %v4511_v20, 0.0 }
 0x153   :  { %1053 = vadd.xlane.f32.xlu0 %v1052_v28  ;;  %v1190_v28 = vsel %vm198_vm0, %v4527_v23, 0.0 }
 0x154   :  { %1185 = vadd.xlane.f32.xlu1 %v1184_v15  ;;  %v4539_v15 = vadd.f32 %v4307_v41, %v4065_v31  ;;  %v4555_v41 = vadd.f32 %v4315_v53, %v4065_v31 }
 0x156   :  { %v1199_v16 = vsel %vm198_vm0, %v4539_v15, 0.0  ;;  %v1064_v5 = vsel %vm198_vm0, %v4555_v41, 0.0 }
 0x157   :  { %1062 = vadd.xlane.f32.xlu0 %v1061_v27  ;;  %v4559_v27 = vadd.f32 %v4325_v26, %v4065_v31  ;;  %v4575_v26 = vadd.f32 %v4337_v47, %v4065_v31 }
 0x158   :  { %1194 = vadd.xlane.f32.xlu1 %v1193_v11  ;;  %v1067_v11 = vsel %vm198_vm0, %v4535_v43, 0.0 }
 0x159   :  { %6582 = vst [vmem:[#allocation38_spill] sm:$0xff] %v4559_v27  ;;  %6584 = vst [vmem:[#allocation40_spill] sm:$0xff] %v4575_v26 }
 0x15b   :  { %1059 = vadd.xlane.f32.xlu0 %v1058_v33  ;;  %v1196_v33 = vsel %vm198_vm0, %v4551_v29, 0.0 }
 0x15c   :  { %1191 = vadd.xlane.f32.xlu1 %v1190_v28  ;;  %v4563_v28 = vadd.f32 %v4327_v59, %v4065_v31  ;;  %v4579_v59 = vadd.f32 %v4339_v54, %v4065_v31 }
 0x15e   :  { %6583 = vst [vmem:[#allocation39_spill] sm:$0xff] %v4563_v28  ;;  %v1205_v53 = vsel %vm198_vm0, %v4563_v28, 0.0  ;;  %6585 = vst [vmem:[#allocation41_spill] sm:$0xff] %v4579_v59  ;;  %v1070_v47 = vsel %vm198_vm0, %v4579_v59, 0.0  ;;  %v4607_v59 = vadd.f32 %v4365_v6, %v4065_v31 }
 0x15f   :  { %1068 = vadd.xlane.f32.xlu0 %v1067_v11  ;;  %v4583_v11 = vadd.f32 %v4345_v42, %v4065_v31 }
 0x160   :  { %1200 = vadd.xlane.f32.xlu1 %v1199_v16  ;;  %v1073_v16 = vsel %vm198_vm0, %v4559_v27, 0.0  ;;  %6590 = vst [vmem:[#allocation46_spill] sm:$0xff] %v4607_v59  ;;  %v1085_v6 = vsel %vm198_vm0, %v4607_v59, 0.0 }
 0x161   :  { %6586 = vst [vmem:[#allocation42_spill] sm:$0xff] %v4583_v11  ;;  %v1079_v42 = vsel %vm198_vm0, %v4583_v11, 0.0 }
 0x163   :  { %1065 = vadd.xlane.f32.xlu0 %v1064_v5  ;;  %v1202_v5 = vsel %vm198_vm0, %v4575_v26, 0.0 }
 0x164   :  { %1197 = vadd.xlane.f32.xlu1 %v1196_v33  ;;  %v4587_v33 = vadd.f32 %v4347_v51, %v4065_v31  ;;  %v4599_v51 = vadd.f32 %v4353_v49, %v4065_v31 }
 0x166   :  { %6587 = vst [vmem:[#allocation43_spill] sm:$0xff] %v4587_v33  ;;  %6588 = vst [vmem:[#allocation44_spill] sm:$0xff] %v4599_v51  ;;  %v1208_v49 = vsel %vm198_vm0, %v4599_v51, 0.0  ;;  %v4627_v51 = vadd.f32 %v4379_v32, %v4065_v31 }
 0x167   :  { %1074 = vadd.xlane.f32.xlu0 %v1073_v16  ;;  %v4603_v16 = vadd.f32 %v4355_v30, %v4065_v31 }
 0x168   :  { %1206 = vadd.xlane.f32.xlu1 %v1205_v53  ;;  %v1211_v53 = vsel %vm198_vm0, %v4587_v33, 0.0  ;;  %v4611_v33 = vadd.f32 %v4367_v22, %v4065_v31  ;;  %v4623_v22 = vadd.f32 %v4377_v55, %v4065_v31  ;;  %6593 = vst [vmem:[#allocation49_spill] sm:$0xff] %v4627_v51  ;;  %v1082_v59 = vsel %vm198_vm0, %v4627_v51, 0.0 }
 0x169   :  { %6589 = vst [vmem:[#allocation45_spill] sm:$0xff] %v4603_v16  ;;  %v1076_v11 = vsel %vm198_vm0, %v4603_v16, 0.0  ;;  %v4631_v16 = vadd.f32 %v4385_v52, %v4065_v31  ;;  %v4655_v51 = vadd.f32 %v4405_v50, %v4065_v31 }
 0x16a   :  { %6591 = vst [vmem:[#allocation47_spill] sm:$0xff] %v4611_v33  ;;  %6592 = vst [vmem:[#allocation48_spill] sm:$0xff] %v4623_v22  ;;  %v1214_v55 = vsel %vm198_vm0, %v4623_v22, 0.0  ;;  %v4651_v22 = vadd.f32 %v4395_v12, %v4065_v31 }
 0x16b   :  { %1071 = vadd.xlane.f32.xlu0 %v1070_v47  ;;  %6594 = vst [vmem:[#allocation50_spill] sm:$0xff] %v4631_v16  ;;  %v1091_v52 = vsel %vm198_vm0, %v4631_v16, 0.0 }
 0x16c   :  { %1203 = vadd.xlane.f32.xlu1 %v1202_v5  ;;  %v973_v27 = vpop.xlane.xlu0 %972  ;;  %v1088_v12 = vsel %vm198_vm0, %v4651_v22, 0.0 }
 0x16d   :  { %v1105_v54 = vpop.xlane.xlu1 %1104  ;;  %v1234_v16 = vmul.f32 0.0625, %v973_v27 }
 0x16e   :  { %v1278_v27 = vmul.f32 0.0625, %v1105_v54 }
 0x16f   :  { %1080 = vadd.xlane.f32.xlu0 %v1079_v42  ;;  %v1217_v42 = vsel %vm198_vm0, %v4611_v33, 0.0  ;;  %v4635_v33 = vadd.f32 %v4387_v63, %v4065_v31  ;;  %v4647_v63 = vadd.f32 %v4393_v24, %v4065_v31  ;;  %v4674_v28 = vsub.f32 %v4068_v34, %v1234_v16 }
 0x170   :  { %1212 = vadd.xlane.f32.xlu1 %v1211_v53  ;;  %v970_v47 = vpop.xlane.xlu0 %969  ;;  %v4692_v34 = vsub.f32 %v4071_v35, %v1278_v27 }
 0x171   :  { %v1102_v5 = vpop.xlane.xlu1 %1101  ;;  %6595 = vst [vmem:[#allocation51_spill] sm:$0xff] %v4635_v33  ;;  %6596 = vst [vmem:[#allocation52_spill] sm:$0xff] %v4647_v63  ;;  %v1233_v26 = vmul.f32 0.0625, %v970_v47  ;;  %v1220_v24 = vsel %vm198_vm0, %v4647_v63, 0.0 }
 0x172   :  { %v1277_v47 = vmul.f32 0.0625, %v1102_v5 }
 0x173   :  { %1077 = vadd.xlane.f32.xlu0 %v1076_v11  ;;  %v4677_v63 = vsub.f32 %v4074_v38, %v1233_v26 }
 0x174   :  { %1209 = vadd.xlane.f32.xlu1 %v1208_v49  ;;  %v979_v53 = vpop.xlane.xlu0 %978  ;;  %v4695_v38 = vsub.f32 %v4077_v39, %v1277_v47 }
 0x175   :  { %v1111_v30 = vpop.xlane.xlu1 %1110  ;;  %6598 = vst [vmem:[#allocation54_spill] sm:$0xff] %v4677_v63  ;;  %v1236_v16 = vmul.f32 0.0625, %v979_v53  ;;  %v1409_v5 = vmul.f32 %v4677_v63, %v4677_v63 }
 0x176   :  { %6599 = vst [vmem:[#allocation55_spill] sm:$0xff] %v4695_v38  ;;  %v1280_v26 = vmul.f32 0.0625, %v1111_v30 }
 0x177   :  { %1086 = vadd.xlane.f32.xlu0 %v1085_v6  ;;  %v1223_v6 = vsel %vm198_vm0, %v4635_v33, 0.0  ;;  %v4659_v33 = vadd.f32 %v4407_v36, %v4065_v31  ;;  %v1097_v36 = vsel %vm198_vm0, %v4655_v51, 0.0  ;;  %v4713_v53 = vsub.f32 %v4084_v44, %v1236_v16 }
 0x178   :  { %1218 = vadd.xlane.f32.xlu1 %v1217_v42  ;;  %v976_v11 = vpop.xlane.xlu0 %975  ;;  %v4710_v30 = vsub.f32 %v4087_v45, %v1280_v26 }
 0x179   :  { %v1108_v49 = vpop.xlane.xlu1 %1107  ;;  %6597 = vst [vmem:[#allocation53_spill] sm:$0xff] %v4659_v33  ;;  %v1229_v50 = vsel %vm198_vm0, %v4659_v33, 0.0  ;;  %6601 = vst [vmem:[#allocation57_spill] sm:$0xff] %v4713_v53  ;;  %v1235_v47 = vmul.f32 0.0625, %v976_v11 }
 0x17a   :  { %6600 = vst [vmem:[#allocation56_spill] sm:$0xff] %v4710_v30  ;;  %v1279_v27 = vmul.f32 0.0625, %v1108_v49  ;;  %v1456_v16 = vmul.f32 %v4710_v30, %v4710_v30 }
 0x17b   :  { %1083 = vadd.xlane.f32.xlu0 %v1082_v59  ;;  %v4731_v11 = vsub.f32 %v4101_v57, %v1235_v47 }
 0x17c   :  { %1215 = vadd.xlane.f32.xlu1 %v1214_v55  ;;  %v985_v42 = vpop.xlane.xlu0 %984  ;;  %v4728_v49 = vsub.f32 %v4098_v56, %v1279_v27  ;;  %v1638_v30 = vsel %vm198_vm0, %v1456_v16, 0.0 }
 0x17d   :  { %v1117_v32 = vpop.xlane.xlu1 %1116 }
 0x17f   :  { %1092 = vadd.xlane.f32.xlu0 %v1091_v52 }
 0x180   :  { %1224 = vadd.xlane.f32.xlu1 %v1223_v6  ;;  %v982_v59 = vpop.xlane.xlu0 %981 }
 0x181   :  { %v1114_v55 = vpop.xlane.xlu1 %1113 }
 0x183   :  { %1089 = vadd.xlane.f32.xlu0 %v1088_v12  ;;  %v4685_v12 = vadd.f32 %v4419_v13, %v4065_v31  ;;  %v1410_v13 = vmul.f32 %v4674_v28, %v4674_v28 }
 0x184   :  { %1221 = vadd.xlane.f32.xlu1 %v1220_v24  ;;  %v4667_v52 = vpop.xlane.xlu0 %990  ;;  %v4681_v24 = vadd.f32 %v4417_v3, %v4065_v31 }
 0x185   :  { %v4665_v6 = vpop.xlane.xlu1 %1122  ;;  %v1094_v31 = vsel %vm198_vm0, %v4685_v12, 0.0  ;;  %v1240_v47 = vmul.f32 0.0625, %v4667_v52  ;;  %v6608_v52 = vld [vmem:[#allocation7_spill] sm:$0xff] }
 0x186   :  { %v1226_v3 = vsel %vm198_vm0, %v4681_v24, 0.0 }
 0x187   :  { %1098 = vadd.xlane.f32.xlu0 %v1097_v36  ;;  %v1453_v36 = vmul.f32 %v4695_v38, %v4695_v38  ;;  %v1412_v38 = vmul.f32 %v4713_v53, %v4713_v53 }
 0x188   :  { %1230 = vadd.xlane.f32.xlu1 %v1229_v50  ;;  %v4689_v54 = vpop.xlane.xlu0 %987  ;;  %v1454_v50 = vmul.f32 %v4692_v34, %v4692_v34 }
 0x189   :  { %v4687_v33 = vpop.xlane.xlu1 %1119  ;;  %v1629_v44 = vsel %vm198_vm0, %v1453_v36, 0.0  ;;  %v1281_v36 = vmul.f32 0.0625, %v1114_v55  ;;  %v1506_v53 = vsel %vm198_vm0, %v1412_v38, 0.0 }
 0x18a   :  { %v1632_v26 = vsel %vm198_vm0, %v1454_v50, 0.0 }
 0x18b   :  { %1095 = vadd.xlane.f32.xlu0 %v1094_v31  ;;  %v1497_v31 = vsel %vm198_vm0, %v1409_v5, 0.0  ;;  %v1238_v5 = vmul.f32 0.0625, %v985_v42  ;;  %v1411_v42 = vmul.f32 %v4731_v11, %v4731_v11  ;;  %v4754_v38 = vsub.f32 %v4118_v8, %v1281_v36 }
 0x18c   :  { %1227 = vadd.xlane.f32.xlu1 %v1226_v3  ;;  %v4707_v39 = vpop.xlane.xlu0 %996  ;;  %v1500_v3 = vsel %vm198_vm0, %v1410_v13, 0.0  ;;  %v1282_v13 = vmul.f32 0.0625, %v1117_v32  ;;  %v1455_v32 = vmul.f32 %v4728_v49, %v4728_v49 }
 0x18d   :  { %v4705_v35 = vpop.xlane.xlu1 %1128  ;;  %v4743_v57 = vsub.f32 %v4104_v60, %v1238_v5  ;;  %6603 = vst [vmem:[#allocation59_spill] sm:$0xff] %v4754_v38  ;;  %v1284_v60 = vmul.f32 0.0625, %v4665_v6  ;;  %v4775_v5 = vsub.f32 %v6608_v52, %v1240_v47  ;;  %v1457_v36 = vmul.f32 %v4754_v38, %v4754_v38 }
 0x18e   :  { %v4740_v56 = vsub.f32 %v4107_v61, %v1282_v13  ;;  %v6604_v61 = vld [vmem:[#allocation6_spill] sm:$0xff]  ;;  %v6606_v13 = vld [vmem:[#allocation8_spill] sm:$0xff] }
 0x18f   :  { %1498 = vadd.xlane.f32.xlu0 %v1497_v31  ;;  %v1237_v31 = vmul.f32 0.0625, %v982_v59  ;;  %6602 = vst [vmem:[#allocation58_spill] sm:$0xff] %v4743_v57  ;;  %v4772_v6 = vsub.f32 %v6606_v13, %v1284_v60  ;;  %6609 = vst [vmem:[#allocation7_spill] sm:$0xff] %v4775_v5  ;;  %v1641_v47 = vsel %vm198_vm0, %v1457_v36, 0.0 }
 0x190   :  { %1501 = vadd.xlane.f32.xlu1 %v1500_v3  ;;  %v994_v45 = vpop.xlane.xlu0 %993 }
 0x191   :  { %v1126_v63 = vpop.xlane.xlu1 %1125  ;;  %v4757_v27 = vsub.f32 %v6604_v61, %v1237_v31  ;;  %6607 = vst [vmem:[#allocation8_spill] sm:$0xff] %v4772_v6  ;;  %v1460_v52 = vmul.f32 %v4772_v6, %v4772_v6  ;;  %v1241_v6 = vmul.f32 0.0625, %v994_v45 }
 0x193   :  { %1630 = vadd.xlane.f32.xlu0 %v1629_v44  ;;  %6605 = vst [vmem:[#allocation6_spill] sm:$0xff] %v4757_v27  ;;  %v1503_v44 = vsel %vm198_vm0, %v1411_v42, 0.0  ;;  %v1413_v31 = vmul.f32 %v4757_v27, %v4757_v27  ;;  %v1239_v42 = vmul.f32 0.0625, %v4689_v54  ;;  %v6610_v27 = vld [vmem:[#allocation9_spill] sm:$0xff] }
 0x194   :  { %1633 = vadd.xlane.f32.xlu1 %v1632_v26  ;;  %v4735_v50 = vpop.xlane.xlu0 %1002  ;;  %v1635_v26 = vsel %vm198_vm0, %v1455_v32, 0.0  ;;  %v1283_v32 = vmul.f32 0.0625, %v4687_v33  ;;  %v1416_v33 = vmul.f32 %v4775_v5, %v4775_v5  ;;  %v1650_v5 = vsel %vm198_vm0, %v1460_v52, 0.0  ;;  %v6620_v52 = vld [vmem:[#allocation14_spill] sm:$0xff] }
 0x195   :  { %v4733_v3 = vpop.xlane.xlu1 %1134  ;;  %v1509_v13 = vsel %vm198_vm0, %v1413_v31, 0.0 }
 0x196   :  { %v4792_v54 = vsub.f32 %v6610_v27, %v1283_v32  ;;  %v1518_v27 = vsel %vm198_vm0, %v1416_v33, 0.0  ;;  %v6614_v32 = vld [vmem:[#allocation12_spill] sm:$0xff]  ;;  %v4823_v33 = vsub.f32 %v6620_v52, %v1241_v6 }
 0x197   :  { %1507 = vadd.xlane.f32.xlu0 %v1506_v53  ;;  %v1414_v53 = vmul.f32 %v4743_v57, %v4743_v57 }
 0x198   :  { %1639 = vadd.xlane.f32.xlu1 %v1638_v30  ;;  %v4751_v59 = vpop.xlane.xlu0 %999  ;;  %v1458_v30 = vmul.f32 %v4740_v56, %v4740_v56  ;;  %6611 = vst [vmem:[#allocation9_spill] sm:$0xff] %v4792_v54  ;;  %6621 = vst [vmem:[#allocation14_spill] sm:$0xff] %v4823_v33 }
 0x199   :  { %v4749_v55 = vpop.xlane.xlu1 %1131 }
 0x19a   :  { %v1644_v61 = vsel %vm198_vm0, %v1458_v30, 0.0  ;;  %v6612_v30 = vld [vmem:[#allocation10_spill] sm:$0xff] }
 0x19b   :  { %1504 = vadd.xlane.f32.xlu0 %v1503_v44  ;;  %v4795_v38 = vsub.f32 %v6612_v30, %v1239_v42  ;;  %v6616_v42 = vld [vmem:[#allocation11_spill] sm:$0xff] }
 0x19c   :  { %1636 = vadd.xlane.f32.xlu1 %v1635_v26  ;;  %v4769_v16 = vpop.xlane.xlu0 %1008  ;;  %v1512_v26 = vsel %vm198_vm0, %v1414_v53, 0.0  ;;  %v1286_v53 = vmul.f32 0.0625, %v4705_v35  ;;  %v1459_v35 = vmul.f32 %v4792_v54, %v4792_v54 }
 0x19d   :  { %v4767_v8 = vpop.xlane.xlu1 %1140  ;;  %6613 = vst [vmem:[#allocation10_spill] sm:$0xff] %v4795_v38 }
 0x19e   :  { %v4806_v57 = vsub.f32 %v6614_v32, %v1286_v53  ;;  %v1288_v53 = vmul.f32 0.0625, %v4733_v3  ;;  %v1647_v32 = vsel %vm198_vm0, %v1459_v35, 0.0 }
 0x19f   :  { %1513 = vadd.xlane.f32.xlu0 %v1512_v26  ;;  %v1285_v26 = vmul.f32 0.0625, %v1126_v63 }
 0x1a0   :  { %1645 = vadd.xlane.f32.xlu1 %v1644_v61  ;;  %v1006_v44 = vpop.xlane.xlu0 %1005  ;;  %v1242_v61 = vmul.f32 0.0625, %v4707_v39  ;;  %6615 = vst [vmem:[#allocation12_spill] sm:$0xff] %v4806_v57  ;;  %v1415_v39 = vmul.f32 %v4795_v38, %v4795_v38 }
 0x1a1   :  { %v1138_v60 = vpop.xlane.xlu1 %1137 }
 0x1a2   :  { %v4809_v30 = vsub.f32 %v6616_v42, %v1242_v61  ;;  %v1244_v61 = vmul.f32 0.0625, %v4735_v50  ;;  %v1515_v42 = vsel %vm198_vm0, %v1415_v39, 0.0  ;;  %v6624_v50 = vld [vmem:[#allocation15_spill] sm:$0xff]  ;;  %v1417_v39 = vmul.f32 %v4823_v33, %v4823_v33  ;;  %v6626_v33 = vld [vmem:[#allocation17_spill] sm:$0xff] }
 0x1a3   :  { %1510 = vadd.xlane.f32.xlu0 %v1509_v13 }
 0x1a4   :  { %1642 = vadd.xlane.f32.xlu1 %v1641_v47  ;;  %v4801_v31 = vpop.xlane.xlu0 %1014  ;;  %6617 = vst [vmem:[#allocation11_spill] sm:$0xff] %v4809_v30  ;;  %v6618_v47 = vld [vmem:[#allocation13_spill] sm:$0xff]  ;;  %v4841_v52 = vsub.f32 %v6624_v50, %v1244_v61  ;;  %v1521_v50 = vsel %vm198_vm0, %v1417_v39, 0.0 }
 0x1a5   :  { %v4799_v36 = vpop.xlane.xlu1 %1146  ;;  %v4820_v13 = vsub.f32 %v6618_v47, %v1285_v26  ;;  %v6622_v47 = vld [vmem:[#allocation16_spill] sm:$0xff] }
 0x1a6   :  { %v4838_v3 = vsub.f32 %v6622_v47, %v1288_v53  ;;  %6625 = vst [vmem:[#allocation15_spill] sm:$0xff] %v4841_v52 }
 0x1a7   :  { %1519 = vadd.xlane.f32.xlu0 %v1518_v27  ;;  %6619 = vst [vmem:[#allocation13_spill] sm:$0xff] %v4820_v13  ;;  %v1418_v27 = vmul.f32 %v4809_v30, %v4809_v30  ;;  %v1461_v35 = vmul.f32 %v4820_v13, %v4820_v13  ;;  %v1287_v30 = vmul.f32 0.0625, %v4749_v55  ;;  %v1420_v55 = vmul.f32 %v4841_v52, %v4841_v52 }
 0x1a8   :  { %1651 = vadd.xlane.f32.xlu1 %v1650_v5  ;;  %v4817_v45 = vpop.xlane.xlu0 %1011  ;;  %v1462_v5 = vmul.f32 %v4806_v57, %v4806_v57  ;;  %6623 = vst [vmem:[#allocation16_spill] sm:$0xff] %v4838_v3  ;;  %v1464_v13 = vmul.f32 %v4838_v3, %v4838_v3  ;;  %v1245_v3 = vmul.f32 0.0625, %v1006_v44 }
 0x1a9   :  { %v4815_v63 = vpop.xlane.xlu1 %1143  ;;  %v1524_v57 = vsel %vm198_vm0, %v1418_v27, 0.0  ;;  %v1653_v61 = vsel %vm198_vm0, %v1461_v35, 0.0  ;;  %v1246_v27 = vmul.f32 0.0625, %v4769_v16 }
 0x1aa   :  { %v1662_v52 = vsel %vm198_vm0, %v1464_v13, 0.0  ;;  %v6634_v13 = vld [vmem:[#allocation21_spill] sm:$0xff] }
 0x1ab   :  { %1516 = vadd.xlane.f32.xlu0 %v1515_v42  ;;  %v1656_v42 = vsel %vm198_vm0, %v1462_v5, 0.0  ;;  %v6628_v5 = vld [vmem:[#allocation18_spill] sm:$0xff] }
 0x1ac   :  { %1648 = vadd.xlane.f32.xlu1 %v1647_v32  ;;  %v4835_v6 = vpop.xlane.xlu0 %1020  ;;  %v1243_v32 = vmul.f32 0.0625, %v4751_v59  ;;  %v4858_v59 = vsub.f32 %v6626_v33, %v1287_v30  ;;  %v1530_v30 = vsel %vm198_vm0, %v1420_v55, 0.0  ;;  %v6630_v33 = vld [vmem:[#allocation20_spill] sm:$0xff] }
 0x1ad   :  { %v4833_v26 = vpop.xlane.xlu1 %1152 }
 0x1ae   :  { %6627 = vst [vmem:[#allocation17_spill] sm:$0xff] %v4858_v59  ;;  %v4861_v38 = vsub.f32 %v6628_v5, %v1243_v32  ;;  %v6632_v32 = vld [vmem:[#allocation19_spill] sm:$0xff] }
 0x1af   :  { %1525 = vadd.xlane.f32.xlu0 %v1524_v57  ;;  %v1290_v57 = vmul.f32 0.0625, %v4767_v8  ;;  %v4875_v5 = vsub.f32 %v6632_v32, %v1246_v27  ;;  %v1463_v8 = vmul.f32 %v4858_v59, %v4858_v59  ;;  %v1248_v27 = vmul.f32 0.0625, %v4801_v31  ;;  %v6640_v31 = vld [vmem:[#allocation23_spill] sm:$0xff] }
 0x1b0   :  { %1657 = vadd.xlane.f32.xlu1 %v1656_v42  ;;  %v1018_v47 = vpop.xlane.xlu0 %1017  ;;  %6629 = vst [vmem:[#allocation18_spill] sm:$0xff] %v4861_v38  ;;  %v1289_v42 = vmul.f32 0.0625, %v1138_v60  ;;  %v1419_v16 = vmul.f32 %v4861_v38, %v4861_v38 }
 0x1b1   :  { %v1150_v53 = vpop.xlane.xlu1 %1149  ;;  %v4872_v54 = vsub.f32 %v6630_v33, %v1290_v57  ;;  %6633 = vst [vmem:[#allocation19_spill] sm:$0xff] %v4875_v5  ;;  %v1292_v57 = vmul.f32 0.0625, %v4799_v36  ;;  %v1659_v33 = vsel %vm198_vm0, %v1463_v8, 0.0 }
 0x1b2   :  { %v1527_v32 = vsel %vm198_vm0, %v1419_v16, 0.0 }
 0x1b3   :  { %1522 = vadd.xlane.f32.xlu0 %v1521_v50  ;;  %6631 = vst [vmem:[#allocation20_spill] sm:$0xff] %v4872_v54  ;;  %v6636_v50 = vld [vmem:[#allocation22_spill] sm:$0xff] }
 0x1b4   :  { %1654 = vadd.xlane.f32.xlu1 %v1653_v61  ;;  %v4867_v39 = vpop.xlane.xlu0 %1026  ;;  %v4886_v61 = vsub.f32 %v6634_v13, %v1289_v42  ;;  %v4889_v55 = vsub.f32 %v6636_v50, %v1245_v3  ;;  %v6638_v13 = vld [vmem:[#allocation24_spill] sm:$0xff]  ;;  %v4907_v50 = vsub.f32 %v6640_v31, %v1248_v27 }
 0x1b5   :  { %v4865_v35 = vpop.xlane.xlu1 %1158  ;;  %v4904_v36 = vsub.f32 %v6638_v13, %v1292_v57 }
 0x1b6   :  { %6635 = vst [vmem:[#allocation21_spill] sm:$0xff] %v4886_v61  ;;  %6637 = vst [vmem:[#allocation22_spill] sm:$0xff] %v4889_v55  ;;  %v1465_v8 = vmul.f32 %v4886_v61, %v4886_v61  ;;  %v1421_v16 = vmul.f32 %v4889_v55, %v4889_v55  ;;  %v6642_v55 = vld [vmem:[#allocation25_spill] sm:$0xff] }
 0x1b7   :  { %1531 = vadd.xlane.f32.xlu0 %v1530_v30  ;;  %v1422_v30 = vmul.f32 %v4875_v5, %v4875_v5  ;;  %6639 = vst [vmem:[#allocation24_spill] sm:$0xff] %v4904_v36  ;;  %6641 = vst [vmem:[#allocation23_spill] sm:$0xff] %v4907_v50  ;;  %v1291_v5 = vmul.f32 0.0625, %v4815_v63  ;;  %v1468_v61 = vmul.f32 %v4904_v36, %v4904_v36  ;;  %v1249_v36 = vmul.f32 0.0625, %v1018_v47 }
 0x1b8   :  { %1663 = vadd.xlane.f32.xlu1 %v1662_v52  ;;  %v4883_v44 = vpop.xlane.xlu0 %1023  ;;  %v1466_v52 = vmul.f32 %v4872_v54, %v4872_v54  ;;  %v1665_v27 = vsel %vm198_vm0, %v1465_v8, 0.0  ;;  %v1533_v31 = vsel %vm198_vm0, %v1421_v16, 0.0  ;;  %v1424_v63 = vmul.f32 %v4907_v50, %v4907_v50 }
 0x1b9   :  { %v4881_v60 = vpop.xlane.xlu1 %1155  ;;  %v1536_v54 = vsel %vm198_vm0, %v1422_v30, 0.0  ;;  %v1250_v30 = vmul.f32 0.0625, %v4835_v6  ;;  %v1674_v50 = vsel %vm198_vm0, %v1468_v61, 0.0  ;;  %v6650_v61 = vld [vmem:[#allocation29_spill] sm:$0xff] }
 0x1bb   :  { %1528 = vadd.xlane.f32.xlu0 %v1527_v32  ;;  %v1668_v32 = vsel %vm198_vm0, %v1466_v52, 0.0  ;;  %v6644_v52 = vld [vmem:[#allocation26_spill] sm:$0xff] }
 0x1bc   :  { %1660 = vadd.xlane.f32.xlu1 %v1659_v33  ;;  %v4901_v3 = vpop.xlane.xlu0 %1032  ;;  %v1247_v33 = vmul.f32 0.0625, %v4817_v45  ;;  %v4924_v45 = vsub.f32 %v6642_v55, %v1291_v5  ;;  %v1542_v5 = vsel %vm198_vm0, %v1424_v63, 0.0  ;;  %v6646_v55 = vld [vmem:[#allocation28_spill] sm:$0xff] }
 0x1bd   :  { %v4899_v42 = vpop.xlane.xlu1 %1164 }
 0x1be   :  { %6643 = vst [vmem:[#allocation25_spill] sm:$0xff] %v4924_v45  ;;  %v4927_v38 = vsub.f32 %v6644_v52, %v1247_v33  ;;  %v6648_v33 = vld [vmem:[#allocation27_spill] sm:$0xff] }
 0x1bf   :  { %1537 = vadd.xlane.f32.xlu0 %v1536_v54  ;;  %v1294_v54 = vmul.f32 0.0625, %v4833_v26  ;;  %v4941_v52 = vsub.f32 %v6648_v33, %v1250_v30  ;;  %v1467_v26 = vmul.f32 %v4924_v45, %v4924_v45  ;;  %v1252_v30 = vmul.f32 0.0625, %v4867_v39  ;;  %v6656_v39 = vld [vmem:[#allocation31_spill] sm:$0xff] }
 0x1c0   :  { %1669 = vadd.xlane.f32.xlu1 %v1668_v32  ;;  %v1030_v13 = vpop.xlane.xlu0 %1029  ;;  %6645 = vst [vmem:[#allocation26_spill] sm:$0xff] %v4927_v38  ;;  %v1293_v32 = vmul.f32 0.0625, %v1150_v53  ;;  %v1423_v6 = vmul.f32 %v4927_v38, %v4927_v38 }
 0x1c1   :  { %v1162_v57 = vpop.xlane.xlu1 %1161  ;;  %v4938_v59 = vsub.f32 %v6646_v55, %v1294_v54  ;;  %6649 = vst [vmem:[#allocation27_spill] sm:$0xff] %v4941_v52  ;;  %v1296_v54 = vmul.f32 0.0625, %v4865_v35  ;;  %v1671_v55 = vsel %vm198_vm0, %v1467_v26, 0.0 }
 0x1c2   :  { %v1539_v33 = vsel %vm198_vm0, %v1423_v6, 0.0 }
 0x1c3   :  { %1534 = vadd.xlane.f32.xlu0 %v1533_v31  ;;  %6647 = vst [vmem:[#allocation28_spill] sm:$0xff] %v4938_v59  ;;  %v6652_v31 = vld [vmem:[#allocation30_spill] sm:$0xff] }
 0x1c4   :  { %1666 = vadd.xlane.f32.xlu1 %v1665_v27  ;;  %v4933_v16 = vpop.xlane.xlu0 %1038  ;;  %v4952_v27 = vsub.f32 %v6650_v61, %v1293_v32  ;;  %v4955_v63 = vsub.f32 %v6652_v31, %v1249_v36  ;;  %v6654_v61 = vld [vmem:[#allocation32_spill] sm:$0xff]  ;;  %v4973_v31 = vsub.f32 %v6656_v39, %v1252_v30 }
 0x1c5   :  { %v4931_v8 = vpop.xlane.xlu1 %1170  ;;  %v4970_v35 = vsub.f32 %v6654_v61, %v1296_v54 }
 0x1c6   :  { %6651 = vst [vmem:[#allocation29_spill] sm:$0xff] %v4952_v27  ;;  %6653 = vst [vmem:[#allocation30_spill] sm:$0xff] %v4955_v63  ;;  %v1469_v26 = vmul.f32 %v4952_v27, %v4952_v27  ;;  %v1425_v6 = vmul.f32 %v4955_v63, %v4955_v63  ;;  %v6658_v63 = vld [vmem:[#allocation33_spill] sm:$0xff] }
 0x1c7   :  { %1543 = vadd.xlane.f32.xlu0 %v1542_v5  ;;  %v1426_v5 = vmul.f32 %v4941_v52, %v4941_v52  ;;  %6655 = vst [vmem:[#allocation32_spill] sm:$0xff] %v4970_v35  ;;  %6657 = vst [vmem:[#allocation31_spill] sm:$0xff] %v4973_v31  ;;  %v1295_v52 = vmul.f32 0.0625, %v4881_v60  ;;  %v1472_v27 = vmul.f32 %v4970_v35, %v4970_v35  ;;  %v1253_v35 = vmul.f32 0.0625, %v1030_v13 }
 0x1c8   :  { %1675 = vadd.xlane.f32.xlu1 %v1674_v50  ;;  %v4949_v47 = vpop.xlane.xlu0 %1035  ;;  %v1470_v50 = vmul.f32 %v4938_v59, %v4938_v59  ;;  %v1677_v30 = vsel %vm198_vm0, %v1469_v26, 0.0  ;;  %v1545_v39 = vsel %vm198_vm0, %v1425_v6, 0.0  ;;  %v1428_v60 = vmul.f32 %v4973_v31, %v4973_v31 }
 0x1c9   :  { %v4947_v53 = vpop.xlane.xlu1 %1167  ;;  %v1548_v59 = vsel %vm198_vm0, %v1426_v5, 0.0  ;;  %v1254_v5 = vmul.f32 0.0625, %v4901_v3  ;;  %v1686_v31 = vsel %vm198_vm0, %v1472_v27, 0.0 }
 0x1cb   :  { %1540 = vadd.xlane.f32.xlu0 %v1539_v33  ;;  %v1680_v33 = vsel %vm198_vm0, %v1470_v50, 0.0  ;;  %v6659_v50 = vld [vmem:[#allocation34_spill] sm:$0xff] }
 0x1cc   :  { %1672 = vadd.xlane.f32.xlu1 %v1671_v55  ;;  %v4967_v36 = vpop.xlane.xlu0 %1044  ;;  %v1251_v55 = vmul.f32 0.0625, %v4883_v44  ;;  %v4990_v44 = vsub.f32 %v6658_v63, %v1295_v52  ;;  %v1554_v52 = vsel %vm198_vm0, %v1428_v60, 0.0  ;;  %v6660_v63 = vld [vmem:[#allocation36_spill] sm:$0xff]  ;;  %v1256_v60 = vmul.f32 0.0625, %v4933_v16  ;;  %v6663_v16 = vld [vmem:[#allocation37_spill] sm:$0xff] }
 0x1cd   :  { %v4965_v32 = vpop.xlane.xlu1 %1176 }
 0x1ce   :  { %v4993_v38 = vsub.f32 %v6659_v50, %v1251_v55  ;;  %v6661_v55 = vld [vmem:[#allocation35_spill] sm:$0xff] }
 0x1cf   :  { %1549 = vadd.xlane.f32.xlu0 %v1548_v59  ;;  %v1298_v59 = vmul.f32 0.0625, %v4899_v42  ;;  %v5007_v50 = vsub.f32 %v6661_v55, %v1254_v5  ;;  %v1471_v42 = vmul.f32 %v4990_v44, %v4990_v44  ;;  %v1299_v55 = vmul.f32 0.0625, %v4947_v53 }
 0x1d0   :  { %1681 = vadd.xlane.f32.xlu1 %v1680_v33  ;;  %v1042_v61 = vpop.xlane.xlu0 %1041  ;;  %v1297_v33 = vmul.f32 0.0625, %v1162_v57  ;;  %v1427_v3 = vmul.f32 %v4993_v38, %v4993_v38 }
 0x1d1   :  { %v1174_v54 = vpop.xlane.xlu1 %1173  ;;  %v5004_v45 = vsub.f32 %v6660_v63, %v1298_v59  ;;  %v1683_v59 = vsel %vm198_vm0, %v1471_v42, 0.0  ;;  %v1255_v42 = vmul.f32 0.0625, %v4949_v47  ;;  %v5056_v47 = vsub.f32 %v4431_v10, %v1299_v55 }
 0x1d2   :  { %v5018_v27 = vsub.f32 %v4399_v46, %v1297_v33  ;;  %v1551_v5 = vsel %vm198_vm0, %v1427_v3, 0.0 }
 0x1d3   :  { %1546 = vadd.xlane.f32.xlu0 %v1545_v39  ;;  %v1300_v39 = vmul.f32 0.0625, %v4931_v8 }
 0x1d4   :  { %1678 = vadd.xlane.f32.xlu1 %v1677_v30  ;;  %v4999_v6 = vpop.xlane.xlu0 %1050  ;;  %v5021_v30 = vsub.f32 %v4403_v58, %v1253_v35  ;;  %v5039_v35 = vsub.f32 %v6663_v16, %v1256_v60  ;;  %v1473_v33 = vmul.f32 %v5018_v27, %v5018_v27 }
 0x1d5   :  { %v4997_v26 = vpop.xlane.xlu1 %1182  ;;  %v5036_v8 = vsub.f32 %v4415_v48, %v1300_v39 }
 0x1d6   :  { %6664 = vst [vmem:[#allocation34_spill] sm:$0xff] %v5039_v35  ;;  %v1429_v63 = vmul.f32 %v5021_v30, %v5021_v30  ;;  %v1689_v60 = vsel %vm198_vm0, %v1473_v33, 0.0  ;;  %v1432_v53 = vmul.f32 %v5039_v35, %v5039_v35 }
 0x1d7   :  { %1555 = vadd.xlane.f32.xlu0 %v1554_v52  ;;  %v1430_v52 = vmul.f32 %v5007_v50, %v5007_v50  ;;  %6662 = vst [vmem:[#allocation33_spill] sm:$0xff] %v5036_v8  ;;  %v1476_v16 = vmul.f32 %v5036_v8, %v5036_v8  ;;  %v1257_v8 = vmul.f32 0.0625, %v1042_v61 }
 0x1d8   :  { %1687 = vadd.xlane.f32.xlu1 %v1686_v31  ;;  %v5015_v13 = vpop.xlane.xlu0 %1047  ;;  %v1474_v31 = vmul.f32 %v5004_v45, %v5004_v45  ;;  %v1566_v10 = vsel %vm198_vm0, %v1432_v53, 0.0 }
 0x1d9   :  { %v5013_v57 = vpop.xlane.xlu1 %1179  ;;  %v1698_v35 = vsel %vm198_vm0, %v1476_v16, 0.0 }
 0x1da   :  { %v1692_v3 = vsel %vm198_vm0, %v1474_v31, 0.0  ;;  %v5059_v31 = vsub.f32 %v4435_v9, %v1255_v42 }
 0x1db   :  { %1552 = vadd.xlane.f32.xlu0 %v1551_v5  ;;  %v1557_v5 = vsel %vm198_vm0, %v1429_v63, 0.0 }
 0x1dc   :  { %1684 = vadd.xlane.f32.xlu1 %v1683_v59  ;;  %v5033_v58 = vpop.xlane.xlu0 %1056  ;;  %v1560_v59 = vsel %vm198_vm0, %v1430_v52, 0.0  ;;  %v1302_v52 = vmul.f32 0.0625, %v4965_v32  ;;  %v1475_v32 = vmul.f32 %v5056_v47, %v5056_v47 }
 0x1dd   :  { %v5031_v46 = vpop.xlane.xlu1 %1188 }
 0x1de   :  { %v5070_v55 = vsub.f32 %v4443_v25, %v1302_v52  ;;  %v5087_v25 = vsub.f32 %v4459_v37, %v1257_v8 }
 0x1df   :  { %1561 = vadd.xlane.f32.xlu0 %v1560_v59  ;;  %v1301_v59 = vmul.f32 0.0625, %v1174_v54 }
 0x1e0   :  { %1693 = vadd.xlane.f32.xlu1 %v1692_v3  ;;  %v1054_v39 = vpop.xlane.xlu0 %1053  ;;  %v1258_v3 = vmul.f32 0.0625, %v4967_v36  ;;  %v1431_v36 = vmul.f32 %v5059_v31, %v5059_v31  ;;  %v1433_v52 = vmul.f32 %v5087_v25, %v5087_v25 }
 0x1e1   :  { %v1186_v48 = vpop.xlane.xlu1 %1185  ;;  %v5084_v42 = vsub.f32 %v4455_v21, %v1301_v59  ;;  %v1259_v59 = vmul.f32 0.0625, %v5015_v13 }
 0x1e2   :  { %v5073_v9 = vsub.f32 %v4439_v4, %v1258_v3  ;;  %v1304_v4 = vmul.f32 0.0625, %v4997_v26  ;;  %v1563_v16 = vsel %vm198_vm0, %v1431_v36, 0.0  ;;  %v1303_v3 = vmul.f32 0.0625, %v5013_v57 }
 0x1e3   :  { %1558 = vadd.xlane.f32.xlu0 %v1557_v5  ;;  %v1695_v5 = vsel %vm198_vm0, %v1475_v32, 0.0  ;;  %v1477_v8 = vmul.f32 %v5084_v42, %v5084_v42 }
 0x1e4   :  { %1690 = vadd.xlane.f32.xlu1 %v1689_v60  ;;  %v5065_v63 = vpop.xlane.xlu0 %1062  ;;  %v1260_v60 = vmul.f32 0.0625, %v4999_v6  ;;  %v1434_v53 = vmul.f32 %v5073_v9, %v5073_v9  ;;  %v5102_v26 = vsub.f32 %v4467_v0, %v1304_v4  ;;  %v1569_v4 = vsel %vm198_vm0, %v1433_v52, 0.0 }
 0x1e5   :  { %v5063_v33 = vpop.xlane.xlu1 %1194  ;;  %v5122_v13 = vsub.f32 %v4479_v62, %v1303_v3  ;;  %v1305_v52 = vmul.f32 0.0625, %v1186_v48 }
 0x1e6   :  { %v5105_v6 = vsub.f32 %v4463_v2, %v1260_v60  ;;  %v1572_v32 = vsel %vm198_vm0, %v1434_v53, 0.0  ;;  %v1701_v2 = vsel %vm198_vm0, %v1477_v8, 0.0  ;;  %v1480_v60 = vmul.f32 %v5102_v26, %v5102_v26 }
 0x1e7   :  { %1567 = vadd.xlane.f32.xlu0 %v1566_v10  ;;  %6665 = vst [vmem:[#allocation36_spill] sm:$0xff] %v5122_v13 }
 0x1e8   :  { %1699 = vadd.xlane.f32.xlu1 %v1698_v35  ;;  %v5081_v61 = vpop.xlane.xlu0 %1059  ;;  %v1478_v35 = vmul.f32 %v5070_v55, %v5070_v55  ;;  %v1436_v57 = vmul.f32 %v5105_v6, %v5105_v6 }
 0x1e9   :  { %v5079_v54 = vpop.xlane.xlu1 %1191 }
 0x1ea   :  { %v1704_v10 = vsel %vm198_vm0, %v1478_v35, 0.0  ;;  %v1262_v35 = vmul.f32 0.0625, %v5033_v58  ;;  %v1578_v62 = vsel %vm198_vm0, %v1436_v57, 0.0 }
 0x1eb   :  { %1564 = vadd.xlane.f32.xlu0 %v1563_v16  ;;  %v1306_v16 = vmul.f32 0.0625, %v5031_v46  ;;  %v1479_v46 = vmul.f32 %v5122_v13, %v5122_v13 }
 0x1ec   :  { %1696 = vadd.xlane.f32.xlu1 %v1695_v5  ;;  %v5099_v37 = vpop.xlane.xlu0 %1068  ;;  %v5125_v5 = vsub.f32 %v4483_v1, %v1259_v59  ;;  %v5139_v1 = vsub.f32 %v4487_v7, %v1262_v35  ;;  %v5150_v59 = vsub.f32 %v4503_v18, %v1305_v52  ;;  %v1308_v7 = vmul.f32 0.0625, %v5063_v33 }
 0x1ed   :  { %v5097_v21 = vpop.xlane.xlu1 %1200  ;;  %v5136_v3 = vsub.f32 %v4491_v17, %v1306_v16 }
 0x1ee   :  { %6666 = vst [vmem:[#allocation35_spill] sm:$0xff] %v5125_v5  ;;  %6668 = vst [vmem:[#allocation60_spill] sm:$0xff] %v5139_v1  ;;  %v1435_v58 = vmul.f32 %v5125_v5, %v5125_v5  ;;  %v1438_v16 = vmul.f32 %v5139_v1, %v5139_v1  ;;  %v5168_v33 = vsub.f32 %v4515_v40, %v1308_v7 }
 0x1ef   :  { %1573 = vadd.xlane.f32.xlu0 %v1572_v32  ;;  %v1710_v32 = vsel %vm198_vm0, %v1480_v60, 0.0  ;;  %6667 = vst [vmem:[#allocation37_spill] sm:$0xff] %v5136_v3  ;;  %6669 = vst [vmem:[#allocation61_spill] sm:$0xff] %v5150_v59  ;;  %v1482_v57 = vmul.f32 %v5136_v3, %v5136_v3  ;;  %v1481_v35 = vmul.f32 %v5150_v59, %v5150_v59  ;;  %v6748_v3 = vld [vmem:[#allocation32_spill] sm:$0xff] }
 0x1f0   :  { %1705 = vadd.xlane.f32.xlu1 %v1704_v10  ;;  %v1066_v36 = vpop.xlane.xlu0 %1065  ;;  %v1261_v10 = vmul.f32 0.0625, %v1054_v39  ;;  %v1575_v60 = vsel %vm198_vm0, %v1435_v58, 0.0  ;;  %6671 = vst [vmem:[#allocation63_spill] sm:$0xff] %v5168_v33 }
 0x1f1   :  { %v1198_v0 = vpop.xlane.xlu1 %1197 }
 0x1f2   :  { %v5153_v17 = vsub.f32 %v4507_v19, %v1261_v10  ;;  %v1307_v10 = vmul.f32 0.0625, %v5079_v54 }
 0x1f3   :  { %1570 = vadd.xlane.f32.xlu0 %v1569_v4  ;;  %v1707_v4 = vsel %vm198_vm0, %v1479_v46, 0.0  ;;  %v1584_v46 = vsel %vm198_vm0, %v1438_v16, 0.0  ;;  %v1309_v16 = vmul.f32 0.0625, %v1198_v0 }
 0x1f4   :  { %1702 = vadd.xlane.f32.xlu1 %v1701_v2  ;;  %v5131_v8 = vpop.xlane.xlu0 %1074  ;;  %6670 = vst [vmem:[#allocation62_spill] sm:$0xff] %v5153_v17  ;;  %v1264_v2 = vmul.f32 0.0625, %v5065_v63  ;;  %v1437_v52 = vmul.f32 %v5153_v17, %v5153_v17 }
 0x1f5   :  { %v5129_v53 = vpop.xlane.xlu1 %1206  ;;  %v5208_v0 = vsub.f32 %v4551_v29, %v1309_v16 }
 0x1f6   :  { %v5171_v63 = vsub.f32 %v4511_v20, %v1264_v2  ;;  %v1713_v20 = vsel %vm198_vm0, %v1481_v35, 0.0  ;;  %v1581_v7 = vsel %vm198_vm0, %v1437_v52, 0.0  ;;  %v1484_v2 = vmul.f32 %v5168_v33, %v5168_v33 }
 0x1f7   :  { %1579 = vadd.xlane.f32.xlu0 %v1578_v62  ;;  %v1716_v62 = vsel %vm198_vm0, %v1482_v57, 0.0  ;;  %v1266_v57 = vmul.f32 0.0625, %v5099_v37  ;;  %6677 = vst [vmem:[#allocation69_spill] sm:$0xff] %v5208_v0 }
 0x1f8   :  { %1711 = vadd.xlane.f32.xlu1 %v1710_v32  ;;  %v5147_v39 = vpop.xlane.xlu0 %1071  ;;  %6672 = vst [vmem:[#allocation64_spill] sm:$0xff] %v5171_v63  ;;  %v1263_v32 = vmul.f32 0.0625, %v5081_v61  ;;  %v1440_v54 = vmul.f32 %v5171_v63, %v5171_v63  ;;  %v5188_v61 = vsub.f32 %v4527_v23, %v1307_v10 }
 0x1f9   :  { %v5145_v48 = vpop.xlane.xlu1 %1203 }
 0x1fa   :  { %6673 = vst [vmem:[#allocation65_spill] sm:$0xff] %v5188_v61  ;;  %v1590_v63 = vsel %vm198_vm0, %v1440_v54, 0.0  ;;  %v1311_v16 = vmul.f32 0.0625, %v5145_v48 }
 0x1fb   :  { %1576 = vadd.xlane.f32.xlu0 %v1575_v60  ;;  %v1310_v60 = vmul.f32 0.0625, %v5097_v21  ;;  %v1483_v21 = vmul.f32 %v5188_v61, %v5188_v61  ;;  %v6700_v61 = vld [vmem:[#allocation48_spill] sm:$0xff] }
 0x1fc   :  { %1708 = vadd.xlane.f32.xlu1 %v1707_v4  ;;  %v5165_v19 = vpop.xlane.xlu0 %1080  ;;  %v5191_v4 = vsub.f32 %v4531_v14, %v1263_v32  ;;  %v5201_v14 = vsub.f32 %v4535_v43, %v1266_v57  ;;  %v1312_v43 = vmul.f32 0.0625, %v5129_v53  ;;  %v1268_v32 = vmul.f32 0.0625, %v5131_v8  ;;  %v6679_v53 = vld [vmem:[#allocation39_spill] sm:$0xff]  ;;  %v6681_v8 = vld [vmem:[#allocation38_spill] sm:$0xff] }
 0x1fd   :  { %v5163_v18 = vpop.xlane.xlu1 %1212  ;;  %v5198_v23 = vsub.f32 %v4539_v15, %v1310_v60 }
 0x1fe   :  { %6674 = vst [vmem:[#allocation66_spill] sm:$0xff] %v5191_v4  ;;  %6676 = vst [vmem:[#allocation68_spill] sm:$0xff] %v5201_v14  ;;  %v1439_v37 = vmul.f32 %v5191_v4, %v5191_v4  ;;  %v1442_v29 = vmul.f32 %v5201_v14, %v5201_v14  ;;  %v5228_v60 = vsub.f32 %v6679_v53, %v1312_v43 }
 0x1ff   :  { %1585 = vadd.xlane.f32.xlu0 %v1584_v46  ;;  %v1722_v46 = vsel %vm198_vm0, %v1484_v2, 0.0  ;;  %6675 = vst [vmem:[#allocation67_spill] sm:$0xff] %v5198_v23  ;;  %v5231_v57 = vsub.f32 %v6681_v8, %v1268_v32  ;;  %v6683_v32 = vld [vmem:[#allocation40_spill] sm:$0xff] }
 0x200   :  { %1717 = vadd.xlane.f32.xlu1 %v1716_v62  ;;  %v1078_v58 = vpop.xlane.xlu0 %1077  ;;  %v1265_v62 = vmul.f32 0.0625, %v1066_v36  ;;  %6680 = vst [vmem:[#allocation39_spill] sm:$0xff] %v5228_v60  ;;  %v5243_v53 = vsub.f32 %v6683_v32, %v1311_v16  ;;  %v1488_v8 = vmul.f32 %v5228_v60, %v5228_v60 }
 0x201   :  { %v1210_v40 = vpop.xlane.xlu1 %1209  ;;  %6682 = vst [vmem:[#allocation38_spill] sm:$0xff] %v5231_v57 }
 0x202   :  { %v5215_v15 = vsub.f32 %v4555_v41, %v1265_v62  ;;  %v1485_v41 = vmul.f32 %v5208_v0, %v5208_v0  ;;  %6684 = vst [vmem:[#allocation40_spill] sm:$0xff] %v5243_v53  ;;  %v1734_v0 = vsel %vm198_vm0, %v1488_v8, 0.0 }
 0x203   :  { %1582 = vadd.xlane.f32.xlu0 %v1581_v7  ;;  %v1587_v7 = vsel %vm198_vm0, %v1439_v37, 0.0  ;;  %v1596_v37 = vsel %vm198_vm0, %v1442_v29, 0.0 }
 0x204   :  { %1714 = vadd.xlane.f32.xlu1 %v1713_v20  ;;  %v1087_v52 = vpop.xlane.xlu0 %1086  ;;  %6678 = vst [vmem:[#allocation70_spill] sm:$0xff] %v5215_v15  ;;  %v1719_v20 = vsel %vm198_vm0, %v1483_v21, 0.0  ;;  %v1441_v62 = vmul.f32 %v5215_v15, %v5215_v15  ;;  %v1725_v43 = vsel %vm198_vm0, %v1485_v41, 0.0  ;;  %v1313_v15 = vmul.f32 0.0625, %v1210_v40 }
 0x205   :  { %v1219_v35 = vpop.xlane.xlu1 %1218  ;;  %v1269_v41 = vmul.f32 0.0625, %v1078_v58 }
 0x206   :  { %v1593_v48 = vsel %vm198_vm0, %v1441_v62, 0.0  ;;  %v1316_v16 = vmul.f32 0.0625, %v1219_v35  ;;  %v6693_v35 = vld [vmem:[#allocation45_spill] sm:$0xff] }
 0x207   :  { %1591 = vadd.xlane.f32.xlu0 %v1590_v63  ;;  %v1486_v63 = vmul.f32 %v5198_v23, %v5198_v23 }
 0x208   :  { %1723 = vadd.xlane.f32.xlu1 %v1722_v46  ;;  %v5212_v10 = vpop.xlane.xlu0 %1083  ;;  %v1267_v46 = vmul.f32 0.0625, %v5147_v39  ;;  %v1444_v39 = vmul.f32 %v5231_v57, %v5231_v57  ;;  %v1487_v57 = vmul.f32 %v5243_v53, %v5243_v53 }
 0x209   :  { %v5210_v36 = vpop.xlane.xlu1 %1215  ;;  %v1728_v21 = vsel %vm198_vm0, %v1486_v63, 0.0  ;;  %v6685_v63 = vld [vmem:[#allocation41_spill] sm:$0xff] }
 0x20a   :  { %v5251_v29 = vsub.f32 %v6685_v63, %v1267_v46  ;;  %v1602_v60 = vsel %vm198_vm0, %v1444_v39, 0.0  ;;  %v6687_v46 = vld [vmem:[#allocation43_spill] sm:$0xff]  ;;  %v1272_v39 = vmul.f32 0.0625, %v1087_v52 }
 0x20b   :  { %1588 = vadd.xlane.f32.xlu0 %v1587_v7 }
 0x20c   :  { %1720 = vadd.xlane.f32.xlu1 %v1719_v20  ;;  %v1093_v54 = vpop.xlane.xlu0 %1092  ;;  %6686 = vst [vmem:[#allocation41_spill] sm:$0xff] %v5251_v29  ;;  %v1443_v58 = vmul.f32 %v5251_v29, %v5251_v29 }
 0x20d   :  { %v1225_v2 = vpop.xlane.xlu1 %1224 }
 0x20e   :  { %v1318_v52 = vmul.f32 0.0625, %v1225_v2  ;;  %v6702_v2 = vld [vmem:[#allocation49_spill] sm:$0xff] }
 0x20f   :  { %1597 = vadd.xlane.f32.xlu0 %v1596_v37  ;;  %v1270_v37 = vmul.f32 0.0625, %v5165_v19  ;;  %v6691_v19 = vld [vmem:[#allocation44_spill] sm:$0xff] }
 0x210   :  { %1729 = vadd.xlane.f32.xlu1 %v1728_v21  ;;  %v5239_v7 = vpop.xlane.xlu0 %1089  ;;  %v1314_v21 = vmul.f32 0.0625, %v5163_v18  ;;  %v6689_v18 = vld [vmem:[#allocation42_spill] sm:$0xff]  ;;  %v5266_v40 = vsub.f32 %v6691_v19, %v1313_v15  ;;  %v1731_v15 = vsel %vm198_vm0, %v1487_v57, 0.0  ;;  %v1599_v19 = vsel %vm198_vm0, %v1443_v58, 0.0 }
 0x211   :  { %v1222_v20 = vpop.xlane.xlu1 %1221  ;;  %v5263_v14 = vsub.f32 %v6689_v18, %v1270_v37  ;;  %v6697_v37 = vld [vmem:[#allocation5_spill] sm:$0xff]  ;;  %v1315_v58 = vmul.f32 0.0625, %v5210_v36 }
 0x212   :  { %v5260_v63 = vsub.f32 %v6687_v46, %v1314_v21  ;;  %6692 = vst [vmem:[#allocation44_spill] sm:$0xff] %v5266_v40  ;;  %v2115_v18 = vsub.s32 1, %v6697_v37  ;;  %v1317_v53 = vmul.f32 0.0625, %v1222_v20  ;;  %v6704_v20 = vld [vmem:[#allocation51_spill] sm:$0xff] }
 0x213   :  { %1594 = vadd.xlane.f32.xlu0 %v1593_v48  ;;  %6690 = vst [vmem:[#allocation42_spill] sm:$0xff] %v5263_v14  ;;  %v6695_v48 = vld [vmem:[#allocation47_spill] sm:$0xff] }
 0x214   :  { %1726 = vadd.xlane.f32.xlu1 %v1725_v43  ;;  %v1099_v62 = vpop.xlane.xlu0 %1098  ;;  %6688 = vst [vmem:[#allocation43_spill] sm:$0xff] %v5260_v63  ;;  %v5271_v43 = vsub.f32 %v6693_v35, %v1269_v41  ;;  %v5274_v8 = vsub.f32 %v6695_v48, %v1316_v16  ;;  %v1490_v29 = vmul.f32 %v5260_v63, %v5260_v63  ;;  %v6698_v16 = vld [vmem:[#allocation46_spill] sm:$0xff]  ;;  %v1271_v35 = vmul.f32 0.0625, %v5212_v10 }
 0x215   :  { %v1231_v32 = vpop.xlane.xlu1 %1230  ;;  %v5291_v57 = vsub.f32 %v6698_v16, %v1272_v39  ;;  %v1274_v39 = vmul.f32 0.0625, %v1093_v54 }
 0x216   :  { %6694 = vst [vmem:[#allocation45_spill] sm:$0xff] %v5271_v43  ;;  %6696 = vst [vmem:[#allocation47_spill] sm:$0xff] %v5274_v8  ;;  %v1445_v41 = vmul.f32 %v5271_v43, %v5271_v43  ;;  %v1740_v16 = vsel %vm198_vm0, %v1490_v29, 0.0 }
 0x217   :  { %1603 = vadd.xlane.f32.xlu0 %v1602_v60  ;;  %v1489_v60 = vmul.f32 %v5266_v40, %v5266_v40  ;;  %6699 = vst [vmem:[#allocation46_spill] sm:$0xff] %v5291_v57 }
 0x218   :  { %1735 = vadd.xlane.f32.xlu1 %v1734_v0  ;;  %v5276_v46 = vpop.xlane.xlu0 %1095  ;;  %v1446_v0 = vmul.f32 %v5263_v14, %v5263_v14  ;;  %v1492_v14 = vmul.f32 %v5274_v8, %v5274_v8  ;;  %v1605_v8 = vsel %vm198_vm0, %v1445_v41, 0.0  ;;  %v6706_v41 = vld [vmem:[#allocation50_spill] sm:$0xff] }
 0x219   :  { %v1228_v21 = vpop.xlane.xlu1 %1227  ;;  %v1737_v10 = vsel %vm198_vm0, %v1489_v60, 0.0 }
 0x21a   :  { %v1608_v36 = vsel %vm198_vm0, %v1446_v0, 0.0  ;;  %v1746_v29 = vsel %vm198_vm0, %v1492_v14, 0.0  ;;  %v1448_v0 = vmul.f32 %v5291_v57, %v5291_v57  ;;  %v1276_v14 = vmul.f32 0.0625, %v1099_v62 }
 0x21b   :  { %1600 = vadd.xlane.f32.xlu0 %v1599_v19 }
 0x21c   :  { %1732 = vadd.xlane.f32.xlu1 %v1731_v15  ;;  %v1499_v63 = vpop.xlane.xlu0 %1498  ;;  %v3654_v15 = vld [vmem:[%s6425_s1 + $0x10] sm:$0x7] }
 0x21d   :  { %v1502_v48 = vpop.xlane.xlu1 %1501  ;;  %v5300_v19 = vrot.slane %v3654_v15, %v2115_v18  ;;  %v1761_v40 = vmul.f32 0.0625, %v1499_v63  ;;  %v5307_v18 = vsub.f32 %v6700_v61, %v1315_v58  ;;  %v1273_v61 = vmul.f32 0.0625, %v5239_v7 }
 0x21e   :  { %v1762_v43 = vmul.f32 0.0625, %v1502_v48  ;;  %v5310_v48 = vsub.f32 %v6702_v2, %v1271_v35  ;;  %v1320_v58 = vmul.f32 0.0625, %v1231_v32  ;;  %v6708_v35 = vld [vmem:[#allocation52_spill] sm:$0xff] }
 0x21f   :  { %v1849_v4 = vadd.f32 1e-05, %v1761_v40  ;;  %1609 = vadd.xlane.f32.xlu0 %v1608_v36  ;;  %6701 = vst [vmem:[#allocation48_spill] sm:$0xff] %v5307_v18  ;;  %v5323_v36 = vsub.f32 %v6708_v35, %v1317_v53  ;;  %v5333_v62 = vsub.f32 %v4651_v22, %v1273_v61  ;;  %v6714_v22 = vsub.s32 2, %v6697_v37 }
 0x220   :  { %v1850_v23 = vadd.f32 1e-05, %v1762_v43  ;;  %1741 = vadd.xlane.f32.xlu1 %v1740_v16  ;;  %6703 = vst [vmem:[#allocation49_spill] sm:$0xff] %v5310_v48  ;;  %v1631_v63 = vpop.xlane.xlu0 %1630  ;;  %v5316_v43 = vsub.f32 %v6704_v20, %v1318_v52  ;;  %v5319_v16 = vsub.f32 %v6706_v41, %v1274_v39  ;;  %v1319_v52 = vmul.f32 0.0625, %v1228_v21 }
 0x221   :  { %v1634_v54 = vpop.xlane.xlu1 %1633  ;;  %v1805_v60 = vmul.f32 0.0625, %v1631_v63  ;;  %6709 = vst [vmem:[#allocation52_spill] sm:$0xff] %v5323_v36  ;;  %v1491_v39 = vmul.f32 %v5307_v18, %v5307_v18  ;;  %v1447_v7 = vmul.f32 %v5310_v48, %v5310_v48  ;;  %6710 = vst [vmem:[#allocation71_spill] sm:$0xff] %v5333_v62  ;;  %v5340_v63 = vsub.f32 %v4655_v51, %v1276_v14 }
 0x222   :  { %6705 = vst [vmem:[#allocation51_spill] sm:$0xff] %v5316_v43  ;;  %3478 = vrsqrt.f32 %v1850_v23  ;;  %v1806_v40 = vmul.f32 0.0625, %v1634_v54  ;;  %6707 = vst [vmem:[#allocation50_spill] sm:$0xff] %v5319_v16  ;;  %v1614_v54 = vsel %vm198_vm0, %v1448_v0, 0.0  ;;  %v1494_v32 = vmul.f32 %v5316_v43, %v5316_v43 }
 0x223   :  { %3480 = vrsqrt.f32 %v1849_v4  ;;  %v1893_v33 = vadd.f32 1e-05, %v1805_v60  ;;  %1606 = vadd.xlane.f32.xlu0 %v1605_v8  ;;  %v6711_v8 = vld [vmem:[#allocation53_spill] sm:$0xff]  ;;  %6713 = vst [vmem:[#allocation72_spill] sm:$0xff] %v5340_v63  ;;  %v1493_v60 = vmul.f32 %v5323_v36, %v5323_v36  ;;  %v5348_v41 = vrot.slane %v3654_v15, %v6714_v22 }
 0x224   :  { %v1894_v2 = vadd.f32 1e-05, %v1806_v40  ;;  %1738 = vadd.xlane.f32.xlu1 %v1737_v10  ;;  %v1508_v23 = vpop.xlane.xlu0 %1507  ;;  %v5336_v21 = vsub.f32 %v6711_v8, %v1320_v58  ;;  %v1275_v10 = vmul.f32 0.0625, %v5276_v46  ;;  %v1450_v40 = vmul.f32 %v5319_v16, %v5319_v16 }
 0x225   :  { %v1640_v20 = vpop.xlane.xlu1 %1639  ;;  %v1764_v53 = vmul.f32 0.0625, %v1508_v23  ;;  %v5351_v61 = vsub.f32 %v4681_v24, %v1319_v52  ;;  %v1743_v58 = vsel %vm198_vm0, %v1491_v39, 0.0  ;;  %v1611_v14 = vsel %vm198_vm0, %v1447_v7, 0.0 }
 0x226   :  { %3482 = vrsqrt.f32 %v1894_v2  ;;  %v1808_v4 = vmul.f32 0.0625, %v1640_v20  ;;  %6712 = vst [vmem:[#allocation53_spill] sm:$0xff] %v5336_v21  ;;  %v5356_v2 = vsub.f32 %v4685_v12, %v1275_v10  ;;  %v1752_v20 = vsel %vm198_vm0, %v1494_v32, 0.0 }
 0x227   :  { %3484 = vrsqrt.f32 %v1893_v33  ;;  %1615 = vadd.xlane.f32.xlu0 %v1614_v54  ;;  %6715 = vst [vmem:[#allocation73_spill] sm:$0xff] %v5351_v61  ;;  %v1852_v33 = vadd.f32 1e-05, %v1764_v53  ;;  %v1449_v15 = vmul.f32 %v5333_v62, %v5333_v62  ;;  %v1496_v24 = vmul.f32 %v5336_v21, %v5336_v21 }
 0x228   :  { %v1896_v0 = vadd.f32 1e-05, %v1808_v4  ;;  %1747 = vadd.xlane.f32.xlu1 %v1746_v29  ;;  %v1505_v51 = vpop.xlane.xlu0 %1504  ;;  %6716 = vst [vmem:[#allocation74_spill] sm:$0xff] %v5356_v2  ;;  %v1620_v54 = vsel %vm198_vm0, %v1450_v40, 0.0  ;;  %v1749_v39 = vsel %vm198_vm0, %v1493_v60, 0.0  ;;  %v1452_v12 = vmul.f32 %v5340_v63, %v5340_v63 }
 0x229   :  { %v1637_v46 = vpop.xlane.xlu1 %1636  ;;  %v1763_v35 = vmul.f32 0.0625, %v1505_v51  ;;  %v1495_v10 = vmul.f32 %v5351_v61, %v5351_v61  ;;  %v1617_v51 = vsel %vm198_vm0, %v1449_v15, 0.0 }
 0x22a   :  { %3486 = vrsqrt.f32 %v1896_v0  ;;  %v1807_v29 = vmul.f32 0.0625, %v1637_v46  ;;  %v6717_v0 = vld [vmem:[#allocation54_spill] sm:$0xff] }
 0x22b   :  { %1612 = vadd.xlane.f32.xlu0 %v1611_v14  ;;  %3488 = vrsqrt.f32 %v1852_v33  ;;  %v1851_v53 = vadd.f32 1e-05, %v1763_v35 }
 0x22c   :  { %v3479_v52 = vpop.eup %3478  ;;  %v1895_v23 = vadd.f32 1e-05, %v1807_v29  ;;  %1744 = vadd.xlane.f32.xlu1 %v1743_v58  ;;  %v1514_v8 = vpop.xlane.xlu0 %1513  ;;  %v1451_v58 = vmul.f32 %v5356_v2, %v5356_v2 }
 0x22d   :  { %v3481_v7 = vpop.eup %3480  ;;  %v2026_v4 = vmul.f32 %v3479_v52, %v4674_v28  ;;  %v1646_v32 = vpop.xlane.xlu1 %1645  ;;  %v1766_v40 = vmul.f32 0.0625, %v1514_v8  ;;  %v5376_v28 = vsel %vm198_vm0, %v1496_v24, 0.0  ;;  %v5380_v52 = vsel %vm198_vm0, %v1452_v12, 0.0 }
 0x22e   :  { %v2025_v22 = vmul.f32 %v3481_v7, %v6717_v0  ;;  %3490 = vrsqrt.f32 %v1895_v23  ;;  %v1810_v46 = vmul.f32 0.0625, %v1646_v32  ;;  %v1755_v24 = vsel %vm198_vm0, %v1495_v10, 0.0  ;;  %v6718_v0 = vld [vmem:[#allocation55_spill] sm:$0xff] }
 0x22f   :  { %v2118_v60 = vmul.f32 %v5300_v19, %v2026_v4  ;;  %v1854_v14 = vadd.f32 1e-05, %v1766_v40  ;;  %1621 = vadd.xlane.f32.xlu0 %v1620_v54  ;;  %3492 = vrsqrt.f32 %v1851_v53  ;;  %v19_v54 = vld [vmem:[%s6426_s2 + $0x8] sm:$0xff]  ;;  %v1623_v10 = vsel %vm198_vm0, %v1451_v58, 0.0  ;;  %v18_v40 = vld [vmem:[%s6426_s2] sm:$0xff] }
 0x230   :  { %v3483_v33 = vpop.eup %3482  ;;  %v2117_v29 = vmul.f32 %v5300_v19, %v2025_v22  ;;  %v1898_v35 = vadd.f32 1e-05, %v1810_v46  ;;  %1753 = vadd.xlane.f32.xlu1 %v1752_v20  ;;  %v5384_v32 = vpop.xlane.xlu0 %1510  ;;  %v6719_v58 = vld [vmem:[#allocation56_spill] sm:$0xff] }
 0x231   :  { %v3485_v23 = vpop.eup %3484  ;;  %v2210_v7 = vadd.f32 %v5348_v41, %v2118_v60  ;;  %v2070_v15 = vmul.f32 %v3483_v33, %v4692_v34  ;;  %v1643_v4 = vpop.xlane.xlu1 %1642  ;;  %v63_v34 = vld [vmem:[%s6426_s2 + $0x168] sm:$0xff]  ;;  %v62_v60 = vld [vmem:[%s6426_s2 + $0x160] sm:$0xff] }
 0x232   :  { %v2209_v8 = vadd.f32 %v5348_v41, %v2117_v29  ;;  %v2069_v22 = vmul.f32 %v3485_v23, %v6718_v0  ;;  %3494 = vrsqrt.f32 %v1898_v35  ;;  %v1809_v20 = vmul.f32 0.0625, %v1643_v4 }
 0x233   :  { %vm2298_vm1 = vcmp.ge.f32.partialorder %v2210_v7, 0.0  ;;  %v2386_v12 = vmul.f32 0.15, %v2210_v7  ;;  %v2162_v53 = vmul.f32 %v5300_v19, %v2070_v15  ;;  %3496 = vrsqrt.f32 %v1854_v14  ;;  %1618 = vadd.xlane.f32.xlu0 %v1617_v51 }
 0x234   :  { %v3487_v46 = vpop.eup %3486  ;;  %vm2297_vm2 = vcmp.ge.f32.partialorder %v2209_v8, 0.0  ;;  %v2385_v33 = vmul.f32 0.15, %v2209_v8  ;;  %v2161_v29 = vmul.f32 %v5300_v19, %v2069_v22  ;;  %1750 = vadd.xlane.f32.xlu1 %v1749_v39  ;;  %v5406_v4 = vadd.f32 1e-05, %v1809_v20  ;;  %v5410_v37 = vpop.xlane.xlu0 %1519 }
 0x235   :  { %v2474_v35 = vsel %vm2298_vm1, %v2210_v7, %v2386_v12  ;;  %v2254_v23 = vadd.f32 %v5348_v41, %v2162_v53  ;;  %v2072_v15 = vmul.f32 %v3487_v46, %v6719_v58  ;;  %v5408_v0 = vpop.xlane.xlu1 %1651  ;;  %v3489_v22 = vpop.eup %3488 }
 0x236   :  { %v2562_v63 = vmul.f32 %v2474_v35, %v19_v54  ;;  %v2606_v21 = vmul.f32 %v2474_v35, %v63_v34  ;;  %v2473_v2 = vsel %vm2297_vm2, %v2209_v8, %v2385_v33  ;;  %v2253_v61 = vadd.f32 %v5348_v41, %v2161_v29 }
 0x237   :  { %v2561_v14 = vmul.f32 %v2473_v2, %v18_v40  ;;  %v2605_v39 = vmul.f32 %v2473_v2, %v62_v60  ;;  %vm2342_vm3 = vcmp.ge.f32.partialorder %v2254_v23, 0.0  ;;  %v2430_v51 = vmul.f32 0.15, %v2254_v23  ;;  %1624 = vadd.xlane.f32.xlu0 %v1623_v10 }
 0x238   :  { %v3491_v7 = vpop.eup %3490  ;;  %v2650_v12 = vsel %vm198_vm0, %v2562_v63, 0.0  ;;  %v2743_v20 = vsel %vm198_vm0, %v2606_v21, 0.0  ;;  %vm2341_vm4 = vcmp.ge.f32.partialorder %v2253_v61, 0.0  ;;  %v2429_v53 = vmul.f32 0.15, %v2253_v61  ;;  %1756 = vadd.xlane.f32.xlu1 %v1755_v24  ;;  %v5420_v2 = vpop.xlane.xlu0 %1516 }
 0x239   :  { %v2649_v46 = vsel %vm198_vm0, %v2561_v14, 0.0  ;;  %v2742_v8 = vsel %vm198_vm0, %v2605_v39, 0.0  ;;  %v2518_v33 = vsel %vm2342_vm3, %v2254_v23, %v2430_v51  ;;  %v2164_v29 = vmul.f32 %v5300_v19, %v2072_v15  ;;  %v5418_v35 = vpop.xlane.xlu1 %1648  ;;  %v3493_v36 = vpop.eup %3492  ;;  %v6720_v14 = vld [vmem:[#allocation57_spill] sm:$0xff] }
 0x23a   :  { %v5422_v58 = vadd.f32 %v2650_v12, %v2649_v46  ;;  %v5424_v63 = vadd.f32 %v2743_v20, %v2742_v8  ;;  %v2836_v21 = vmul.f32 %v2518_v33, %v19_v54  ;;  %v2880_v62 = vmul.f32 %v2518_v33, %v63_v34  ;;  %v65_v54 = vld [vmem:[%s6426_s2 + $0x178] sm:$0xff] }
 0x23b   :  { %v2517_v24 = vsel %vm2341_vm4, %v2253_v61, %v2429_v53  ;;  %v2256_v10 = vadd.f32 %v5348_v41, %v2164_v29  ;;  %v2028_v16 = vmul.f32 %v3489_v22, %v6720_v14  ;;  %v2071_v23 = vmul.f32 %v3491_v7, %v4728_v49  ;;  %1627 = vadd.xlane.f32.xlu0 %v5380_v52  ;;  %v21_v61 = vld [vmem:[%s6426_s2 + $0x18] sm:$0xff] }
 0x23c   :  { %v3495_v39 = vpop.eup %3494  ;;  %v2924_v15 = vsel %vm198_vm0, %v2836_v21, 0.0  ;;  %v3017_v51 = vsel %vm198_vm0, %v2880_v62, 0.0  ;;  %v2835_v43 = vmul.f32 %v2517_v24, %v18_v40  ;;  %v2879_v12 = vmul.f32 %v2517_v24, %v62_v60  ;;  %1759 = vadd.xlane.f32.xlu1 %v5376_v28  ;;  %v5443_v60 = vpop.xlane.xlu0 %1525 }
 0x23d   :  { %vm2344_vm5 = vcmp.ge.f32.partialorder %v2256_v10, 0.0  ;;  %v2432_v49 = vmul.f32 0.15, %v2256_v10  ;;  %v2120_v34 = vmul.f32 %v5300_v19, %v2028_v16  ;;  %v2163_v62 = vmul.f32 %v5300_v19, %v2071_v23  ;;  %v5441_v40 = vpop.xlane.xlu1 %1657  ;;  %v3497_v28 = vpop.eup %3496 }
 0x23e   :  { %v2923_v52 = vsel %vm198_vm0, %v2835_v43, 0.0  ;;  %v3016_v22 = vsel %vm198_vm0, %v2879_v12, 0.0  ;;  %v2027_v7 = vmul.f32 %v3493_v36, %v4731_v11  ;;  %v2074_v20 = vmul.f32 %v3495_v39, %v4740_v56  ;;  %v20_v43 = vld [vmem:[%s6426_s2 + $0x10] sm:$0xff] }
 0x23f   :  { %v2925_v53 = vadd.f32 %v2924_v15, %v2923_v52  ;;  %v3018_v46 = vadd.f32 %v3017_v51, %v3016_v22  ;;  %v2520_v8 = vsel %vm2344_vm5, %v2256_v10, %v2432_v49  ;;  %v2212_v16 = vadd.f32 %v5348_v41, %v2120_v34  ;;  %v6721_v56 = vld [vmem:[#allocation58_spill] sm:$0xff] }
 0x240   :  { %v2838_v33 = vmul.f32 %v2520_v8, %v21_v61  ;;  %v2882_v29 = vmul.f32 %v2520_v8, %v65_v54  ;;  %v2255_v21 = vadd.f32 %v5348_v41, %v2163_v62  ;;  %v2119_v24 = vmul.f32 %v5300_v19, %v2027_v7  ;;  %v5459_v10 = vpop.xlane.xlu0 %1522  ;;  %v64_v15 = vld [vmem:[%s6426_s2 + $0x170] sm:$0xff] }
 0x241   :  { %vm2300_vm6 = vcmp.ge.f32.partialorder %v2212_v16, 0.0  ;;  %v2388_v14 = vmul.f32 0.15, %v2212_v16  ;;  %v2166_v11 = vmul.f32 %v5300_v19, %v2074_v20  ;;  %v2030_v36 = vmul.f32 %v3497_v28, %v6721_v56  ;;  %v5457_v23 = vpop.xlane.xlu1 %1654 }
 0x242   :  { %v2928_v39 = vsel %vm198_vm0, %v2838_v33, 0.0  ;;  %vm2343_vm7 = vcmp.ge.f32.partialorder %v2255_v21, 0.0  ;;  %v2431_v51 = vmul.f32 0.15, %v2255_v21  ;;  %v1765_v12 = vmul.f32 0.0625, %v5384_v32 }
 0x243   :  { %v2476_v49 = vsel %vm2300_vm6, %v2212_v16, %v2388_v14  ;;  %v2211_v34 = vadd.f32 %v5348_v41, %v2119_v24  ;;  %v2258_v62 = vadd.f32 %v5348_v41, %v2166_v11  ;;  %v2122_v28 = vmul.f32 %v5300_v19, %v2030_v36 }
 0x244   :  { %v3021_v52 = vsel %vm198_vm0, %v2882_v29, 0.0  ;;  %v2564_v22 = vmul.f32 %v2476_v49, %v21_v61  ;;  %v2519_v7 = vsel %vm2343_vm7, %v2255_v21, %v2431_v51  ;;  %3498 = vrsqrt.f32 %v5406_v4  ;;  %v23_v61 = vld [vmem:[%s6426_s2 + $0x28] sm:$0xff] }
 0x245   :  { %v2837_v20 = vmul.f32 %v2519_v7, %v20_v43  ;;  %v2881_v8 = vmul.f32 %v2519_v7, %v64_v15  ;;  %vm2299_vm8 = vcmp.ge.f32.partialorder %v2211_v34, 0.0  ;;  %v2387_v33 = vmul.f32 0.15, %v2211_v34  ;;  %v1664_v56 = vpop.xlane.xlu1 %1663  ;;  %v67_v4 = vld [vmem:[%s6426_s2 + $0x188] sm:$0xff] }
 0x246   :  { %v2608_v48 = vmul.f32 %v2476_v49, %v65_v54  ;;  %v2654_v32 = vsel %vm198_vm0, %v2564_v22, 0.0  ;;  %vm2346_vm9 = vcmp.ge.f32.partialorder %v2258_v62, 0.0  ;;  %v2434_v16 = vmul.f32 0.15, %v2258_v62  ;;  %v1532_v54 = vpop.xlane.xlu0 %1531 }
 0x247   :  { %v2926_v24 = vsel %vm198_vm0, %v2837_v20, 0.0  ;;  %v3019_v14 = vsel %vm198_vm0, %v2881_v8, 0.0  ;;  %v2475_v11 = vsel %vm2299_vm8, %v2211_v34, %v2387_v33  ;;  %v2214_v29 = vadd.f32 %v5348_v41, %v2122_v28 }
 0x248   :  { %v2927_v21 = vadd.f32 %v2926_v24, %v2925_v53  ;;  %v3020_v36 = vadd.f32 %v3019_v14, %v3018_v46  ;;  %v2563_v51 = vmul.f32 %v2475_v11, %v20_v43  ;;  %v2607_v49 = vmul.f32 %v2475_v11, %v64_v15 }
 0x249   :  { %v2522_v22 = vsel %vm2346_vm9, %v2258_v62, %v2434_v16  ;;  %vm2302_vm10 = vcmp.ge.f32.partialorder %v2214_v29, 0.0  ;;  %v2390_v7 = vmul.f32 0.15, %v2214_v29  ;;  %v1853_v20 = vadd.f32 1e-05, %v1765_v12  ;;  %v1661_v57 = vpop.xlane.xlu1 %1660 }
 0x24a   :  { %v2652_v34 = vsel %vm198_vm0, %v2563_v51, 0.0  ;;  %v2745_v8 = vsel %vm198_vm0, %v2607_v49, 0.0  ;;  %v2840_v33 = vmul.f32 %v2522_v22, %v23_v61  ;;  %v2884_v18 = vmul.f32 %v2522_v22, %v67_v4 }
 0x24b   :  { %v2653_v17 = vadd.f32 %v2652_v34, %v5422_v58  ;;  %v2746_v28 = vadd.f32 %v2745_v8, %v5424_v63  ;;  %v2478_v59 = vsel %vm2302_vm10, %v2214_v29, %v2390_v7  ;;  %v5485_v53 = vadd.f32 %v2928_v39, %v2927_v21  ;;  %v1529_v58 = vpop.xlane.xlu0 %1528 }
 0x24c   :  { %v2747_v46 = vsel %vm198_vm0, %v2608_v48, 0.0  ;;  %v5489_v43 = vsel %vm198_vm0, %v2840_v33, 0.0  ;;  %v2566_v15 = vmul.f32 %v2478_v59, %v23_v61  ;;  %v2610_v12 = vmul.f32 %v2478_v59, %v67_v4  ;;  %v6722_v59 = vld [vmem:[#allocation59_spill] sm:$0xff]  ;;  %v22_v33 = vld [vmem:[%s6426_s2 + $0x20] sm:$0xff] }
 0x24d   :  { %v5491_v62 = vadd.f32 %v3021_v52, %v3020_v36  ;;  %v5493_v16 = vadd.f32 %v2654_v32, %v2653_v17  ;;  %v5495_v24 = vadd.f32 %v2747_v46, %v2746_v28  ;;  %3500 = vrsqrt.f32 %v1853_v20  ;;  %v1670_v36 = vpop.xlane.xlu1 %1669  ;;  %v66_v28 = vld [vmem:[%s6426_s2 + $0x180] sm:$0xff] }
 0x24e   :  { %v3499_v14 = vpop.eup %3498  ;;  %v5498_v63 = vsel %vm198_vm0, %v2884_v18, 0.0  ;;  %v5501_v39 = vsel %vm198_vm0, %v2566_v15, 0.0  ;;  %v1812_v48 = vmul.f32 0.0625, %v5408_v0  ;;  %v1768_v11 = vmul.f32 0.0625, %v5410_v37 }
 0x24f   :  { %v2073_v52 = vmul.f32 %v3499_v14, %v6722_v59  ;;  %v1811_v17 = vmul.f32 0.0625, %v5418_v35  ;;  %v1767_v32 = vmul.f32 0.0625, %v5420_v2  ;;  %v1814_v61 = vmul.f32 0.0625, %v5441_v40  ;;  %v1538_v20 = vpop.xlane.xlu0 %1537 }
 0x250   :  { %v1900_v4 = vadd.f32 1e-05, %v1812_v48  ;;  %v1856_v29 = vadd.f32 1e-05, %v1768_v11  ;;  %v1770_v18 = vmul.f32 0.0625, %v5443_v60  ;;  %v1813_v21 = vmul.f32 0.0625, %v5457_v23 }
 0x251   :  { %v5512_v51 = vsel %vm198_vm0, %v2610_v12, 0.0  ;;  %v2165_v37 = vmul.f32 %v5300_v19, %v2073_v52  ;;  %v1899_v0 = vadd.f32 1e-05, %v1811_v17  ;;  %v1855_v49 = vadd.f32 1e-05, %v1767_v32  ;;  %v1667_v12 = vpop.xlane.xlu1 %1666  ;;  %v6723_v17 = vld [vmem:[#allocation6_spill] sm:$0xff] }
 0x252   :  { %3502 = vrsqrt.f32 %v1900_v4  ;;  %v1902_v35 = vadd.f32 1e-05, %v1814_v61  ;;  %v1858_v22 = vadd.f32 1e-05, %v1770_v18  ;;  %v1769_v2 = vmul.f32 0.0625, %v5459_v10 }
 0x253   :  { %v2257_v40 = vadd.f32 %v5348_v41, %v2165_v37  ;;  %3504 = vrsqrt.f32 %v1856_v29  ;;  %v1816_v7 = vmul.f32 0.0625, %v1664_v56  ;;  %v1772_v60 = vmul.f32 0.0625, %v1532_v54 }
 0x254   :  { %3506 = vrsqrt.f32 %v1899_v0  ;;  %v1901_v23 = vadd.f32 1e-05, %v1813_v21  ;;  %v1857_v34 = vadd.f32 1e-05, %v1769_v2  ;;  %v1815_v8 = vmul.f32 0.0625, %v1661_v57 }
 0x255   :  { %vm2345_vm11 = vcmp.ge.f32.partialorder %v2257_v40, 0.0  ;;  %v2433_v10 = vmul.f32 0.15, %v2257_v40  ;;  %3508 = vrsqrt.f32 %v1855_v49  ;;  %v1771_v46 = vmul.f32 0.0625, %v1529_v58  ;;  %v1535_v58 = vpop.xlane.xlu0 %1534 }
 0x256   :  { %3510 = vrsqrt.f32 %v1902_v35  ;;  %v1904_v56 = vadd.f32 1e-05, %v1816_v7  ;;  %v1860_v54 = vadd.f32 1e-05, %v1772_v60  ;;  %v1903_v15 = vadd.f32 1e-05, %v1815_v8  ;;  %v1676_v7 = vpop.xlane.xlu1 %1675 }
 0x257   :  { %v3501_v14 = vpop.eup %3500  ;;  %v2521_v48 = vsel %vm2345_vm11, %v2257_v40, %v2433_v10  ;;  %3512 = vrsqrt.f32 %v1858_v22  ;;  %v1818_v57 = vmul.f32 0.0625, %v1670_v36  ;;  %v1774_v11 = vmul.f32 0.0625, %v1538_v20  ;;  %v6724_v20 = vld [vmem:[#allocation8_spill] sm:$0xff]  ;;  %v6725_v10 = vld [vmem:[#allocation7_spill] sm:$0xff] }
 0x258   :  { %v2839_v59 = vmul.f32 %v2521_v48, %v22_v33  ;;  %v2883_v52 = vmul.f32 %v2521_v48, %v66_v28  ;;  %v2029_v32 = vmul.f32 %v3501_v14, %v6723_v17  ;;  %3514 = vrsqrt.f32 %v1901_v23 }
 0x259   :  { %3516 = vrsqrt.f32 %v1857_v34  ;;  %v1859_v61 = vadd.f32 1e-05, %v1771_v46  ;;  %v1906_v4 = vadd.f32 1e-05, %v1818_v57  ;;  %v1817_v29 = vmul.f32 0.0625, %v1667_v12  ;;  %v6727_v57 = vld [vmem:[#allocation10_spill] sm:$0xff] }
 0x25a   :  { %v2930_v18 = vsel %vm198_vm0, %v2839_v59, 0.0  ;;  %v3023_v21 = vsel %vm198_vm0, %v2883_v52, 0.0  ;;  %v2121_v37 = vmul.f32 %v5300_v19, %v2029_v32  ;;  %3518 = vrsqrt.f32 %v1904_v56 }
 0x25b   :  { %v2931_v36 = vadd.f32 %v2930_v18, %v5485_v53  ;;  %v3024_v0 = vadd.f32 %v3023_v21, %v5491_v62  ;;  %3520 = vrsqrt.f32 %v1860_v54  ;;  %v1862_v49 = vadd.f32 1e-05, %v1774_v11  ;;  %v6728_v21 = vld [vmem:[#allocation12_spill] sm:$0xff] }
 0x25c   :  { %v3503_v35 = vpop.eup %3502  ;;  %v2213_v22 = vadd.f32 %v5348_v41, %v2121_v37  ;;  %3522 = vrsqrt.f32 %v1903_v15  ;;  %v1905_v2 = vadd.f32 1e-05, %v1817_v29  ;;  %v5530_v40 = vmul.f32 0.0625, %v1535_v58  ;;  %v6726_v15 = vld [vmem:[#allocation9_spill] sm:$0xff]  ;;  %v25_v29 = vld [vmem:[%s6426_s2 + $0x38] sm:$0xff] }
 0x25d   :  { %v3505_v60 = vpop.eup %3504  ;;  %v2076_v23 = vmul.f32 %v3503_v35, %v6724_v20  ;;  %v5534_v34 = vadd.f32 %v5489_v43, %v2931_v36  ;;  %v5537_v53 = vadd.f32 %v5498_v63, %v3024_v0  ;;  %3524 = vrsqrt.f32 %v1859_v61  ;;  %v6729_v36 = vld [vmem:[#allocation11_spill] sm:$0xff] }
 0x25e   :  { %v3507_v62 = vpop.eup %3506  ;;  %vm2301_vm12 = vcmp.ge.f32.partialorder %v2213_v22, 0.0  ;;  %v2389_v8 = vmul.f32 0.15, %v2213_v22  ;;  %v2032_v46 = vmul.f32 %v3505_v60, %v6725_v10  ;;  %3526 = vrsqrt.f32 %v1906_v4  ;;  %v69_v35 = vld [vmem:[%s6426_s2 + $0x198] sm:$0xff] }
 0x25f   :  { %v3509_v56 = vpop.eup %3508  ;;  %v2168_v54 = vmul.f32 %v5300_v19, %v2076_v23  ;;  %v2075_v12 = vmul.f32 %v3507_v62, %v6726_v15  ;;  %3528 = vrsqrt.f32 %v1862_v49  ;;  %v5542_v14 = vmul.f32 0.0625, %v1676_v7 }
 0x260   :  { %v3511_v43 = vpop.eup %3510  ;;  %v2477_v48 = vsel %vm2301_vm12, %v2213_v22, %v2389_v8  ;;  %v2124_v63 = vmul.f32 %v5300_v19, %v2032_v46  ;;  %v2031_v11 = vmul.f32 %v3509_v56, %v6727_v57  ;;  %3530 = vrsqrt.f32 %v1905_v2  ;;  %v68_v57 = vld [vmem:[%s6426_s2 + $0x190] sm:$0xff] }
 0x261   :  { %v3513_v59 = vpop.eup %3512  ;;  %v2565_v52 = vmul.f32 %v2477_v48, %v22_v33  ;;  %v2609_v17 = vmul.f32 %v2477_v48, %v66_v28  ;;  %v2260_v32 = vadd.f32 %v5348_v41, %v2168_v54  ;;  %v2167_v61 = vmul.f32 %v5300_v19, %v2075_v12 }
 0x262   :  { %v3515_v4 = vpop.eup %3514  ;;  %v2216_v58 = vadd.f32 %v5348_v41, %v2124_v63  ;;  %v2123_v18 = vmul.f32 %v5300_v19, %v2031_v11  ;;  %v2078_v37 = vmul.f32 %v3511_v43, %v6728_v21  ;;  %v2034_v0 = vmul.f32 %v3513_v59, %v6729_v36  ;;  %v24_v63 = vld [vmem:[%s6426_s2 + $0x30] sm:$0xff] }
 0x263   :  { %v3517_v49 = vpop.eup %3516  ;;  %v2656_v33 = vsel %vm198_vm0, %v2565_v52, 0.0  ;;  %v2749_v28 = vsel %vm198_vm0, %v2609_v17, 0.0  ;;  %vm2348_vm13 = vcmp.ge.f32.partialorder %v2260_v32, 0.0  ;;  %v2436_v22 = vmul.f32 0.15, %v2260_v32 }
 0x264   :  { %v3519_v2 = vpop.eup %3518  ;;  %v2657_v7 = vadd.f32 %v2656_v33, %v5493_v16  ;;  %v2750_v60 = vadd.f32 %v2749_v28, %v5495_v24  ;;  %vm2304_vm14 = vcmp.ge.f32.partialorder %v2216_v58, 0.0  ;;  %v2392_v20 = vmul.f32 0.15, %v2216_v58 }
 0x265   :  { %v5562_v23 = vpop.eup %3520  ;;  %v2524_v62 = vsel %vm2348_vm13, %v2260_v32, %v2436_v22  ;;  %v2259_v8 = vadd.f32 %v5348_v41, %v2167_v61  ;;  %v2215_v10 = vadd.f32 %v5348_v41, %v2123_v18  ;;  %v2170_v46 = vmul.f32 %v5300_v19, %v2078_v37  ;;  %v6730_v22 = vld [vmem:[#allocation13_spill] sm:$0xff] }
 0x266   :  { %v5567_v56 = vpop.eup %3522  ;;  %v2842_v54 = vmul.f32 %v2524_v62, %v25_v29  ;;  %v2886_v15 = vmul.f32 %v2524_v62, %v69_v35  ;;  %v2480_v12 = vsel %vm2304_vm14, %v2216_v58, %v2392_v20  ;;  %v2659_v16 = vadd.f32 %v5501_v39, %v2657_v7  ;;  %v6731_v7 = vld [vmem:[#allocation14_spill] sm:$0xff]  ;;  %v6732_v20 = vld [vmem:[#allocation16_spill] sm:$0xff] }
 0x267   :  { %v5570_v43 = vpop.eup %3524  ;;  %v2568_v24 = vmul.f32 %v2480_v12, %v25_v29  ;;  %v2612_v48 = vmul.f32 %v2480_v12, %v69_v35  ;;  %vm2347_vm15 = vcmp.ge.f32.partialorder %v2259_v8, 0.0  ;;  %v2435_v11 = vmul.f32 0.15, %v2259_v8 }
 0x268   :  { %v5578_v59 = vpop.eup %3526  ;;  %v2936_v52 = vsel %vm198_vm0, %v2842_v54, 0.0  ;;  %v3029_v39 = vsel %vm198_vm0, %v2886_v15, 0.0  ;;  %v2752_v17 = vadd.f32 %v5512_v51, %v2750_v60  ;;  %vm2303_vm1 = vcmp.ge.f32.partialorder %v2215_v10, 0.0 }
 0x269   :  { %v5583_v32 = vpop.eup %3528  ;;  %v2662_v61 = vsel %vm198_vm0, %v2568_v24, 0.0  ;;  %v2755_v29 = vsel %vm198_vm0, %v2612_v48, 0.0  ;;  %v2523_v58 = vsel %vm2347_vm15, %v2259_v8, %v2435_v11  ;;  %v2391_v18 = vmul.f32 0.15, %v2215_v10 }
 0x26a   :  { %v5587_v21 = vpop.eup %3530  ;;  %v2841_v37 = vmul.f32 %v2523_v58, %v24_v63  ;;  %v2885_v36 = vmul.f32 %v2523_v58, %v68_v57  ;;  %v2262_v33 = vadd.f32 %v5348_v41, %v2170_v46  ;;  %v2126_v28 = vmul.f32 %v5300_v19, %v2034_v0  ;;  %v27_v0 = vld [vmem:[%s6426_s2 + $0x48] sm:$0xff] }
 0x26b   :  { %v2479_v35 = vsel %vm2303_vm1, %v2215_v10, %v2391_v18  ;;  %v2077_v51 = vmul.f32 %v3515_v4, %v6730_v22  ;;  %v2033_v60 = vmul.f32 %v3517_v49, %v6731_v7  ;;  %v2080_v62 = vmul.f32 %v3519_v2, %v6732_v20  ;;  %v71_v4 = vld [vmem:[%s6426_s2 + $0x1a8] sm:$0xff] }
 0x26c   :  { %v2934_v54 = vsel %vm198_vm0, %v2841_v37, 0.0  ;;  %v3027_v8 = vsel %vm198_vm0, %v2885_v36, 0.0  ;;  %v2567_v15 = vmul.f32 %v2479_v35, %v24_v63  ;;  %v2611_v12 = vmul.f32 %v2479_v35, %v68_v57 }
 0x26d   :  { %v2935_v24 = vadd.f32 %v2934_v54, %v5534_v34  ;;  %v3028_v48 = vadd.f32 %v3027_v8, %v5537_v53  ;;  %vm2350_vm2 = vcmp.ge.f32.partialorder %v2262_v33, 0.0  ;;  %v2438_v49 = vmul.f32 0.15, %v2262_v33 }
 0x26e   :  { %v2660_v2 = vsel %vm198_vm0, %v2567_v15, 0.0  ;;  %v2753_v10 = vsel %vm198_vm0, %v2611_v12, 0.0  ;;  %v2218_v46 = vadd.f32 %v5348_v41, %v2126_v28  ;;  %v2169_v34 = vmul.f32 %v5300_v19, %v2077_v51  ;;  %v6733_v15 = vld [vmem:[#allocation15_spill] sm:$0xff]  ;;  %v6734_v12 = vld [vmem:[#allocation17_spill] sm:$0xff] }
 0x26f   :  { %v2661_v63 = vadd.f32 %v2660_v2, %v2659_v16  ;;  %v2754_v53 = vadd.f32 %v2753_v10, %v2752_v17  ;;  %v2526_v57 = vsel %vm2350_vm2, %v2262_v33, %v2438_v49  ;;  %v2937_v11 = vadd.f32 %v2936_v52, %v2935_v24  ;;  %v26_v52 = vld [vmem:[%s6426_s2 + $0x40] sm:$0xff]  ;;  %v6735_v2 = vld [vmem:[#allocation18_spill] sm:$0xff] }
 0x270   :  { %v2844_v58 = vmul.f32 %v2526_v57, %v27_v0  ;;  %v2888_v18 = vmul.f32 %v2526_v57, %v71_v4  ;;  %vm2306_vm3 = vcmp.ge.f32.partialorder %v2218_v46, 0.0  ;;  %v2394_v37 = vmul.f32 0.15, %v2218_v46  ;;  %v70_v33 = vld [vmem:[%s6426_s2 + $0x1a0] sm:$0xff] }
 0x271   :  { %v2261_v36 = vadd.f32 %v5348_v41, %v2169_v34  ;;  %v3030_v35 = vadd.f32 %v3029_v39, %v3028_v48  ;;  %v2663_v22 = vadd.f32 %v2662_v61, %v2661_v63  ;;  %v2756_v7 = vadd.f32 %v2755_v29, %v2754_v53  ;;  %v5618_v61 = vpop.xlane.xlu0 %1543  ;;  %v5626_v48 = vpop.xlane.xlu1 %1672 }
 0x272   :  { %v2940_v20 = vsel %vm198_vm0, %v2844_v58, 0.0  ;;  %v3033_v54 = vsel %vm198_vm0, %v2888_v18, 0.0  ;;  %v2482_v28 = vsel %vm2306_vm3, %v2218_v46, %v2394_v37  ;;  %v2125_v51 = vmul.f32 %v5300_v19, %v2033_v60  ;;  %v6736_v37 = vld [vmem:[#allocation20_spill] sm:$0xff] }
 0x273   :  { %v2570_v16 = vmul.f32 %v2482_v28, %v27_v0  ;;  %v2614_v17 = vmul.f32 %v2482_v28, %v71_v4  ;;  %vm2349_vm4 = vcmp.ge.f32.partialorder %v2261_v36, 0.0  ;;  %v2437_v39 = vmul.f32 0.15, %v2261_v36 }
 0x274   :  { %v2217_v29 = vadd.f32 %v5348_v41, %v2125_v51  ;;  %v2172_v8 = vmul.f32 %v5300_v19, %v2080_v62  ;;  %v2036_v60 = vmul.f32 %v5562_v23, %v6733_v15  ;;  %v2079_v24 = vmul.f32 %v5567_v56, %v6734_v12 }
 0x275   :  { %v2666_v0 = vsel %vm198_vm0, %v2570_v16, 0.0  ;;  %v2759_v4 = vsel %vm198_vm0, %v2614_v17, 0.0  ;;  %v2525_v49 = vsel %vm2349_vm4, %v2261_v36, %v2437_v39  ;;  %v2035_v10 = vmul.f32 %v5570_v43, %v6735_v2  ;;  %v5640_v17 = vpop.xlane.xlu0 %1540  ;;  %v29_v39 = vld [vmem:[%s6426_s2 + $0x58] sm:$0xff] }
 0x276   :  { %v2843_v46 = vmul.f32 %v2525_v49, %v26_v52  ;;  %v2887_v34 = vmul.f32 %v2525_v49, %v70_v33  ;;  %vm2305_vm5 = vcmp.ge.f32.partialorder %v2217_v29, 0.0  ;;  %v2393_v62 = vmul.f32 0.15, %v2217_v29 }
 0x277   :  { %v2264_v63 = vadd.f32 %v5348_v41, %v2172_v8  ;;  %v2128_v23 = vmul.f32 %v5300_v19, %v2036_v60  ;;  %v2171_v56 = vmul.f32 %v5300_v19, %v2079_v24  ;;  %v2127_v53 = vmul.f32 %v5300_v19, %v2035_v10  ;;  %v73_v8 = vld [vmem:[%s6426_s2 + $0x1b8] sm:$0xff] }
 0x278   :  { %v2938_v57 = vsel %vm198_vm0, %v2843_v46, 0.0  ;;  %v3031_v58 = vsel %vm198_vm0, %v2887_v34, 0.0  ;;  %v2481_v18 = vsel %vm2305_vm5, %v2217_v29, %v2393_v62  ;;  %v2082_v43 = vmul.f32 %v5578_v59, %v6736_v37  ;;  %v28_v34 = vld [vmem:[%s6426_s2 + $0x50] sm:$0xff] }
 0x279   :  { %v2939_v36 = vadd.f32 %v2938_v57, %v2937_v11  ;;  %v3032_v28 = vadd.f32 %v3031_v58, %v3030_v35  ;;  %v2569_v51 = vmul.f32 %v2481_v18, %v26_v52  ;;  %v2613_v16 = vmul.f32 %v2481_v18, %v70_v33  ;;  %v5650_v11 = vpop.xlane.xlu1 %1681  ;;  %v72_v62 = vld [vmem:[%s6426_s2 + $0x1b0] sm:$0xff]  ;;  %v5664_v58 = vpop.xlane.xlu0 %1549 }
 0x27a   :  { %vm2352_vm6 = vcmp.ge.f32.partialorder %v2264_v63, 0.0  ;;  %v2440_v15 = vmul.f32 0.15, %v2264_v63  ;;  %v2220_v29 = vadd.f32 %v5348_v41, %v2128_v23  ;;  %v2263_v59 = vadd.f32 %v5348_v41, %v2171_v56 }
 0x27b   :  { %v2664_v35 = vsel %vm198_vm0, %v2569_v51, 0.0  ;;  %v2757_v52 = vsel %vm198_vm0, %v2613_v16, 0.0  ;;  %v2941_v33 = vadd.f32 %v2940_v20, %v2939_v36  ;;  %v3034_v60 = vadd.f32 %v3033_v54, %v3032_v28 }
 0x27c   :  { %v2665_v12 = vadd.f32 %v2664_v35, %v2663_v22  ;;  %v2758_v24 = vadd.f32 %v2757_v52, %v2756_v7  ;;  %v2528_v49 = vsel %vm2352_vm6, %v2264_v63, %v2440_v15  ;;  %vm2308_vm7 = vcmp.ge.f32.partialorder %v2220_v29, 0.0 }
 0x27d   :  { %v2846_v2 = vmul.f32 %v2528_v49, %v29_v39  ;;  %v2890_v10 = vmul.f32 %v2528_v49, %v73_v8  ;;  %v2396_v46 = vmul.f32 0.15, %v2220_v29  ;;  %vm2351_vm8 = vcmp.ge.f32.partialorder %v2263_v59, 0.0  ;;  %v5667_v28 = vpop.xlane.xlu1 %1678 }
 0x27e   :  { %v2439_v23 = vmul.f32 0.15, %v2263_v59  ;;  %v2667_v56 = vadd.f32 %v2666_v0, %v2665_v12  ;;  %v2760_v20 = vadd.f32 %v2759_v4, %v2758_v24  ;;  %v2219_v22 = vadd.f32 %v5348_v41, %v2127_v53 }
 0x27f   :  { %v2944_v7 = vsel %vm198_vm0, %v2846_v2, 0.0  ;;  %v2484_v54 = vsel %vm2308_vm7, %v2220_v29, %v2396_v46  ;;  %v2174_v63 = vmul.f32 %v5300_v19, %v2082_v43  ;;  %v1861_v57 = vadd.f32 1e-05, %v5530_v40  ;;  %v6737_v43 = vld [vmem:[#allocation19_spill] sm:$0xff]  ;;  %v6738_v29 = vld [vmem:[#allocation21_spill] sm:$0xff]  ;;  %v1547_v46 = vpop.xlane.xlu0 %1546 }
 0x280   :  { %v3037_v18 = vsel %vm198_vm0, %v2890_v10, 0.0  ;;  %v2572_v37 = vmul.f32 %v2484_v54, %v29_v39  ;;  %v2527_v36 = vsel %vm2351_vm8, %v2263_v59, %v2439_v23  ;;  %vm2307_vm9 = vcmp.ge.f32.partialorder %v2219_v22, 0.0 }
 0x281   :  { %v2845_v0 = vmul.f32 %v2527_v36, %v28_v34  ;;  %v2889_v4 = vmul.f32 %v2527_v36, %v72_v62  ;;  %v2395_v51 = vmul.f32 0.15, %v2219_v22  ;;  %v2266_v53 = vadd.f32 %v5348_v41, %v2174_v63  ;;  %v75_v63 = vld [vmem:[%s6426_s2 + $0x1c8] sm:$0xff] }
 0x282   :  { %v2616_v16 = vmul.f32 %v2484_v54, %v73_v8  ;;  %v2670_v15 = vsel %vm198_vm0, %v2572_v37, 0.0  ;;  %v2038_v40 = vmul.f32 %v5583_v32, %v6737_v43  ;;  %v2081_v35 = vmul.f32 %v5587_v21, %v6738_v29  ;;  %v5680_v8 = vld [vmem:[%s6426_s2 + $0x68] sm:$0xff] }
 0x283   :  { %v2942_v39 = vsel %vm198_vm0, %v2845_v0, 0.0  ;;  %v3035_v59 = vsel %vm198_vm0, %v2889_v4, 0.0  ;;  %v2483_v52 = vsel %vm2307_vm9, %v2219_v22, %v2395_v51  ;;  %vm2354_vm10 = vcmp.ge.f32.partialorder %v2266_v53, 0.0  ;;  %v1556_v29 = vpop.xlane.xlu0 %1555 }
 0x284   :  { %v2943_v12 = vadd.f32 %v2942_v39, %v2941_v33  ;;  %v3036_v24 = vadd.f32 %v3035_v59, %v3034_v60  ;;  %v2571_v49 = vmul.f32 %v2483_v52, %v28_v34  ;;  %v2615_v2 = vmul.f32 %v2483_v52, %v72_v62  ;;  %v1688_v34 = vpop.xlane.xlu1 %1687 }
 0x285   :  { %v2442_v10 = vmul.f32 0.15, %v2266_v53  ;;  %v2130_v32 = vmul.f32 %v5300_v19, %v2038_v40  ;;  %v2173_v21 = vmul.f32 %v5300_v19, %v2081_v35  ;;  %3532 = vrsqrt.f32 %v1861_v57 }
 0x286   :  { %v2668_v23 = vsel %vm198_vm0, %v2571_v49, 0.0  ;;  %v2761_v22 = vsel %vm198_vm0, %v2615_v2, 0.0  ;;  %v2945_v33 = vadd.f32 %v2944_v7, %v2943_v12  ;;  %v3038_v60 = vadd.f32 %v3037_v18, %v3036_v24 }
 0x287   :  { %v2669_v62 = vadd.f32 %v2668_v23, %v2667_v56  ;;  %v2762_v54 = vadd.f32 %v2761_v22, %v2760_v20  ;;  %v2530_v37 = vsel %vm2354_vm10, %v2266_v53, %v2442_v10  ;;  %v2222_v36 = vadd.f32 %v5348_v41, %v2130_v32  ;;  %v5698_v56 = vld [vmem:[%s6426_s2 + $0x60] sm:$0xff] }
 0x288   :  { %v2763_v57 = vsel %vm198_vm0, %v2616_v16, 0.0  ;;  %v2848_v0 = vmul.f32 %v2530_v37, %v5680_v8  ;;  %v2265_v4 = vadd.f32 %v5348_v41, %v2173_v21  ;;  %v1908_v7 = vadd.f32 1e-05, %v5542_v14  ;;  %v5707_v16 = vld [vmem:[%s6426_s2 + $0x1c0] sm:$0xff]  ;;  %v1685_v59 = vpop.xlane.xlu1 %1684 }
 0x289   :  { %v5700_v20 = vadd.f32 %v2670_v15, %v2669_v62  ;;  %v5702_v18 = vadd.f32 %v2763_v57, %v2762_v54  ;;  %v2892_v51 = vmul.f32 %v2530_v37, %v75_v63  ;;  %v2398_v53 = vmul.f32 0.15, %v2222_v36  ;;  %v6739_v54 = vld [vmem:[#allocation22_spill] sm:$0xff] }
 0x28a   :  { %vm2353_vm11 = vcmp.ge.f32.partialorder %v2265_v4, 0.0  ;;  %v2441_v43 = vmul.f32 0.15, %v2265_v4  ;;  %vm2310_vm12 = vcmp.ge.f32.partialorder %v2222_v36, 0.0  ;;  %3534 = vrsqrt.f32 %v1908_v7 }
 0x28b   :  { %v1776_v14 = vmul.f32 0.0625, %v5618_v61  ;;  %v1819_v40 = vmul.f32 0.0625, %v5626_v48  ;;  %v2948_v15 = vsel %vm198_vm0, %v2848_v0, 0.0  ;;  %v1775_v39 = vmul.f32 0.0625, %v5640_v17 }
 0x28c   :  { %v2529_v35 = vsel %vm2353_vm11, %v2265_v4, %v2441_v43  ;;  %v3041_v2 = vsel %vm198_vm0, %v2892_v51, 0.0  ;;  %v2486_v10 = vsel %vm2310_vm12, %v2222_v36, %v2398_v53  ;;  %v1822_v61 = vmul.f32 0.0625, %v5650_v11  ;;  %v1553_v4 = vpop.xlane.xlu0 %1552  ;;  %v1694_v43 = vpop.xlane.xlu1 %1693 }
 0x28d   :  { %v2847_v52 = vmul.f32 %v2529_v35, %v5698_v56  ;;  %v2891_v12 = vmul.f32 %v2529_v35, %v5707_v16  ;;  %v1864_v24 = vadd.f32 1e-05, %v1776_v14  ;;  %v1907_v49 = vadd.f32 1e-05, %v1819_v40 }
 0x28e   :  { %v1863_v32 = vadd.f32 1e-05, %v1775_v39  ;;  %v1778_v17 = vmul.f32 0.0625, %v5664_v58  ;;  %v1910_v57 = vadd.f32 1e-05, %v1822_v61  ;;  %v1821_v36 = vmul.f32 0.0625, %v5667_v28 }
 0x28f   :  { %v3533_v48 = vpop.eup %3532  ;;  %v2946_v21 = vsel %vm198_vm0, %v2847_v52, 0.0  ;;  %v3039_v23 = vsel %vm198_vm0, %v2891_v12, 0.0  ;;  %3536 = vrsqrt.f32 %v1864_v24  ;;  %v1777_v53 = vmul.f32 0.0625, %v1547_v46  ;;  %v6740_v12 = vld [vmem:[#allocation24_spill] sm:$0xff] }
 0x290   :  { %v2947_v22 = vadd.f32 %v2946_v21, %v2945_v33  ;;  %v3040_v62 = vadd.f32 %v3039_v23, %v3038_v60  ;;  %v2037_v37 = vmul.f32 %v3533_v48, %v6739_v54  ;;  %3538 = vrsqrt.f32 %v1907_v49  ;;  %v5732_v48 = vpop.xlane.xlu1 %1690 }
 0x291   :  { %3540 = vrsqrt.f32 %v1863_v32  ;;  %v1866_v0 = vadd.f32 1e-05, %v1778_v17  ;;  %v2574_v58 = vmul.f32 %v2486_v10, %v5680_v8  ;;  %v1909_v33 = vadd.f32 1e-05, %v1821_v36  ;;  %v1562_v8 = vpop.xlane.xlu0 %1561  ;;  %v6741_v17 = vld [vmem:[#allocation23_spill] sm:$0xff] }
 0x292   :  { %v2129_v11 = vmul.f32 %v5300_v19, %v2037_v37  ;;  %v5723_v7 = vadd.f32 %v2948_v15, %v2947_v22  ;;  %v5725_v51 = vadd.f32 %v3041_v2, %v3040_v62  ;;  %3542 = vrsqrt.f32 %v1910_v57 }
 0x293   :  { %v1824_v60 = vmul.f32 0.0625, %v1688_v34  ;;  %3544 = vrsqrt.f32 %v1866_v0  ;;  %v1780_v40 = vmul.f32 0.0625, %v1556_v29  ;;  %v2618_v28 = vmul.f32 %v2486_v10, %v75_v63  ;;  %v6742_v0 = vld [vmem:[#allocation25_spill] sm:$0xff] }
 0x294   :  { %v2221_v14 = vadd.f32 %v5348_v41, %v2129_v11  ;;  %v3535_v35 = vpop.eup %3534  ;;  %3546 = vrsqrt.f32 %v1909_v33  ;;  %v1865_v39 = vadd.f32 1e-05, %v1777_v53  ;;  %v1823_v52 = vmul.f32 0.0625, %v1685_v59 }
 0x295   :  { %v2084_v24 = vmul.f32 %v3535_v35, %v6740_v12  ;;  %v1912_v46 = vadd.f32 1e-05, %v1824_v60  ;;  %v2674_v49 = vsel %vm198_vm0, %v2574_v58, 0.0  ;;  %v1868_v32 = vadd.f32 1e-05, %v1780_v40  ;;  %v5747_v35 = vpop.xlane.xlu0 %1558 }
 0x296   :  { %vm2309_vm13 = vcmp.ge.f32.partialorder %v2221_v14, 0.0  ;;  %v2397_v15 = vmul.f32 0.15, %v2221_v14  ;;  %v1779_v61 = vmul.f32 0.0625, %v1553_v4  ;;  %v2767_v63 = vsel %vm198_vm0, %v2618_v28, 0.0 }
 0x297   :  { %v2176_v34 = vmul.f32 %v5300_v19, %v2084_v24  ;;  %3548 = vrsqrt.f32 %v1865_v39  ;;  %v1911_v62 = vadd.f32 1e-05, %v1823_v52  ;;  %v1826_v4 = vmul.f32 0.0625, %v1694_v43  ;;  %v5754_v52 = vpop.xlane.xlu1 %1699 }
 0x298   :  { %v2485_v2 = vsel %vm2309_vm13, %v2221_v14, %v2397_v15  ;;  %3550 = vrsqrt.f32 %v1912_v46  ;;  %v1867_v11 = vadd.f32 1e-05, %v1779_v61  ;;  %v6743_v14 = vld [vmem:[#allocation26_spill] sm:$0xff]  ;;  %v6745_v61 = vld [vmem:[#allocation27_spill] sm:$0xff] }
 0x299   :  { %v3537_v29 = vpop.eup %3536  ;;  %v2573_v59 = vmul.f32 %v2485_v2, %v5698_v56  ;;  %v2617_v10 = vmul.f32 %v2485_v2, %v5707_v16  ;;  %v2268_v23 = vadd.f32 %v5348_v41, %v2176_v34  ;;  %3552 = vrsqrt.f32 %v1868_v32 }
 0x29a   :  { %v3539_v21 = vpop.eup %3538  ;;  %v2040_v22 = vmul.f32 %v3537_v29, %v6741_v17  ;;  %v1914_v46 = vadd.f32 1e-05, %v1826_v4  ;;  %v1782_v2 = vmul.f32 0.0625, %v1562_v8  ;;  %v6746_v29 = vld [vmem:[#allocation29_spill] sm:$0xff]  ;;  %3554 = vrsqrt.f32 %v1911_v62  ;;  %v32_v8 = vld [vmem:[%s6426_s2 + $0x70] sm:$0xff] }
 0x29b   :  { %v3541_v54 = vpop.eup %3540  ;;  %v2672_v37 = vsel %vm198_vm0, %v2573_v59, 0.0  ;;  %v2765_v57 = vsel %vm198_vm0, %v2617_v10, 0.0  ;;  %v2083_v36 = vmul.f32 %v3539_v21, %v6742_v0  ;;  %v2444_v58 = vmul.f32 0.15, %v2268_v23  ;;  %v33_v21 = vld [vmem:[%s6426_s2 + $0x78] sm:$0xff] }
 0x29c   :  { %v2673_v56 = vadd.f32 %v2672_v37, %v5700_v20  ;;  %v2766_v16 = vadd.f32 %v2765_v57, %v5702_v18  ;;  %v3543_v53 = vpop.eup %3542  ;;  %v2132_v33 = vmul.f32 %v5300_v19, %v2040_v22  ;;  %v2039_v40 = vmul.f32 %v3541_v54, %v6743_v14  ;;  %v6744_v20 = vld [vmem:[#allocation28_spill] sm:$0xff] }
 0x29d   :  { %v2175_v60 = vmul.f32 %v5300_v19, %v2083_v36  ;;  %v3545_v28 = vpop.eup %3544  ;;  %vm2356_vm14 = vcmp.ge.f32.partialorder %v2268_v23, 0.0  ;;  %v2086_v18 = vmul.f32 %v3543_v53, %v6744_v20  ;;  %3556 = vrsqrt.f32 %v1867_v11  ;;  %v5775_v36 = vpop.xlane.xlu0 %1567  ;;  %v77_v53 = vld [vmem:[%s6426_s2 + $0x1d8] sm:$0xff] }
 0x29e   :  { %v5749_v39 = vadd.f32 %v2674_v49, %v2673_v56  ;;  %v5751_v43 = vadd.f32 %v2767_v63, %v2766_v16  ;;  %v3547_v15 = vpop.eup %3546  ;;  %v2224_v12 = vadd.f32 %v5348_v41, %v2132_v33  ;;  %v2131_v34 = vmul.f32 %v5300_v19, %v2039_v40  ;;  %v5777_v16 = vpop.xlane.xlu1 %1696 }
 0x29f   :  { %v2267_v24 = vadd.f32 %v5348_v41, %v2175_v60  ;;  %v2178_v32 = vmul.f32 %v5300_v19, %v2086_v18  ;;  %v2042_v49 = vmul.f32 %v3545_v28, %v6745_v61  ;;  %v2085_v63 = vmul.f32 %v3547_v15, %v6746_v29 }
 0x2a0   :  { %v2532_v59 = vsel %vm2356_vm14, %v2268_v23, %v2444_v58  ;;  %vm2312_vm15 = vcmp.ge.f32.partialorder %v2224_v12, 0.0  ;;  %v2400_v10 = vmul.f32 0.15, %v2224_v12  ;;  %v2223_v22 = vadd.f32 %v5348_v41, %v2131_v34  ;;  %v76_v23 = vld [vmem:[%s6426_s2 + $0x1d0] sm:$0xff] }
 0x2a1   :  { %vm2355_vm1 = vcmp.ge.f32.partialorder %v2267_v24, 0.0  ;;  %v2443_v17 = vmul.f32 0.15, %v2267_v24  ;;  %v2270_v54 = vadd.f32 %v5348_v41, %v2178_v32  ;;  %v3549_v37 = vpop.eup %3548  ;;  %v2134_v62 = vmul.f32 %v5300_v19, %v2042_v49  ;;  %v79_v49 = vld [vmem:[%s6426_s2 + $0x1e8] sm:$0xff] }
 0x2a2   :  { %v2177_v57 = vmul.f32 %v5300_v19, %v2085_v63  ;;  %v1870_v0 = vadd.f32 1e-05, %v1782_v2  ;;  %v3551_v4 = vpop.eup %3550  ;;  %vm2311_vm2 = vcmp.ge.f32.partialorder %v2223_v22, 0.0  ;;  %3558 = vrsqrt.f32 %v1914_v46  ;;  %v6747_v63 = vld [vmem:[#allocation30_spill] sm:$0xff] }
 0x2a3   :  { %v2531_v56 = vsel %vm2355_vm1, %v2267_v24, %v2443_v17  ;;  %v2850_v58 = vmul.f32 %v2532_v59, %v33_v21  ;;  %v2488_v33 = vsel %vm2312_vm15, %v2224_v12, %v2400_v10  ;;  %v2399_v14 = vmul.f32 0.15, %v2223_v22  ;;  %v3553_v40 = vpop.eup %3552  ;;  %v35_v12 = vld [vmem:[%s6426_s2 + $0x88] sm:$0xff]  ;;  %v5793_v17 = vpop.xlane.xlu0 %1564 }
 0x2a4   :  { %v2849_v60 = vmul.f32 %v2531_v56, %v32_v8  ;;  %v2893_v11 = vmul.f32 %v2531_v56, %v76_v23  ;;  %vm2358_vm3 = vcmp.ge.f32.partialorder %v2270_v54, 0.0  ;;  %v2446_v28 = vmul.f32 0.15, %v2270_v54 }
 0x2a5   :  { %v2226_v20 = vadd.f32 %v5348_v41, %v2134_v62  ;;  %v2487_v18 = vsel %vm2311_vm2, %v2223_v22, %v2399_v14  ;;  %v2269_v15 = vadd.f32 %v5348_v41, %v2177_v57  ;;  %3560 = vrsqrt.f32 %v1870_v0  ;;  %v5797_v22 = vpop.xlane.xlu1 %1705 }
 0x2a6   :  { %v2894_v24 = vmul.f32 %v2532_v59, %v77_v53  ;;  %v2576_v46 = vmul.f32 %v2488_v33, %v33_v21  ;;  %v2575_v2 = vmul.f32 %v2487_v18, %v32_v8  ;;  %v2619_v34 = vmul.f32 %v2487_v18, %v76_v23  ;;  %v3555_v23 = vpop.eup %3554 }
 0x2a7   :  { %v2952_v32 = vsel %vm198_vm0, %v2850_v58, 0.0  ;;  %v2620_v61 = vmul.f32 %v2488_v33, %v77_v53  ;;  %v2534_v29 = vsel %vm2358_vm3, %v2270_v54, %v2446_v28  ;;  %v2041_v10 = vmul.f32 %v3549_v37, %v6747_v63  ;;  %v34_v54 = vld [vmem:[%s6426_s2 + $0x80] sm:$0xff] }
 0x2a8   :  { %v2950_v59 = vsel %vm198_vm0, %v2849_v60, 0.0  ;;  %v3043_v21 = vsel %vm198_vm0, %v2893_v11, 0.0  ;;  %v2402_v8 = vmul.f32 0.15, %v2226_v20  ;;  %vm2357_vm4 = vcmp.ge.f32.partialorder %v2269_v15, 0.0  ;;  %v78_v33 = vld [vmem:[%s6426_s2 + $0x1e0] sm:$0xff]  ;;  %v3557_v60 = vpop.eup %3556 }
 0x2a9   :  { %v2676_v62 = vsel %vm198_vm0, %v2575_v2, 0.0  ;;  %v2769_v57 = vsel %vm198_vm0, %v2619_v34, 0.0  ;;  %vm2314_vm5 = vcmp.ge.f32.partialorder %v2226_v20, 0.0  ;;  %v2445_v37 = vmul.f32 0.15, %v2269_v15 }
 0x2aa   :  { %v3045_v0 = vsel %vm198_vm0, %v2894_v24, 0.0  ;;  %v2678_v56 = vsel %vm198_vm0, %v2576_v46, 0.0  ;;  %v2852_v53 = vmul.f32 %v2534_v29, %v35_v12  ;;  %v2896_v58 = vmul.f32 %v2534_v29, %v79_v49 }
 0x2ab   :  { %v2771_v14 = vsel %vm198_vm0, %v2620_v61, 0.0  ;;  %v2951_v11 = vadd.f32 %v2950_v59, %v5723_v7  ;;  %v3044_v28 = vadd.f32 %v3043_v21, %v5725_v51  ;;  %v2533_v18 = vsel %vm2357_vm4, %v2269_v15, %v2445_v37  ;;  %v6749_v61 = vld [vmem:[#allocation31_spill] sm:$0xff]  ;;  %v5819_v7 = vpop.xlane.xlu0 %1573  ;;  %v5825_v59 = vpop.xlane.xlu1 %1702 }
 0x2ac   :  { %v3559_v2 = vpop.eup %3558  ;;  %v2677_v24 = vadd.f32 %v2676_v62, %v5749_v39  ;;  %v2770_v46 = vadd.f32 %v2769_v57, %v5751_v43  ;;  %v2490_v34 = vsel %vm2314_vm5, %v2226_v20, %v2402_v8  ;;  %v2851_v29 = vmul.f32 %v2533_v18, %v34_v54 }
 0x2ad   :  { %v2895_v63 = vmul.f32 %v2533_v18, %v78_v33  ;;  %v2133_v1 = vmul.f32 %v5300_v19, %v2041_v10  ;;  %v2088_v5 = vmul.f32 %v3551_v4, %v6748_v3  ;;  %v2044_v13 = vmul.f32 %v3553_v40, %v6749_v61 }
 0x2ae   :  { %v2956_v51 = vsel %vm198_vm0, %v2852_v53, 0.0  ;;  %v3049_v15 = vsel %vm198_vm0, %v2896_v58, 0.0  ;;  %v2087_v39 = vmul.f32 %v3555_v23, %v4990_v44  ;;  %v2043_v43 = vmul.f32 %v3557_v60, %v4993_v38 }
 0x2af   :  { %v3561_v20 = vpop.eup %3560  ;;  %v2578_v21 = vmul.f32 %v2490_v34, %v35_v12  ;;  %v2953_v8 = vadd.f32 %v2952_v32, %v2951_v11  ;;  %v2225_v10 = vadd.f32 %v5348_v41, %v2133_v1  ;;  %v2180_v3 = vmul.f32 %v5300_v19, %v2088_v5  ;;  %v5838_v60 = vpop.xlane.xlu0 %1570 }
 0x2b0   :  { %v2954_v4 = vsel %vm198_vm0, %v2851_v29, 0.0  ;;  %v2136_v40 = vmul.f32 %v5300_v19, %v2044_v13  ;;  %v2179_v62 = vmul.f32 %v5300_v19, %v2087_v39  ;;  %v2135_v57 = vmul.f32 %v5300_v19, %v2043_v43  ;;  %v37_v43 = vld [vmem:[%s6426_s2 + $0x98] sm:$0xff] }
 0x2b1   :  { %v3047_v44 = vsel %vm198_vm0, %v2895_v63, 0.0  ;;  %vm2313_vm6 = vcmp.ge.f32.partialorder %v2225_v10, 0.0  ;;  %v2401_v38 = vmul.f32 0.15, %v2225_v10  ;;  %v2272_v23 = vadd.f32 %v5348_v41, %v2180_v3  ;;  %v5841_v63 = vpop.xlane.xlu1 %1711 }
 0x2b2   :  { %v3046_v12 = vadd.f32 %v3045_v0, %v3044_v28  ;;  %v2228_v32 = vadd.f32 %v5348_v41, %v2136_v40  ;;  %v2271_v1 = vadd.f32 %v5348_v41, %v2179_v62  ;;  %v2090_v5 = vmul.f32 %v3559_v2, %v5004_v45 }
 0x2b3   :  { %v2622_v37 = vmul.f32 %v2490_v34, %v79_v49  ;;  %v2955_v53 = vadd.f32 %v2954_v4, %v2953_v8  ;;  %v2489_v13 = vsel %vm2313_vm6, %v2225_v10, %v2401_v38  ;;  %v2448_v58 = vmul.f32 0.15, %v2272_v23  ;;  %v36_v49 = vld [vmem:[%s6426_s2 + $0x90] sm:$0xff]  ;;  %v5861_v62 = vpop.xlane.xlu0 %1579 }
 0x2b4   :  { %v3048_v11 = vadd.f32 %v3047_v44, %v3046_v12  ;;  %v2577_v18 = vmul.f32 %v2489_v13, %v34_v54  ;;  %vm2360_vm7 = vcmp.ge.f32.partialorder %v2272_v23, 0.0  ;;  %v2227_v29 = vadd.f32 %v5348_v41, %v2135_v57  ;;  %v80_v54 = vld [vmem:[%s6426_s2 + $0x1f0] sm:$0xff] }
 0x2b5   :  { %v2621_v0 = vmul.f32 %v2489_v13, %v78_v33  ;;  %v2404_v28 = vmul.f32 0.15, %v2228_v32  ;;  %vm2359_vm8 = vcmp.ge.f32.partialorder %v2271_v1, 0.0  ;;  %v2447_v61 = vmul.f32 0.15, %v2271_v1 }
 0x2b6   :  { %v2682_v39 = vsel %vm198_vm0, %v2578_v21, 0.0  ;;  %v2679_v45 = vadd.f32 %v2678_v56, %v2677_v24  ;;  %vm2316_vm9 = vcmp.ge.f32.partialorder %v2228_v32, 0.0  ;;  %v2182_v2 = vmul.f32 %v5300_v19, %v2090_v5  ;;  %v81_v56 = vld [vmem:[%s6426_s2 + $0x1f8] sm:$0xff]  ;;  %v5864_v5 = vpop.xlane.xlu1 %1708 }
 0x2b7   :  { %v2775_v34 = vsel %vm198_vm0, %v2622_v37, 0.0  ;;  %v2772_v33 = vadd.f32 %v2771_v14, %v2770_v46  ;;  %v2536_v24 = vsel %vm2360_vm7, %v2272_v23, %v2448_v58  ;;  %v2535_v21 = vsel %vm2359_vm8, %v2271_v1, %v2447_v61 }
 0x2b8   :  { %v2680_v8 = vsel %vm198_vm0, %v2577_v18, 0.0  ;;  %v2957_v10 = vadd.f32 %v2956_v51, %v2955_v53  ;;  %v3050_v3 = vadd.f32 %v3049_v15, %v3048_v11  ;;  %vm2315_vm10 = vcmp.ge.f32.partialorder %v2227_v29, 0.0 }
 0x2b9   :  { %v2773_v4 = vsel %vm198_vm0, %v2621_v0, 0.0  ;;  %v2492_v40 = vsel %vm2316_vm9, %v2228_v32, %v2404_v28  ;;  %v2853_v14 = vmul.f32 %v2535_v21, %v36_v49  ;;  %v2897_v46 = vmul.f32 %v2535_v21, %v80_v54 }
 0x2ba   :  { %v2854_v57 = vmul.f32 %v2536_v24, %v37_v43  ;;  %v2898_v44 = vmul.f32 %v2536_v24, %v81_v56  ;;  %v2403_v38 = vmul.f32 0.15, %v2227_v29  ;;  %v2274_v12 = vadd.f32 %v5348_v41, %v2182_v2  ;;  %v1718_v21 = vpop.xlane.xlu1 %1717 }
 0x2bb   :  { %v2681_v23 = vadd.f32 %v2680_v8, %v2679_v45  ;;  %v2958_v1 = vsel %vm198_vm0, %v2853_v14, 0.0  ;;  %v2046_v51 = vmul.f32 %v3561_v20, %v5007_v50  ;;  %v1825_v15 = vmul.f32 0.0625, %v5732_v48 }
 0x2bc   :  { %v2774_v37 = vadd.f32 %v2773_v4, %v2772_v33  ;;  %v2580_v32 = vmul.f32 %v2492_v40, %v37_v43  ;;  %v2624_v53 = vmul.f32 %v2492_v40, %v81_v56  ;;  %v2491_v13 = vsel %vm2315_vm10, %v2227_v29, %v2403_v38  ;;  %v1577_v33 = vpop.xlane.xlu0 %1576 }
 0x2bd   :  { %v3051_v58 = vsel %vm198_vm0, %v2897_v46, 0.0  ;;  %vm2362_vm11 = vcmp.ge.f32.partialorder %v2274_v12, 0.0  ;;  %v2450_v11 = vmul.f32 0.15, %v2274_v12  ;;  %v2138_v18 = vmul.f32 %v5300_v19, %v2046_v51 }
 0x2be   :  { %v2959_v0 = vadd.f32 %v2958_v1, %v2957_v10  ;;  %v2579_v28 = vmul.f32 %v2491_v13, %v36_v49  ;;  %v1913_v61 = vadd.f32 1e-05, %v1825_v15  ;;  %v1781_v45 = vmul.f32 0.0625, %v5747_v35  ;;  %v39_v49 = vld [vmem:[%s6426_s2 + $0xa8] sm:$0xff] }
 0x2bf   :  { %v2960_v50 = vsel %vm198_vm0, %v2854_v57, 0.0  ;;  %v3053_v48 = vsel %vm198_vm0, %v2898_v44, 0.0  ;;  %v2623_v20 = vmul.f32 %v2491_v13, %v80_v54  ;;  %v2230_v2 = vadd.f32 %v5348_v41, %v2138_v18 }
 0x2c0   :  { %v3052_v29 = vadd.f32 %v3051_v58, %v3050_v3  ;;  %v2683_v43 = vadd.f32 %v2682_v39, %v2681_v23  ;;  %v2776_v56 = vadd.f32 %v2775_v34, %v2774_v37  ;;  %v2538_v24 = vsel %vm2362_vm11, %v2274_v12, %v2450_v11  ;;  %v83_v39 = vld [vmem:[%s6426_s2 + $0x208] sm:$0xff]  ;;  %v1586_v15 = vpop.xlane.xlu0 %1585 }
 0x2c1   :  { %vm2318_vm12 = vcmp.ge.f32.partialorder %v2230_v2, 0.0  ;;  %v2406_v8 = vmul.f32 0.15, %v2230_v2  ;;  %3562 = vrsqrt.f32 %v1913_v61  ;;  %v1869_v35 = vadd.f32 1e-05, %v1781_v45 }
 0x2c2   :  { %v2686_v10 = vsel %vm198_vm0, %v2580_v32, 0.0  ;;  %v2779_v54 = vsel %vm198_vm0, %v2624_v53, 0.0  ;;  %v2684_v4 = vsel %vm198_vm0, %v2579_v28, 0.0  ;;  %v5885_v34 = vadd.f32 %v2960_v50, %v2959_v0 }
 0x2c3   :  { %v2777_v3 = vsel %vm198_vm0, %v2623_v20, 0.0  ;;  %3564 = vrsqrt.f32 %v1869_v35  ;;  %v1828_v40 = vmul.f32 0.0625, %v5754_v52  ;;  %v1784_v14 = vmul.f32 0.0625, %v5775_v36  ;;  %v1715_v52 = vpop.xlane.xlu1 %1714 }
 0x2c4   :  { %v2856_v46 = vmul.f32 %v2538_v24, %v39_v49  ;;  %v2494_v57 = vsel %vm2318_vm12, %v2230_v2, %v2406_v8  ;;  %v1827_v44 = vmul.f32 0.0625, %v5777_v16  ;;  %v1783_v38 = vmul.f32 0.0625, %v5793_v17 }
 0x2c5   :  { %v2900_v12 = vmul.f32 %v2538_v24, %v83_v39  ;;  %v5892_v23 = vadd.f32 %v3053_v48, %v3052_v29  ;;  %v1916_v1 = vadd.f32 1e-05, %v1828_v40  ;;  %v1872_v51 = vadd.f32 1e-05, %v1784_v14  ;;  %v1583_v29 = vpop.xlane.xlu0 %1582 }
 0x2c6   :  { %v2685_v37 = vadd.f32 %v2684_v4, %v2683_v43  ;;  %v2778_v32 = vadd.f32 %v2777_v3, %v2776_v56  ;;  %v1915_v53 = vadd.f32 1e-05, %v1827_v44  ;;  %v1830_v13 = vmul.f32 0.0625, %v5797_v22 }
 0x2c7   :  { %v2582_v58 = vmul.f32 %v2494_v57, %v39_v49  ;;  %3566 = vrsqrt.f32 %v1916_v1  ;;  %v1871_v36 = vadd.f32 1e-05, %v1783_v38  ;;  %v1786_v11 = vmul.f32 0.0625, %v5819_v7  ;;  %v1724_v24 = vpop.xlane.xlu1 %1723  ;;  %v82_v1 = vld [vmem:[%s6426_s2 + $0x200] sm:$0xff] }
 0x2c8   :  { %v5897_v16 = vsel %vm198_vm0, %v2856_v46, 0.0  ;;  %v2626_v17 = vmul.f32 %v2494_v57, %v83_v39  ;;  %3568 = vrsqrt.f32 %v1872_v51  ;;  %v1829_v18 = vmul.f32 0.0625, %v5825_v59 }
 0x2c9   :  { %v5901_v0 = vsel %vm198_vm0, %v2900_v12, 0.0  ;;  %3570 = vrsqrt.f32 %v1915_v53  ;;  %v1785_v28 = vmul.f32 0.0625, %v5838_v60  ;;  %v1832_v22 = vmul.f32 0.0625, %v5841_v63  ;;  %v38_v12 = vld [vmem:[%s6426_s2 + $0xa0] sm:$0xff] }
 0x2ca   :  { %v5905_v61 = vadd.f32 %v2686_v10, %v2685_v37  ;;  %v5907_v45 = vadd.f32 %v2779_v54, %v2778_v32  ;;  %v1918_v7 = vadd.f32 1e-05, %v1830_v13  ;;  %v1788_v50 = vmul.f32 0.0625, %v5861_v62  ;;  %v6750_v37 = vld [vmem:[#allocation33_spill] sm:$0xff] }
 0x2cb   :  { %v3563_v48 = vpop.eup %3562  ;;  %v5911_v20 = vsel %vm198_vm0, %v2582_v58, 0.0  ;;  %3572 = vrsqrt.f32 %v1871_v36  ;;  %v1874_v59 = vadd.f32 1e-05, %v1786_v11  ;;  %v1831_v2 = vmul.f32 0.0625, %v5864_v5  ;;  %v1721_v53 = vpop.xlane.xlu1 %1720 }
 0x2cc   :  { %v5915_v60 = vsel %vm198_vm0, %v2626_v17, 0.0  ;;  %v2089_v63 = vmul.f32 %v3563_v48, %v5018_v27  ;;  %v1917_v43 = vadd.f32 1e-05, %v1829_v18  ;;  %v1787_v56 = vmul.f32 0.0625, %v1577_v33 }
 0x2cd   :  { %v3565_v49 = vpop.eup %3564  ;;  %v1873_v8 = vadd.f32 1e-05, %v1785_v28  ;;  %v1920_v62 = vadd.f32 1e-05, %v1832_v22  ;;  %v1834_v35 = vmul.f32 0.0625, %v1718_v21  ;;  %v1790_v10 = vmul.f32 0.0625, %v1586_v15 }
 0x2ce   :  { %v2181_v54 = vmul.f32 %v5300_v19, %v2089_v63  ;;  %v2045_v4 = vmul.f32 %v3565_v49, %v5021_v30  ;;  %3574 = vrsqrt.f32 %v1918_v7  ;;  %v1876_v5 = vadd.f32 1e-05, %v1788_v50  ;;  %v1592_v30 = vpop.xlane.xlu0 %1591 }
 0x2cf   :  { %3576 = vrsqrt.f32 %v1874_v59  ;;  %v1919_v39 = vadd.f32 1e-05, %v1831_v2  ;;  %v1833_v3 = vmul.f32 0.0625, %v1715_v52  ;;  %v1789_v40 = vmul.f32 0.0625, %v1583_v29  ;;  %v6751_v52 = vld [vmem:[#allocation34_spill] sm:$0xff] }
 0x2d0   :  { %v2273_v27 = vadd.f32 %v5348_v41, %v2181_v54  ;;  %v2137_v33 = vmul.f32 %v5300_v19, %v2045_v4  ;;  %3578 = vrsqrt.f32 %v1917_v43  ;;  %v1875_v14 = vadd.f32 1e-05, %v1787_v56 }
 0x2d1   :  { %v3567_v46 = vpop.eup %3566  ;;  %3580 = vrsqrt.f32 %v1873_v8  ;;  %v5922_v21 = vadd.f32 1e-05, %v1834_v35  ;;  %v5924_v57 = vadd.f32 1e-05, %v1790_v10  ;;  %v1836_v44 = vmul.f32 0.0625, %v1724_v24 }
 0x2d2   :  { %v3569_v38 = vpop.eup %3568  ;;  %vm2361_vm13 = vcmp.ge.f32.partialorder %v2273_v27, 0.0  ;;  %v2449_v51 = vmul.f32 0.15, %v2273_v27  ;;  %v2229_v15 = vadd.f32 %v5348_v41, %v2137_v33  ;;  %v2092_v32 = vmul.f32 %v3567_v46, %v6750_v37  ;;  %v1589_v8 = vpop.xlane.xlu0 %1588 }
 0x2d3   :  { %v3571_v13 = vpop.eup %3570  ;;  %v2048_v58 = vmul.f32 %v3569_v38, %v6751_v52  ;;  %3582 = vrsqrt.f32 %v1920_v62  ;;  %v5935_v36 = vadd.f32 1e-05, %v1833_v3  ;;  %v5937_v11 = vadd.f32 1e-05, %v1789_v40 }
 0x2d4   :  { %v2537_v17 = vsel %vm2361_vm13, %v2273_v27, %v2449_v51  ;;  %vm2317_vm14 = vcmp.ge.f32.partialorder %v2229_v15, 0.0  ;;  %v2405_v18 = vmul.f32 0.15, %v2229_v15  ;;  %v2184_v28 = vmul.f32 %v5300_v19, %v2092_v32 }
 0x2d5   :  { %v3573_v22 = vpop.eup %3572  ;;  %v2855_v7 = vmul.f32 %v2537_v17, %v38_v12  ;;  %v2899_v50 = vmul.f32 %v2537_v17, %v82_v1  ;;  %v2140_v48 = vmul.f32 %v5300_v19, %v2048_v58  ;;  %v2091_v59 = vmul.f32 %v3571_v13, %v5056_v47  ;;  %v1730_v47 = vpop.xlane.xlu1 %1729 }
 0x2d6   :  { %v2493_v2 = vsel %vm2317_vm14, %v2229_v15, %v2405_v18  ;;  %v2276_v29 = vadd.f32 %v5348_v41, %v2184_v28  ;;  %3584 = vrsqrt.f32 %v1876_v5  ;;  %v5943_v63 = vadd.f32 1e-05, %v1836_v44 }
 0x2d7   :  { %v2962_v43 = vsel %vm198_vm0, %v2855_v7, 0.0  ;;  %v2581_v56 = vmul.f32 %v2493_v2, %v38_v12  ;;  %v2625_v24 = vmul.f32 %v2493_v2, %v82_v1  ;;  %v1792_v49 = vmul.f32 0.0625, %v1592_v30 }
 0x2d8   :  { %v3575_v62 = vpop.eup %3574  ;;  %v3055_v35 = vsel %vm198_vm0, %v2899_v50, 0.0  ;;  %v2047_v10 = vmul.f32 %v3573_v22, %v5059_v31  ;;  %3586 = vrsqrt.f32 %v1919_v39  ;;  %v1835_v54 = vmul.f32 0.0625, %v1721_v53 }
 0x2d9   :  { %v3577_v4 = vpop.eup %3576  ;;  %v2688_v3 = vsel %vm198_vm0, %v2581_v56, 0.0  ;;  %v2452_v5 = vmul.f32 0.15, %v2276_v29  ;;  %v2232_v40 = vadd.f32 %v5348_v41, %v2140_v48  ;;  %v2183_v27 = vmul.f32 %v5300_v19, %v2091_v59  ;;  %v84_v48 = vld [vmem:[%s6426_s2 + $0x210] sm:$0xff] }
 0x2da   :  { %v3579_v33 = vpop.eup %3578  ;;  %v2963_v46 = vadd.f32 %v2962_v43, %v5885_v34  ;;  %v2781_v44 = vsel %vm198_vm0, %v2625_v24, 0.0  ;;  %vm2364_vm15 = vcmp.ge.f32.partialorder %v2276_v29, 0.0  ;;  %v5953_v30 = vmul.f32 0.0625, %v1589_v8 }
 0x2db   :  { %v3581_v31 = vpop.eup %3580  ;;  %v2094_v39 = vmul.f32 %v3575_v62, %v5070_v55  ;;  %3588 = vrsqrt.f32 %v1875_v14  ;;  %v5956_v38 = vadd.f32 1e-05, %v1792_v49  ;;  %v5958_v12 = vmul.f32 0.0625, %v1730_v47  ;;  %v41_v55 = vld [vmem:[%s6426_s2 + $0xb8] sm:$0xff] }
 0x2dc   :  { %v3056_v1 = vadd.f32 %v3055_v35, %v5892_v23  ;;  %v2689_v51 = vadd.f32 %v2688_v3, %v5905_v61  ;;  %v2275_v15 = vadd.f32 %v5348_v41, %v2183_v27  ;;  %v5963_v34 = vadd.f32 1e-05, %v1835_v54  ;;  %v85_v14 = vld [vmem:[%s6426_s2 + $0x218] sm:$0xff]  ;;  %v40_v61 = vld [vmem:[%s6426_s2 + $0xb0] sm:$0xff] }
 0x2dd   :  { %v3583_v37 = vpop.eup %3582  ;;  %v2782_v32 = vadd.f32 %v2781_v44, %v5907_v45  ;;  %v2540_v53 = vsel %vm2364_vm15, %v2276_v29, %v2452_v5  ;;  %v2408_v13 = vmul.f32 0.15, %v2232_v40  ;;  %v2139_v23 = vmul.f32 %v5300_v19, %v2047_v10 }
 0x2de   :  { %vm2320_vm1 = vcmp.ge.f32.partialorder %v2232_v40, 0.0  ;;  %vm2363_vm2 = vcmp.ge.f32.partialorder %v2275_v15, 0.0  ;;  %v2451_v52 = vmul.f32 0.15, %v2275_v15  ;;  %v2965_v45 = vadd.f32 %v5897_v16, %v2963_v46 }
 0x2df   :  { %v2231_v58 = vadd.f32 %v5348_v41, %v2139_v23  ;;  %v2186_v17 = vmul.f32 %v5300_v19, %v2094_v39  ;;  %v2050_v18 = vmul.f32 %v3577_v4, %v5073_v9  ;;  %v2093_v28 = vmul.f32 %v3579_v33, %v5084_v42  ;;  %v87_v23 = vld [vmem:[%s6426_s2 + $0x228] sm:$0xff] }
 0x2e0   :  { %v3585_v22 = vpop.eup %3584  ;;  %v2858_v7 = vmul.f32 %v2540_v53, %v41_v55  ;;  %v2902_v50 = vmul.f32 %v2540_v53, %v85_v14  ;;  %v2539_v59 = vsel %vm2363_vm2, %v2275_v15, %v2451_v52  ;;  %v2049_v2 = vmul.f32 %v3581_v31, %v5087_v25 }
 0x2e1   :  { %v2496_v29 = vsel %vm2320_vm1, %v2232_v40, %v2408_v13  ;;  %v2857_v16 = vmul.f32 %v2539_v59, %v40_v61  ;;  %vm2319_vm3 = vcmp.ge.f32.partialorder %v2231_v58, 0.0  ;;  %v2407_v43 = vmul.f32 0.15, %v2231_v58 }
 0x2e2   :  { %v3587_v56 = vpop.eup %3586  ;;  %v3058_v24 = vadd.f32 %v5901_v0, %v3056_v1  ;;  %v2278_v9 = vadd.f32 %v5348_v41, %v2186_v17  ;;  %v2142_v42 = vmul.f32 %v5300_v19, %v2050_v18  ;;  %v2185_v49 = vmul.f32 %v5300_v19, %v2093_v28 }
 0x2e3   :  { %v2901_v8 = vmul.f32 %v2539_v59, %v84_v48  ;;  %v2691_v62 = vadd.f32 %v5911_v20, %v2689_v51  ;;  %v2784_v35 = vadd.f32 %v5915_v60, %v2782_v32  ;;  %v2495_v10 = vsel %vm2319_vm3, %v2231_v58, %v2407_v43  ;;  %v43_v32 = vld [vmem:[%s6426_s2 + $0xc8] sm:$0xff]  ;;  %v86_v58 = vld [vmem:[%s6426_s2 + $0x220] sm:$0xff] }
 0x2e4   :  { %v2584_v25 = vmul.f32 %v2496_v29, %v41_v55  ;;  %v2966_v54 = vsel %vm198_vm0, %v2857_v16, 0.0  ;;  %v2583_v47 = vmul.f32 %v2495_v10, %v40_v61  ;;  %v2141_v4 = vmul.f32 %v5300_v19, %v2049_v2  ;;  %v6752_v16 = vld [vmem:[#allocation36_spill] sm:$0xff] }
 0x2e5   :  { %v3589_v3 = vpop.eup %3588  ;;  %v2627_v0 = vmul.f32 %v2495_v10, %v84_v48  ;;  %v2454_v5 = vmul.f32 0.15, %v2278_v9  ;;  %v2234_v40 = vadd.f32 %v5348_v41, %v2142_v42  ;;  %v2277_v27 = vadd.f32 %v5348_v41, %v2185_v49 }
 0x2e6   :  { %v2968_v33 = vsel %vm198_vm0, %v2858_v7, 0.0  ;;  %v2628_v46 = vmul.f32 %v2496_v29, %v85_v14  ;;  %vm2366_vm4 = vcmp.ge.f32.partialorder %v2278_v9, 0.0  ;;  %v2096_v20 = vmul.f32 %v3583_v37, %v5102_v26  ;;  %v42_v26 = vld [vmem:[%s6426_s2 + $0xc0] sm:$0xff] }
 0x2e7   :  { %v3061_v60 = vsel %vm198_vm0, %v2902_v50, 0.0  ;;  %v2967_v44 = vadd.f32 %v2966_v54, %v2965_v45  ;;  %v3059_v31 = vsel %vm198_vm0, %v2901_v8, 0.0  ;;  %vm2322_vm5 = vcmp.ge.f32.partialorder %v2234_v40, 0.0 }
 0x2e8   :  { %v2694_v39 = vsel %vm198_vm0, %v2584_v25, 0.0  ;;  %v2692_v1 = vsel %vm198_vm0, %v2583_v47, 0.0  ;;  %v2410_v51 = vmul.f32 0.15, %v2234_v40  ;;  %vm2365_vm6 = vcmp.ge.f32.partialorder %v2277_v27, 0.0 }
 0x2e9   :  { %v2785_v15 = vsel %vm198_vm0, %v2627_v0, 0.0  ;;  %v2542_v55 = vsel %vm2366_vm4, %v2278_v9, %v2454_v5  ;;  %v2453_v37 = vmul.f32 0.15, %v2277_v27  ;;  %v2233_v14 = vadd.f32 %v5348_v41, %v2141_v4  ;;  %v6753_v4 = vld [vmem:[#allocation35_spill] sm:$0xff] }
 0x2ea   :  { %v2787_v53 = vsel %vm198_vm0, %v2628_v46, 0.0  ;;  %v3060_v13 = vadd.f32 %v3059_v31, %v3058_v24  ;;  %v2498_v61 = vsel %vm2322_vm5, %v2234_v40, %v2410_v51  ;;  %v2188_v52 = vmul.f32 %v5300_v19, %v2096_v20  ;;  %v1598_v20 = vpop.xlane.xlu0 %1597  ;;  %v1727_v31 = vpop.xlane.xlu1 %1726 }
 0x2eb   :  { %v2693_v45 = vadd.f32 %v2692_v1, %v2691_v62  ;;  %v2541_v17 = vsel %vm2365_vm6, %v2277_v27, %v2453_v37  ;;  %v2969_v18 = vadd.f32 %v2968_v33, %v2967_v44  ;;  %vm2321_vm7 = vcmp.ge.f32.partialorder %v2233_v14, 0.0 }
 0x2ec   :  { %v2786_v28 = vadd.f32 %v2785_v15, %v2784_v35  ;;  %v2860_v7 = vmul.f32 %v2542_v55, %v43_v32  ;;  %v2859_v50 = vmul.f32 %v2541_v17, %v42_v26  ;;  %v2409_v48 = vmul.f32 0.15, %v2233_v14 }
 0x2ed   :  { %v2904_v59 = vmul.f32 %v2542_v55, %v87_v23  ;;  %v2586_v2 = vmul.f32 %v2498_v61, %v43_v32  ;;  %v2052_v29 = vmul.f32 %v3585_v22, %v5105_v6  ;;  %v2095_v43 = vmul.f32 %v3587_v56, %v6752_v16  ;;  %v44_v32 = vld [vmem:[%s6426_s2 + $0xd0] sm:$0xff] }
 0x2ee   :  { %v2903_v24 = vmul.f32 %v2541_v17, %v86_v58  ;;  %v2970_v9 = vsel %vm198_vm0, %v2859_v50, 0.0  ;;  %v2497_v42 = vsel %vm2321_vm7, %v2233_v14, %v2409_v48  ;;  %v2280_v49 = vadd.f32 %v5348_v41, %v2188_v52  ;;  %v88_v55 = vld [vmem:[%s6426_s2 + $0x230] sm:$0xff] }
 0x2ef   :  { %v2630_v8 = vmul.f32 %v2498_v61, %v87_v23  ;;  %v3062_v62 = vadd.f32 %v3061_v60, %v3060_v13  ;;  %v2695_v10 = vadd.f32 %v2694_v39, %v2693_v45  ;;  %v2585_v25 = vmul.f32 %v2497_v42, %v42_v26  ;;  %v89_v13 = vld [vmem:[%s6426_s2 + $0x238] sm:$0xff] }
 0x2f0   :  { %v2629_v35 = vmul.f32 %v2497_v42, %v86_v58  ;;  %v2144_v54 = vmul.f32 %v5300_v19, %v2052_v29  ;;  %v2187_v47 = vmul.f32 %v5300_v19, %v2095_v43  ;;  %v2051_v0 = vmul.f32 %v3589_v3, %v6753_v4 }
 0x2f1   :  { %v2972_v6 = vsel %vm198_vm0, %v2860_v7, 0.0  ;;  %v3065_v22 = vsel %vm198_vm0, %v2904_v59, 0.0  ;;  %v2971_v56 = vadd.f32 %v2970_v9, %v2969_v18  ;;  %v2788_v5 = vadd.f32 %v2787_v53, %v2786_v28  ;;  %v45_v53 = vld [vmem:[%s6426_s2 + $0xd8] sm:$0xff]  ;;  %v1595_v7 = vpop.xlane.xlu0 %1594 }
 0x2f2   :  { %v2698_v40 = vsel %vm198_vm0, %v2586_v2, 0.0  ;;  %v3063_v27 = vsel %vm198_vm0, %v2903_v24, 0.0  ;;  %v2456_v33 = vmul.f32 0.15, %v2280_v49  ;;  %v2236_v46 = vadd.f32 %v5348_v41, %v2144_v54  ;;  %v1736_v2 = vpop.xlane.xlu1 %1735 }
 0x2f3   :  { %v2696_v60 = vsel %vm198_vm0, %v2585_v25, 0.0  ;;  %vm2368_vm8 = vcmp.ge.f32.partialorder %v2280_v49, 0.0  ;;  %v2279_v44 = vadd.f32 %v5348_v41, %v2187_v47  ;;  %v2143_v3 = vmul.f32 %v5300_v19, %v2051_v0 }
 0x2f4   :  { %v2791_v39 = vsel %vm198_vm0, %v2630_v8, 0.0  ;;  %v2789_v1 = vsel %vm198_vm0, %v2629_v35, 0.0  ;;  %vm2324_vm9 = vcmp.ge.f32.partialorder %v2236_v46, 0.0  ;;  %v2412_v51 = vmul.f32 0.15, %v2236_v46 }
 0x2f5   :  { %v3064_v15 = vadd.f32 %v3063_v27, %v3062_v62  ;;  %vm2367_vm10 = vcmp.ge.f32.partialorder %v2279_v44, 0.0  ;;  %v2455_v26 = vmul.f32 0.15, %v2279_v44  ;;  %v2973_v37 = vadd.f32 %v2972_v6, %v2971_v56  ;;  %v1604_v47 = vpop.xlane.xlu0 %1603 }
 0x2f6   :  { %v2697_v14 = vadd.f32 %v2696_v60, %v2695_v10  ;;  %v2544_v23 = vsel %vm2368_vm8, %v2280_v49, %v2456_v33  ;;  %v2235_v61 = vadd.f32 %v5348_v41, %v2143_v3  ;;  %3590 = vrsqrt.f32 %v5922_v21 }
 0x2f7   :  { %v2790_v52 = vadd.f32 %v2789_v1, %v2788_v5  ;;  %v2500_v45 = vsel %vm2324_vm9, %v2236_v46, %v2412_v51  ;;  %v2543_v58 = vsel %vm2367_vm10, %v2279_v44, %v2455_v26  ;;  %3592 = vrsqrt.f32 %v5924_v57 }
 0x2f8   :  { %v2861_v17 = vmul.f32 %v2543_v58, %v44_v32  ;;  %v2905_v18 = vmul.f32 %v2543_v58, %v88_v55  ;;  %vm2323_vm11 = vcmp.ge.f32.partialorder %v2235_v61, 0.0  ;;  %v2411_v28 = vmul.f32 0.15, %v2235_v61 }
 0x2f9   :  { %v2862_v50 = vmul.f32 %v2544_v23, %v45_v53  ;;  %v2906_v48 = vmul.f32 %v2544_v23, %v89_v13  ;;  %v3066_v59 = vadd.f32 %v3065_v22, %v3064_v15  ;;  %3594 = vrsqrt.f32 %v5935_v36  ;;  %v1733_v22 = vpop.xlane.xlu1 %1732  ;;  %v6757_v23 = vld [vmem:[#allocation62_spill] sm:$0xff] }
 0x2fa   :  { %v2974_v29 = vsel %vm198_vm0, %v2861_v17, 0.0  ;;  %v3067_v21 = vsel %vm198_vm0, %v2905_v18, 0.0  ;;  %v2499_v16 = vsel %vm2323_vm11, %v2235_v61, %v2411_v28  ;;  %3596 = vrsqrt.f32 %v5937_v11 }
 0x2fb   :  { %v2588_v43 = vmul.f32 %v2500_v45, %v45_v53  ;;  %v2699_v57 = vadd.f32 %v2698_v40, %v2697_v14  ;;  %v2587_v24 = vmul.f32 %v2499_v16, %v44_v32  ;;  %v2631_v9 = vmul.f32 %v2499_v16, %v88_v55 }
 0x2fc   :  { %v2632_v42 = vmul.f32 %v2500_v45, %v89_v13  ;;  %v2975_v49 = vadd.f32 %v2974_v29, %v2973_v37  ;;  %v2792_v8 = vadd.f32 %v2791_v39, %v2790_v52  ;;  %3598 = vrsqrt.f32 %v5943_v63  ;;  %v6756_v37 = vld [vmem:[#allocation61_spill] sm:$0xff]  ;;  %v1601_v13 = vpop.xlane.xlu0 %1600 }
 0x2fd   :  { %v3068_v62 = vadd.f32 %v3067_v21, %v3066_v59  ;;  %v2700_v36 = vsel %vm198_vm0, %v2587_v24, 0.0  ;;  %v2793_v10 = vsel %vm198_vm0, %v2631_v9, 0.0  ;;  %v1794_v25 = vmul.f32 0.0625, %v1598_v20  ;;  %v6754_v20 = vld [vmem:[#allocation37_spill] sm:$0xff]  ;;  %v1742_v58 = vpop.xlane.xlu1 %1741  ;;  %v6758_v59 = vld [vmem:[#allocation63_spill] sm:$0xff] }
 0x2fe   :  { %v2976_v35 = vsel %vm198_vm0, %v2862_v50, 0.0  ;;  %v3069_v54 = vsel %vm198_vm0, %v2906_v48, 0.0  ;;  %3600 = vrsqrt.f32 %v5956_v38  ;;  %v1837_v11 = vmul.f32 0.0625, %v1727_v31  ;;  %v6755_v31 = vld [vmem:[#allocation60_spill] sm:$0xff] }
 0x2ff   :  { %v2702_v4 = vsel %vm198_vm0, %v2588_v43, 0.0  ;;  %v2701_v0 = vadd.f32 %v2700_v36, %v2699_v57  ;;  %v1879_v6 = vadd.f32 1e-05, %v5953_v30  ;;  %v1793_v63 = vmul.f32 0.0625, %v1595_v7 }
 0x300   :  { %v3591_v56 = vpop.eup %3590  ;;  %v2795_v5 = vsel %vm198_vm0, %v2632_v42, 0.0  ;;  %v2794_v40 = vadd.f32 %v2793_v10, %v2792_v8  ;;  %v6063_v27 = vadd.f32 %v2976_v35, %v2975_v49  ;;  %v1926_v33 = vadd.f32 1e-05, %v5958_v12  ;;  %v6759_v42 = vld [vmem:[#allocation64_spill] sm:$0xff]  ;;  %v47_v8 = vld [vmem:[%s6426_s2 + $0xe8] sm:$0xff] }
 0x301   :  { %v3593_v46 = vpop.eup %3592  ;;  %v2098_v38 = vmul.f32 %v3591_v56, %v6754_v20  ;;  %v6067_v60 = vadd.f32 %v3069_v54, %v3068_v62  ;;  %v1882_v44 = vadd.f32 1e-05, %v1794_v25  ;;  %v1840_v3 = vmul.f32 0.0625, %v1736_v2  ;;  %v46_v62 = vld [vmem:[%s6426_s2 + $0xe0] sm:$0xff] }
 0x302   :  { %v2054_v39 = vmul.f32 %v3593_v46, %v6755_v31  ;;  %3602 = vrsqrt.f32 %v5963_v34  ;;  %v1925_v30 = vadd.f32 1e-05, %v1837_v11  ;;  %v1796_v1 = vmul.f32 0.0625, %v1604_v47  ;;  %v90_v25 = vld [vmem:[%s6426_s2 + $0x240] sm:$0xff]  ;;  %v91_v47 = vld [vmem:[%s6426_s2 + $0x248] sm:$0xff] }
 0x303   :  { %v3595_v51 = vpop.eup %3594  ;;  %v2190_v15 = vmul.f32 %v5300_v19, %v2098_v38  ;;  %v6072_v32 = vadd.f32 %v2702_v4, %v2701_v0  ;;  %3604 = vrsqrt.f32 %v1879_v6  ;;  %v1881_v12 = vadd.f32 1e-05, %v1793_v63 }
 0x304   :  { %v3597_v55 = vpop.eup %3596  ;;  %v2146_v26 = vmul.f32 %v5300_v19, %v2054_v39  ;;  %v2097_v14 = vmul.f32 %v3595_v51, %v6756_v37  ;;  %v6076_v53 = vadd.f32 %v2795_v5, %v2794_v40  ;;  %3606 = vrsqrt.f32 %v1926_v33 }
 0x305   :  { %v2282_v34 = vadd.f32 %v5348_v41, %v2190_v15  ;;  %v2053_v61 = vmul.f32 %v3597_v55, %v6757_v23  ;;  %v1928_v52 = vadd.f32 1e-05, %v1840_v3  ;;  %v1839_v45 = vmul.f32 0.0625, %v1733_v22 }
 0x306   :  { %v3599_v17 = vpop.eup %3598  ;;  %v2238_v18 = vadd.f32 %v5348_v41, %v2146_v26  ;;  %v2189_v28 = vmul.f32 %v5300_v19, %v2097_v14  ;;  %3608 = vrsqrt.f32 %v1882_v44  ;;  %v1884_v7 = vadd.f32 1e-05, %v1796_v1  ;;  %v1610_v44 = vpop.xlane.xlu0 %1609 }
 0x307   :  { %v2458_v50 = vmul.f32 0.15, %v2282_v34  ;;  %v2145_v48 = vmul.f32 %v5300_v19, %v2053_v61  ;;  %v2100_v2 = vmul.f32 %v3599_v17, %v6758_v59  ;;  %v1795_v29 = vmul.f32 0.0625, %v1601_v13 }
 0x308   :  { %v3601_v21 = vpop.eup %3600  ;;  %vm2370_vm12 = vcmp.ge.f32.partialorder %v2282_v34, 0.0  ;;  %v2281_v16 = vadd.f32 %v5348_v41, %v2189_v28  ;;  %3610 = vrsqrt.f32 %v1925_v30  ;;  %v1842_v43 = vmul.f32 0.0625, %v1742_v58 }
 0x309   :  { %v2414_v57 = vmul.f32 0.15, %v2238_v18  ;;  %v2237_v24 = vadd.f32 %v5348_v41, %v2145_v48  ;;  %v2192_v9 = vmul.f32 %v5300_v19, %v2100_v2  ;;  %v2056_v49 = vmul.f32 %v3601_v21, %v6759_v42 }
 0x30a   :  { %vm2326_vm13 = vcmp.ge.f32.partialorder %v2238_v18, 0.0  ;;  %vm2369_vm14 = vcmp.ge.f32.partialorder %v2281_v16, 0.0  ;;  %3612 = vrsqrt.f32 %v1881_v12  ;;  %v1927_v36 = vadd.f32 1e-05, %v1839_v45  ;;  %v6760_v12 = vld [vmem:[#allocation65_spill] sm:$0xff] }
 0x30b   :  { %v2546_v10 = vsel %vm2370_vm12, %v2282_v34, %v2458_v50  ;;  %v2457_v35 = vmul.f32 0.15, %v2281_v16  ;;  %vm2325_vm15 = vcmp.ge.f32.partialorder %v2237_v24, 0.0  ;;  %v6097_v54 = vadd.f32 1e-05, %v1795_v29 }
 0x30c   :  { %v3603_v11 = vpop.eup %3602  ;;  %v2413_v4 = vmul.f32 0.15, %v2237_v24  ;;  %v2284_v0 = vadd.f32 %v5348_v41, %v2192_v9  ;;  %3614 = vrsqrt.f32 %v1928_v52  ;;  %v6103_v6 = vadd.f32 1e-05, %v1842_v43  ;;  %v6761_v52 = vld [vmem:[#allocation66_spill] sm:$0xff]  ;;  %v93_v43 = vld [vmem:[%s6426_s2 + $0x258] sm:$0xff] }
 0x30d   :  { %v3605_v63 = vpop.eup %3604  ;;  %v2502_v22 = vsel %vm2326_vm13, %v2238_v18, %v2414_v57  ;;  %v2545_v56 = vsel %vm2369_vm14, %v2281_v16, %v2457_v35  ;;  %v2148_v5 = vmul.f32 %v5300_v19, %v2056_v49  ;;  %3616 = vrsqrt.f32 %v1884_v7  ;;  %v49_v18 = vld [vmem:[%s6426_s2 + $0xf8] sm:$0xff] }
 0x30e   :  { %v3607_v40 = vpop.eup %3606  ;;  %v2864_v33 = vmul.f32 %v2546_v10, %v47_v8  ;;  %v2863_v46 = vmul.f32 %v2545_v56, %v46_v62  ;;  %v2907_v20 = vmul.f32 %v2545_v56, %v90_v25  ;;  %v2501_v38 = vsel %vm2325_vm15, %v2237_v24, %v2413_v4 }
 0x30f   :  { %v2908_v3 = vmul.f32 %v2546_v10, %v91_v47  ;;  %v2589_v31 = vmul.f32 %v2501_v38, %v46_v62  ;;  %v2633_v39 = vmul.f32 %v2501_v38, %v90_v25  ;;  %v2460_v30 = vmul.f32 0.15, %v2284_v0  ;;  %v6764_v10 = vld [vmem:[#allocation69_spill] sm:$0xff] }
 0x310   :  { %v3609_v1 = vpop.eup %3608  ;;  %v2590_v51 = vmul.f32 %v2502_v22, %v47_v8  ;;  %v2634_v15 = vmul.f32 %v2502_v22, %v91_v47  ;;  %vm2372_vm1 = vcmp.ge.f32.partialorder %v2284_v0, 0.0  ;;  %v2099_v55 = vmul.f32 %v3603_v11, %v6760_v12  ;;  %v6762_v8 = vld [vmem:[#allocation67_spill] sm:$0xff] }
 0x311   :  { %v2978_v26 = vsel %vm198_vm0, %v2863_v46, 0.0  ;;  %v3071_v37 = vsel %vm198_vm0, %v2907_v20, 0.0  ;;  %v2240_v14 = vadd.f32 %v5348_v41, %v2148_v5  ;;  %v6113_v13 = vmul.f32 0.0625, %v1610_v44  ;;  %v92_v11 = vld [vmem:[%s6426_s2 + $0x250] sm:$0xff] }
 0x312   :  { %v3611_v34 = vpop.eup %3610  ;;  %v2704_v23 = vsel %vm198_vm0, %v2589_v31, 0.0  ;;  %v2797_v61 = vsel %vm198_vm0, %v2633_v39, 0.0  ;;  %v2055_v45 = vmul.f32 %v3605_v63, %v6761_v52  ;;  %3618 = vrsqrt.f32 %v1927_v36  ;;  %v6765_v46 = vld [vmem:[#allocation70_spill] sm:$0xff] }
 0x313   :  { %v2980_v58 = vsel %vm198_vm0, %v2864_v33, 0.0  ;;  %v3073_v17 = vsel %vm198_vm0, %v2908_v3, 0.0  ;;  %v2548_v28 = vsel %vm2372_vm1, %v2284_v0, %v2460_v30  ;;  %v2191_v7 = vmul.f32 %v5300_v19, %v2099_v55 }
 0x314   :  { %v3613_v50 = vpop.eup %3612  ;;  %v2706_v48 = vsel %vm198_vm0, %v2590_v51, 0.0  ;;  %v2799_v59 = vsel %vm198_vm0, %v2634_v15, 0.0  ;;  %v2979_v2 = vadd.f32 %v2978_v26, %v6063_v27  ;;  %v3072_v29 = vadd.f32 %v3071_v37, %v6067_v60  ;;  %v48_v60 = vld [vmem:[%s6426_s2 + $0xf0] sm:$0xff] }
 0x315   :  { %v2705_v21 = vadd.f32 %v2704_v23, %v6072_v32  ;;  %v2798_v16 = vadd.f32 %v2797_v61, %v6076_v53  ;;  %v2416_v57 = vmul.f32 0.15, %v2240_v14  ;;  %v2283_v24 = vadd.f32 %v5348_v41, %v2191_v7  ;;  %v6763_v53 = vld [vmem:[#allocation68_spill] sm:$0xff] }
 0x316   :  { %v3615_v9 = vpop.eup %3614  ;;  %v2866_v42 = vmul.f32 %v2548_v28, %v49_v18  ;;  %vm2328_vm2 = vcmp.ge.f32.partialorder %v2240_v14, 0.0  ;;  %v2147_v49 = vmul.f32 %v5300_v19, %v2055_v45  ;;  %v2102_v27 = vmul.f32 %v3607_v40, %v6762_v8 }
 0x317   :  { %v6136_v62 = vpop.eup %3616  ;;  %vm2371_vm3 = vcmp.ge.f32.partialorder %v2283_v24, 0.0  ;;  %v2459_v32 = vmul.f32 0.15, %v2283_v24  ;;  %v2058_v36 = vmul.f32 %v3609_v1, %v6763_v53  ;;  %v2101_v25 = vmul.f32 %v3611_v34, %v6764_v10 }
 0x318   :  { %v2910_v35 = vmul.f32 %v2548_v28, %v93_v43  ;;  %v2981_v47 = vadd.f32 %v2980_v58, %v2979_v2  ;;  %v2239_v4 = vadd.f32 %v5348_v41, %v2147_v49  ;;  %v2194_v0 = vmul.f32 %v5300_v19, %v2102_v27  ;;  %v50_v2 = vld [vmem:[%s6426_s2 + $0x100] sm:$0xff] }
 0x319   :  { %v2504_v63 = vsel %vm2328_vm2, %v2240_v14, %v2416_v57  ;;  %v2547_v22 = vsel %vm2371_vm3, %v2283_v24, %v2459_v32  ;;  %v2150_v56 = vmul.f32 %v5300_v19, %v2058_v36  ;;  %v2193_v5 = vmul.f32 %v5300_v19, %v2101_v25 }
 0x31a   :  { %v2865_v40 = vmul.f32 %v2547_v22, %v48_v60  ;;  %vm2327_vm4 = vcmp.ge.f32.partialorder %v2239_v4, 0.0  ;;  %v2415_v33 = vmul.f32 0.15, %v2239_v4  ;;  %v2057_v20 = vmul.f32 %v3613_v50, %v6765_v46 }
 0x31b   :  { %v2909_v38 = vmul.f32 %v2547_v22, %v92_v11  ;;  %v2286_v44 = vadd.f32 %v5348_v41, %v2194_v0  ;;  %v2242_v3 = vadd.f32 %v5348_v41, %v2150_v56  ;;  %v2285_v31 = vadd.f32 %v5348_v41, %v2193_v5  ;;  %v1607_v56 = vpop.xlane.xlu0 %1606 }
 0x31c   :  { %v3619_v39 = vpop.eup %3618  ;;  %v3074_v30 = vadd.f32 %v3073_v17, %v3072_v29  ;;  %v2707_v1 = vadd.f32 %v2706_v48, %v2705_v21  ;;  %v2800_v51 = vadd.f32 %v2799_v59, %v2798_v16  ;;  %v2503_v15 = vsel %vm2327_vm4, %v2239_v4, %v2415_v33  ;;  %v95_v59 = vld [vmem:[%s6426_s2 + $0x268] sm:$0xff]  ;;  %v94_v29 = vld [vmem:[%s6426_s2 + $0x260] sm:$0xff]  ;;  %v6766_v21 = vld [vmem:[#allocation39_spill] sm:$0xff] }
 0x31d   :  { %v2592_v12 = vmul.f32 %v2504_v63, %v49_v18  ;;  %v2636_v55 = vmul.f32 %v2504_v63, %v93_v43  ;;  %v2591_v26 = vmul.f32 %v2503_v15, %v48_v60  ;;  %v2635_v37 = vmul.f32 %v2503_v15, %v92_v11  ;;  %v51_v18 = vld [vmem:[%s6426_s2 + $0x108] sm:$0xff]  ;;  %v6175_v43 = vpop.xlane.xlu1 %1738  ;;  %v6768_v4 = vld [vmem:[#allocation40_spill] sm:$0xff] }
 0x31e   :  { %v2982_v14 = vsel %vm198_vm0, %v2865_v40, 0.0  ;;  %vm2374_vm5 = vcmp.ge.f32.partialorder %v2286_v44, 0.0  ;;  %v2462_v34 = vmul.f32 0.15, %v2286_v44  ;;  %v2149_v23 = vmul.f32 %v5300_v19, %v2057_v20 }
 0x31f   :  { %v3075_v61 = vsel %vm198_vm0, %v2909_v38, 0.0  ;;  %v2418_v52 = vmul.f32 0.15, %v2242_v3  ;;  %vm2373_vm6 = vcmp.ge.f32.partialorder %v2285_v31, 0.0  ;;  %v2461_v45 = vmul.f32 0.15, %v2285_v31 }
 0x320   :  { %v2708_v58 = vsel %vm198_vm0, %v2591_v26, 0.0  ;;  %v2801_v17 = vsel %vm198_vm0, %v2635_v37, 0.0  ;;  %v2550_v28 = vsel %vm2374_vm5, %v2286_v44, %v2462_v34  ;;  %vm2330_vm7 = vcmp.ge.f32.partialorder %v2242_v3, 0.0  ;;  %v53_v37 = vld [vmem:[%s6426_s2 + $0x118] sm:$0xff]  ;;  %v6206_v34 = vld [vmem:[%s6426_s2 + $0x110] sm:$0xff] }
 0x321   :  { %v2984_v7 = vsel %vm198_vm0, %v2866_v42, 0.0  ;;  %v3077_v50 = vsel %vm198_vm0, %v2910_v35, 0.0  ;;  %v2710_v48 = vsel %vm198_vm0, %v2592_v12, 0.0  ;;  %v2104_v16 = vmul.f32 %v3615_v9, %v6766_v21  ;;  %v6767_v35 = vld [vmem:[#allocation38_spill] sm:$0xff]  ;;  %v1748_v20 = vpop.xlane.xlu1 %1747 }
 0x322   :  { %v2803_v57 = vsel %vm198_vm0, %v2636_v55, 0.0  ;;  %v2983_v24 = vadd.f32 %v2982_v14, %v2981_v47  ;;  %v3076_v42 = vadd.f32 %v3075_v61, %v3074_v30  ;;  %v2549_v49 = vsel %vm2373_vm6, %v2285_v31, %v2461_v45 }
 0x323   :  { %v2709_v8 = vadd.f32 %v2708_v58, %v2707_v1  ;;  %v2802_v27 = vadd.f32 %v2801_v17, %v2800_v51  ;;  %v2868_v60 = vmul.f32 %v2550_v28, %v51_v18  ;;  %v2506_v32 = vsel %vm2330_vm7, %v2242_v3, %v2418_v52 }
 0x324   :  { %v2912_v53 = vmul.f32 %v2550_v28, %v95_v59  ;;  %v2867_v36 = vmul.f32 %v2549_v49, %v50_v2  ;;  %v2911_v10 = vmul.f32 %v2549_v49, %v94_v29  ;;  %v2241_v25 = vadd.f32 %v5348_v41, %v2149_v23  ;;  %v1616_v23 = vpop.xlane.xlu0 %1615 }
 0x325   :  { %v2196_v9 = vmul.f32 %v5300_v19, %v2104_v16  ;;  %v2060_v11 = vmul.f32 %v6136_v62, %v6767_v35  ;;  %v2103_v47 = vmul.f32 %v3619_v39, %v6768_v4  ;;  %3620 = vrsqrt.f32 %v6097_v54  ;;  %v1745_v45 = vpop.xlane.xlu1 %1744 }
 0x326   :  { %v2594_v0 = vmul.f32 %v2506_v32, %v51_v18  ;;  %v2638_v63 = vmul.f32 %v2506_v32, %v95_v59  ;;  %vm2329_vm8 = vcmp.ge.f32.partialorder %v2241_v25, 0.0  ;;  %v2417_v22 = vmul.f32 0.15, %v2241_v25 }
 0x327   :  { %v2985_v5 = vadd.f32 %v2984_v7, %v2983_v24  ;;  %v3078_v40 = vadd.f32 %v3077_v50, %v3076_v42  ;;  %v2288_v33 = vadd.f32 %v5348_v41, %v2196_v9  ;;  %v2152_v46 = vmul.f32 %v5300_v19, %v2060_v11  ;;  %v96_v7 = vld [vmem:[%s6426_s2 + $0x270] sm:$0xff] }
 0x328   :  { %v2505_v38 = vsel %vm2329_vm8, %v2241_v25, %v2417_v22  ;;  %v2195_v44 = vmul.f32 %v5300_v19, %v2103_v47  ;;  %3622 = vrsqrt.f32 %v6103_v6  ;;  %v1886_v62 = vadd.f32 1e-05, %v6113_v13  ;;  %v1613_v35 = vpop.xlane.xlu0 %1612  ;;  %v6770_v47 = vld [vmem:[#allocation43_spill] sm:$0xff] }
 0x329   :  { %v2986_v54 = vsel %vm198_vm0, %v2867_v36, 0.0  ;;  %v3079_v3 = vsel %vm198_vm0, %v2911_v10, 0.0  ;;  %vm2376_vm9 = vcmp.ge.f32.partialorder %v2288_v33, 0.0  ;;  %v2464_v31 = vmul.f32 0.15, %v2288_v33 }
 0x32a   :  { %v2593_v39 = vmul.f32 %v2505_v38, %v50_v2  ;;  %v2637_v30 = vmul.f32 %v2505_v38, %v94_v29  ;;  %v2244_v1 = vadd.f32 %v5348_v41, %v2152_v46  ;;  %v2287_v51 = vadd.f32 %v5348_v41, %v2195_v44  ;;  %v6771_v44 = vld [vmem:[#allocation42_spill] sm:$0xff] }
 0x32b   :  { %v2988_v15 = vsel %vm198_vm0, %v2868_v60, 0.0  ;;  %v3081_v12 = vsel %vm198_vm0, %v2912_v53, 0.0  ;;  %v2711_v55 = vadd.f32 %v2710_v48, %v2709_v8  ;;  %3624 = vrsqrt.f32 %v1886_v62  ;;  %v97_v48 = vld [vmem:[%s6426_s2 + $0x278] sm:$0xff]  ;;  %v6769_v8 = vld [vmem:[#allocation41_spill] sm:$0xff] }
 0x32c   :  { %v6198_v6 = vsel %vm198_vm0, %v2594_v0, 0.0  ;;  %v2987_v13 = vadd.f32 %v2986_v54, %v2985_v5  ;;  %v3080_v26 = vadd.f32 %v3079_v3, %v3078_v40  ;;  %v2552_v14 = vsel %vm2376_vm9, %v2288_v33, %v2464_v31 }
 0x32d   :  { %vm2332_vm10 = vcmp.ge.f32.partialorder %v2244_v1, 0.0  ;;  %v2420_v61 = vmul.f32 0.15, %v2244_v1  ;;  %vm2375_vm11 = vcmp.ge.f32.partialorder %v2287_v51, 0.0  ;;  %v2463_v52 = vmul.f32 0.15, %v2287_v51 }
 0x32e   :  { %v6209_v58 = vsel %vm198_vm0, %v2638_v63, 0.0  ;;  %v2804_v17 = vadd.f32 %v2803_v57, %v2802_v27  ;;  %v2712_v18 = vsel %vm198_vm0, %v2593_v39, 0.0  ;;  %v2805_v28 = vsel %vm198_vm0, %v2637_v30, 0.0  ;;  %v1754_v63 = vpop.xlane.xlu1 %1753 }
 0x32f   :  { %v3621_v50 = vpop.eup %3620  ;;  %v2870_v59 = vmul.f32 %v2552_v14, %v53_v37  ;;  %v2551_v2 = vsel %vm2375_vm11, %v2287_v51, %v2463_v52  ;;  %v1841_v29 = vmul.f32 0.0625, %v6175_v43  ;;  %v1797_v21 = vmul.f32 0.0625, %v1607_v56 }
 0x330   :  { %v2508_v16 = vsel %vm2332_vm10, %v2244_v1, %v2420_v61  ;;  %v2869_v57 = vmul.f32 %v2551_v2, %v6206_v34  ;;  %v2989_v24 = vadd.f32 %v2988_v15, %v2987_v13  ;;  %v3082_v42 = vadd.f32 %v3081_v12, %v3080_v26  ;;  %v1622_v15 = vpop.xlane.xlu0 %1621 }
 0x331   :  { %v2913_v49 = vmul.f32 %v2551_v2, %v96_v7  ;;  %v2059_v27 = vmul.f32 %v3621_v50, %v6769_v8  ;;  %v1929_v60 = vadd.f32 1e-05, %v1841_v29  ;;  %v1844_v32 = vmul.f32 0.0625, %v1748_v20  ;;  %v99_v8 = vld [vmem:[%s6426_s2 + $0x288] sm:$0xff] }
 0x332   :  { %v3623_v53 = vpop.eup %3622  ;;  %v2713_v36 = vadd.f32 %v2712_v18, %v2711_v55  ;;  %v2806_v10 = vadd.f32 %v2805_v28, %v2804_v17  ;;  %v2914_v25 = vmul.f32 %v2552_v14, %v97_v48  ;;  %v1885_v9 = vadd.f32 1e-05, %v1797_v21  ;;  %v1751_v26 = vpop.xlane.xlu1 %1750  ;;  %v55_v21 = vld [vmem:[%s6426_s2 + $0x128] sm:$0xff] }
 0x333   :  { %v2992_v43 = vsel %vm198_vm0, %v2870_v59, 0.0  ;;  %v2596_v11 = vmul.f32 %v2508_v16, %v53_v37  ;;  %v2151_v4 = vmul.f32 %v5300_v19, %v2059_v27  ;;  %v2106_v0 = vmul.f32 %v3623_v53, %v6770_v47 }
 0x334   :  { %3626 = vrsqrt.f32 %v1929_v60  ;;  %v1932_v22 = vadd.f32 1e-05, %v1844_v32  ;;  %v1800_v56 = vmul.f32 0.0625, %v1616_v23  ;;  %v1843_v5 = vmul.f32 0.0625, %v1745_v45 }
 0x335   :  { %v3625_v40 = vpop.eup %3624  ;;  %v2990_v33 = vsel %vm198_vm0, %v2869_v57, 0.0  ;;  %v3083_v46 = vsel %vm198_vm0, %v2913_v49, 0.0  ;;  %v2243_v20 = vadd.f32 %v5348_v41, %v2151_v4  ;;  %v2198_v38 = vmul.f32 %v5300_v19, %v2106_v0  ;;  %v6774_v0 = vld [vmem:[#allocation47_spill] sm:$0xff] }
 0x336   :  { %v2062_v62 = vmul.f32 %v3625_v40, %v6771_v44  ;;  %3628 = vrsqrt.f32 %v1885_v9  ;;  %v1888_v54 = vadd.f32 1e-05, %v1800_v56  ;;  %v1931_v3 = vadd.f32 1e-05, %v1843_v5  ;;  %v6773_v9 = vld [vmem:[#allocation45_spill] sm:$0xff]  ;;  %v6775_v40 = vld [vmem:[#allocation46_spill] sm:$0xff] }
 0x337   :  { %vm2331_vm12 = vcmp.ge.f32.partialorder %v2243_v20, 0.0  ;;  %v2419_v31 = vmul.f32 0.15, %v2243_v20  ;;  %v2290_v39 = vadd.f32 %v5348_v41, %v2198_v38  ;;  %3630 = vrsqrt.f32 %v1932_v22 }
 0x338   :  { %v2154_v30 = vmul.f32 %v5300_v19, %v2062_v62  ;;  %3632 = vrsqrt.f32 %v1888_v54  ;;  %v1799_v1 = vmul.f32 0.0625, %v1613_v35  ;;  %v1846_v51 = vmul.f32 0.0625, %v1754_v63  ;;  %v6776_v62 = vld [vmem:[#allocation48_spill] sm:$0xff] }
 0x339   :  { %v2640_v12 = vmul.f32 %v2508_v16, %v97_v48  ;;  %v2507_v55 = vsel %vm2331_vm12, %v2243_v20, %v2419_v31  ;;  %v2466_v13 = vmul.f32 0.15, %v2290_v39  ;;  %3634 = vrsqrt.f32 %v1931_v3  ;;  %v1757_v3 = vpop.xlane.xlu1 %1756  ;;  %v54_v31 = vld [vmem:[%s6426_s2 + $0x120] sm:$0xff] }
 0x33a   :  { %v2991_v37 = vadd.f32 %v2990_v33, %v2989_v24  ;;  %v3084_v14 = vadd.f32 %v3083_v46, %v3082_v42  ;;  %vm2378_vm13 = vcmp.ge.f32.partialorder %v2290_v39, 0.0  ;;  %v2246_v23 = vadd.f32 %v5348_v41, %v2154_v30  ;;  %v1619_v42 = vpop.xlane.xlu0 %1618 }
 0x33b   :  { %v3085_v61 = vsel %vm198_vm0, %v2914_v25, 0.0  ;;  %v2595_v52 = vmul.f32 %v2507_v55, %v6206_v34  ;;  %v1887_v45 = vadd.f32 1e-05, %v1799_v1  ;;  %v1802_v17 = vmul.f32 0.0625, %v1622_v15 }
 0x33c   :  { %v2715_v18 = vadd.f32 %v6198_v6, %v2713_v36  ;;  %v2639_v28 = vmul.f32 %v2507_v55, %v96_v7  ;;  %v1934_v50 = vadd.f32 1e-05, %v1846_v51  ;;  %v1845_v48 = vmul.f32 0.0625, %v1751_v26 }
 0x33d   :  { %v6238_v59 = vsel %vm198_vm0, %v2596_v11, 0.0  ;;  %v6241_v2 = vsel %vm198_vm0, %v2640_v12, 0.0  ;;  %v2808_v29 = vadd.f32 %v6209_v58, %v2806_v10  ;;  %v2554_v34 = vsel %vm2378_vm13, %v2290_v39, %v2466_v13  ;;  %v6772_v58 = vld [vmem:[#allocation44_spill] sm:$0xff] }
 0x33e   :  { %v3627_v16 = vpop.eup %3626  ;;  %v2422_v57 = vmul.f32 0.15, %v2246_v23  ;;  %v6247_v24 = vadd.f32 %v2992_v43, %v2991_v37  ;;  %v6249_v6 = vadd.f32 %v3085_v61, %v3084_v14  ;;  %v1890_v7 = vadd.f32 1e-05, %v1802_v17  ;;  %v98_v39 = vld [vmem:[%s6426_s2 + $0x280] sm:$0xff] }
 0x33f   :  { %v2716_v49 = vsel %vm198_vm0, %v2595_v52, 0.0  ;;  %vm2334_vm14 = vcmp.ge.f32.partialorder %v2246_v23, 0.0  ;;  %v2105_v27 = vmul.f32 %v3627_v16, %v6772_v58  ;;  %3636 = vrsqrt.f32 %v1887_v45  ;;  %v1625_v45 = vpop.xlane.xlu0 %1624 }
 0x340   :  { %v3629_v60 = vpop.eup %3628  ;;  %v2809_v32 = vsel %vm198_vm0, %v2639_v28, 0.0  ;;  %v2872_v53 = vmul.f32 %v2554_v34, %v55_v21  ;;  %3638 = vrsqrt.f32 %v1934_v50  ;;  %v1933_v36 = vadd.f32 1e-05, %v1845_v48 }
 0x341   :  { %v3631_v10 = vpop.eup %3630  ;;  %v2197_v25 = vmul.f32 %v5300_v19, %v2105_v27  ;;  %v2061_v35 = vmul.f32 %v3629_v60, %v6773_v9  ;;  %3640 = vrsqrt.f32 %v1890_v7  ;;  %v1801_v43 = vmul.f32 0.0625, %v1619_v42 }
 0x342   :  { %v3633_v11 = vpop.eup %3632  ;;  %v2916_v4 = vmul.f32 %v2554_v34, %v99_v8  ;;  %v2510_v47 = vsel %vm2334_vm14, %v2246_v23, %v2422_v57  ;;  %v2108_v63 = vmul.f32 %v3631_v10, %v6774_v0  ;;  %3642 = vrsqrt.f32 %v1933_v36  ;;  %v6780_v0 = vld [vmem:[#allocation52_spill] sm:$0xff] }
 0x343   :  { %v3635_v22 = vpop.eup %3634  ;;  %v2289_v56 = vadd.f32 %v5348_v41, %v2197_v25  ;;  %v2153_v5 = vmul.f32 %v5300_v19, %v2061_v35  ;;  %v2064_v33 = vmul.f32 %v3633_v11, %v6775_v40  ;;  %v1889_v46 = vadd.f32 1e-05, %v1801_v43  ;;  %v6777_v25 = vld [vmem:[#allocation49_spill] sm:$0xff]  ;;  %v6778_v35 = vld [vmem:[#allocation51_spill] sm:$0xff]  ;;  %v1760_v11 = vpop.xlane.xlu1 %1759 }
 0x344   :  { %v2717_v20 = vadd.f32 %v2716_v49, %v2715_v18  ;;  %v2810_v38 = vadd.f32 %v2809_v32, %v2808_v29  ;;  %v2200_v44 = vmul.f32 %v5300_v19, %v2108_v63  ;;  %v2107_v54 = vmul.f32 %v3635_v22, %v6776_v62 }
 0x345   :  { %vm2377_vm15 = vcmp.ge.f32.partialorder %v2289_v56, 0.0  ;;  %v2465_v30 = vmul.f32 0.15, %v2289_v56  ;;  %v2245_v1 = vadd.f32 %v5348_v41, %v2153_v5  ;;  %v2156_v51 = vmul.f32 %v5300_v19, %v2064_v33  ;;  %v57_v33 = vld [vmem:[%s6426_s2 + $0x138] sm:$0xff] }
 0x346   :  { %v2598_v15 = vmul.f32 %v2510_v47, %v55_v21  ;;  %v2642_v12 = vmul.f32 %v2510_v47, %v99_v8  ;;  %v2199_v55 = vmul.f32 %v5300_v19, %v2107_v54  ;;  %3644 = vrsqrt.f32 %v1889_v46  ;;  %v101_v46 = vld [vmem:[%s6426_s2 + $0x298] sm:$0xff]  ;;  %v56_v54 = vld [vmem:[%s6426_s2 + $0x130] sm:$0xff] }
 0x347   :  { %v2553_v13 = vsel %vm2377_vm15, %v2289_v56, %v2465_v30  ;;  %vm2333_vm1 = vcmp.ge.f32.partialorder %v2245_v1, 0.0  ;;  %v2421_v26 = vmul.f32 0.15, %v2245_v1  ;;  %v1847_v37 = vmul.f32 0.0625, %v1757_v3 }
 0x348   :  { %v2871_v14 = vmul.f32 %v2553_v13, %v54_v31  ;;  %v2915_v23 = vmul.f32 %v2553_v13, %v98_v39  ;;  %v2292_v61 = vadd.f32 %v5348_v41, %v2200_v44  ;;  %v2248_v52 = vadd.f32 %v5348_v41, %v2156_v51 }
 0x349   :  { %v3637_v17 = vpop.eup %3636  ;;  %v6277_v18 = vsel %vm198_vm0, %v2872_v53, 0.0  ;;  %v6280_v28 = vsel %vm198_vm0, %v2916_v4, 0.0  ;;  %v2719_v50 = vadd.f32 %v6238_v59, %v2717_v20  ;;  %v2509_v48 = vsel %vm2333_vm1, %v2245_v1, %v2421_v26  ;;  %v6779_v4 = vld [vmem:[#allocation50_spill] sm:$0xff] }
 0x34a   :  { %v3639_v29 = vpop.eup %3638  ;;  %v2994_v21 = vsel %vm198_vm0, %v2871_v14, 0.0  ;;  %v3087_v34 = vsel %vm198_vm0, %v2915_v23, 0.0  ;;  %v2812_v16 = vadd.f32 %v6241_v2, %v2810_v38  ;;  %v2291_v57 = vadd.f32 %v5348_v41, %v2199_v55 }
 0x34b   :  { %v3641_v7 = vpop.eup %3640  ;;  %v6288_v42 = vsel %vm198_vm0, %v2598_v15, 0.0  ;;  %v6291_v49 = vsel %vm198_vm0, %v2642_v12, 0.0  ;;  %v1935_v8 = vadd.f32 1e-05, %v1847_v37  ;;  %v1803_v58 = vmul.f32 0.0625, %v1625_v45  ;;  %v100_v15 = vld [vmem:[%s6426_s2 + $0x290] sm:$0xff] }
 0x34c   :  { %v3643_v59 = vpop.eup %3642  ;;  %v2597_v27 = vmul.f32 %v2509_v48, %v54_v31  ;;  %vm2380_vm2 = vcmp.ge.f32.partialorder %v2292_v61, 0.0  ;;  %v2468_v60 = vmul.f32 0.15, %v2292_v61  ;;  %vm2336_vm3 = vcmp.ge.f32.partialorder %v2248_v52, 0.0 }
 0x34d   :  { %v6294_v32 = vadd.f32 %v2994_v21, %v6247_v24  ;;  %v6297_v2 = vadd.f32 %v3087_v34, %v6249_v6  ;;  %v2641_v53 = vmul.f32 %v2509_v48, %v98_v39  ;;  %v2424_v36 = vmul.f32 0.15, %v2248_v52  ;;  %v6781_v39 = vld [vmem:[#allocation71_spill] sm:$0xff] }
 0x34e   :  { %vm2379_vm4 = vcmp.ge.f32.partialorder %v2291_v57, 0.0  ;;  %v2467_v10 = vmul.f32 0.15, %v2291_v57  ;;  %v2063_v9 = vmul.f32 %v3637_v17, %v6777_v25  ;;  %v2110_v43 = vmul.f32 %v3639_v29, %v6778_v35  ;;  %v1628_v29 = vpop.xlane.xlu0 %1627  ;;  %v102_v25 = vld [vmem:[%s6426_s2 + $0x2a0] sm:$0xff] }
 0x34f   :  { %v2066_v47 = vmul.f32 %v3641_v7, %v6779_v4  ;;  %v2109_v63 = vmul.f32 %v3643_v59, %v6780_v0  ;;  %3646 = vrsqrt.f32 %v1935_v8  ;;  %v1891_v22 = vadd.f32 1e-05, %v1803_v58 }
 0x350   :  { %v3645_v24 = vpop.eup %3644  ;;  %v2720_v56 = vsel %vm198_vm0, %v2597_v27, 0.0  ;;  %v2556_v6 = vsel %vm2380_vm2, %v2292_v61, %v2468_v60  ;;  %v2155_v5 = vmul.f32 %v5300_v19, %v2063_v9  ;;  %v2202_v40 = vmul.f32 %v5300_v19, %v2110_v43  ;;  %v6782_v9 = vld [vmem:[#allocation73_spill] sm:$0xff] }
 0x351   :  { %v2555_v20 = vsel %vm2379_vm4, %v2291_v57, %v2467_v10  ;;  %v2158_v38 = vmul.f32 %v5300_v19, %v2066_v47  ;;  %v2201_v44 = vmul.f32 %v5300_v19, %v2109_v63  ;;  %v1848_v62 = vmul.f32 0.0625, %v1760_v11 }
 0x352   :  { %v2247_v3 = vadd.f32 %v5348_v41, %v2155_v5  ;;  %v2294_v31 = vadd.f32 %v5348_v41, %v2202_v40  ;;  %v2065_v30 = vmul.f32 %v3645_v24, %v6781_v39  ;;  %3648 = vrsqrt.f32 %v1891_v22  ;;  %v59_v24 = vld [vmem:[%s6426_s2 + $0x148] sm:$0xff] }
 0x353   :  { %v2813_v1 = vsel %vm198_vm0, %v2641_v53, 0.0  ;;  %v2512_v51 = vsel %vm2336_vm3, %v2248_v52, %v2424_v36  ;;  %v2250_v12 = vadd.f32 %v5348_v41, %v2158_v38  ;;  %v2293_v55 = vadd.f32 %v5348_v41, %v2201_v44 }
 0x354   :  { %v2874_v13 = vmul.f32 %v2556_v6, %v57_v33  ;;  %v2918_v26 = vmul.f32 %v2556_v6, %v101_v46  ;;  %vm2335_vm5 = vcmp.ge.f32.partialorder %v2247_v3, 0.0  ;;  %v2423_v37 = vmul.f32 0.15, %v2247_v3 }
 0x355   :  { %v6329_v14 = vadd.f32 %v2720_v56, %v2719_v50  ;;  %v2873_v23 = vmul.f32 %v2555_v20, %v56_v54  ;;  %vm2381_vm6 = vcmp.ge.f32.partialorder %v2293_v55, 0.0  ;;  %v2469_v61 = vmul.f32 0.15, %v2293_v55  ;;  %v58_v50 = vld [vmem:[%s6426_s2 + $0x140] sm:$0xff]  ;;  %v103_v56 = vld [vmem:[%s6426_s2 + $0x2a8] sm:$0xff] }
 0x356   :  { %v2917_v45 = vmul.f32 %v2555_v20, %v100_v15  ;;  %v2470_v17 = vmul.f32 0.15, %v2294_v31  ;;  %v2157_v52 = vmul.f32 %v5300_v19, %v2065_v30  ;;  %v1936_v48 = vadd.f32 1e-05, %v1848_v62 }
 0x357   :  { %v6332_v21 = vadd.f32 %v2813_v1, %v2812_v16  ;;  %v2511_v34 = vsel %vm2335_vm5, %v2247_v3, %v2423_v37  ;;  %vm2382_vm7 = vcmp.ge.f32.partialorder %v2294_v31, 0.0  ;;  %v2426_v57 = vmul.f32 0.15, %v2250_v12 }
 0x358   :  { %vm2338_vm8 = vcmp.ge.f32.partialorder %v2250_v12, 0.0  ;;  %v2557_v7 = vsel %vm2381_vm6, %v2293_v55, %v2469_v61  ;;  %v2249_v8 = vadd.f32 %v5348_v41, %v2157_v52  ;;  %3650 = vrsqrt.f32 %v1936_v48 }
 0x359   :  { %v3647_v58 = vpop.eup %3646  ;;  %v2600_v59 = vmul.f32 %v2512_v51, %v57_v33  ;;  %v6338_v27 = vmul.f32 %v2512_v51, %v101_v46  ;;  %v2998_v60 = vsel %vm198_vm0, %v2873_v23, 0.0  ;;  %v1804_v16 = vmul.f32 0.0625, %v1628_v29  ;;  %v6783_v33 = vld [vmem:[#allocation74_spill] sm:$0xff] }
 0x35a   :  { %v3091_v53 = vsel %vm198_vm0, %v2917_v45, 0.0  ;;  %v2599_v36 = vmul.f32 %v2511_v34, %v56_v54  ;;  %v2558_v10 = vsel %vm2382_vm7, %v2294_v31, %v2470_v17  ;;  %v2111_v35 = vmul.f32 %v3647_v58, %v6782_v9  ;;  %v6784_v17 = vld [vmem:[#allocation53_spill] sm:$0xff] }
 0x35b   :  { %v2643_v43 = vmul.f32 %v2511_v34, %v100_v15  ;;  %v2514_v11 = vsel %vm2338_vm8, %v2250_v12, %v2426_v57  ;;  %v2875_v4 = vmul.f32 %v2557_v7, %v58_v50  ;;  %v1892_v47 = vadd.f32 1e-05, %v1804_v16  ;;  %v60_v12 = vld [vmem:[%s6426_s2 + $0x150] sm:$0xff] }
 0x35c   :  { %v3649_v0 = vpop.eup %3648  ;;  %v2425_v63 = vmul.f32 0.15, %v2249_v8  ;;  %v2203_v22 = vmul.f32 %v5300_v19, %v2111_v35  ;;  %v2997_v6 = vadd.f32 %v6277_v18, %v6294_v32  ;;  %v3090_v5 = vadd.f32 %v6280_v28, %v6297_v2 }
 0x35d   :  { %v2919_v40 = vmul.f32 %v2557_v7, %v102_v25  ;;  %vm2337_vm9 = vcmp.ge.f32.partialorder %v2249_v8, 0.0  ;;  %v2067_v46 = vmul.f32 %v3649_v0, %v6783_v33  ;;  %3652 = vrsqrt.f32 %v1892_v47 }
 0x35e   :  { %v2724_v20 = vsel %vm198_vm0, %v2599_v36, 0.0  ;;  %v2295_v38 = vadd.f32 %v5348_v41, %v2203_v22  ;;  %v2999_v44 = vadd.f32 %v2998_v60, %v2997_v6  ;;  %v3092_v62 = vadd.f32 %v3091_v53, %v3090_v5 }
 0x35f   :  { %v2817_v54 = vsel %vm198_vm0, %v2643_v43, 0.0  ;;  %v2159_v3 = vmul.f32 %v5300_v19, %v2067_v46  ;;  %v2876_v31 = vmul.f32 %v2558_v10, %v59_v24  ;;  %v2920_v18 = vmul.f32 %v2558_v10, %v103_v56  ;;  %v6785_v43 = vld [vmem:[#allocation72_spill] sm:$0xff] }
 0x360   :  { %v2513_v32 = vsel %vm2337_vm9, %v2249_v8, %v2425_v63  ;;  %vm2383_vm10 = vcmp.ge.f32.partialorder %v2295_v38, 0.0  ;;  %v2471_v28 = vmul.f32 0.15, %v2295_v38  ;;  %v3000_v2 = vsel %vm198_vm0, %v2874_v13, 0.0 }
 0x361   :  { %v2251_v39 = vadd.f32 %v5348_v41, %v2159_v3  ;;  %v3002_v30 = vsel %vm198_vm0, %v2875_v4, 0.0  ;;  %v3093_v1 = vsel %vm198_vm0, %v2918_v26, 0.0  ;;  %v3095_v51 = vsel %vm198_vm0, %v2919_v40, 0.0  ;;  %v104_v26 = vld [vmem:[%s6426_s2 + $0x2b0] sm:$0xff] }
 0x362   :  { %v3651_v15 = vpop.eup %3650  ;;  %v2559_v55 = vsel %vm2383_vm10, %v2295_v38, %v2471_v28  ;;  %v3001_v37 = vadd.f32 %v3000_v2, %v2999_v44  ;;  %v3094_v23 = vadd.f32 %v3093_v1, %v3092_v62  ;;  %v2723_v61 = vadd.f32 %v6288_v42, %v6329_v14 }
 0x363   :  { %v2601_v13 = vmul.f32 %v2513_v32, %v58_v50  ;;  %v2427_v45 = vmul.f32 0.15, %v2251_v39  ;;  %v2112_v52 = vmul.f32 %v3651_v15, %v6784_v17  ;;  %v3004_v48 = vsel %vm198_vm0, %v2876_v31, 0.0 }
 0x364   :  { %vm2339_vm11 = vcmp.ge.f32.partialorder %v2251_v39, 0.0  ;;  %v3003_v29 = vadd.f32 %v3002_v30, %v3001_v37  ;;  %v3096_v34 = vadd.f32 %v3095_v51, %v3094_v23  ;;  %v2725_v57 = vadd.f32 %v2724_v20, %v2723_v61 }
 0x365   :  { %v2645_v7 = vmul.f32 %v2513_v32, %v102_v25  ;;  %v2204_v8 = vmul.f32 %v5300_v19, %v2112_v52  ;;  %v2877_v58 = vmul.f32 %v2559_v55, %v60_v12  ;;  %v3097_v42 = vsel %vm198_vm0, %v2920_v18, 0.0 }
 0x366   :  { %v2921_v14 = vmul.f32 %v2559_v55, %v104_v26  ;;  %v2602_v50 = vmul.f32 %v2514_v11, %v59_v24  ;;  %v2646_v60 = vmul.f32 %v2514_v11, %v103_v56  ;;  %v2726_v16 = vsel %vm198_vm0, %v2600_v59, 0.0  ;;  %v61_v11 = vld [vmem:[%s6426_s2 + $0x158] sm:$0xff] }
 0x367   :  { %v3653_v53 = vpop.eup %3652  ;;  %v2296_v36 = vadd.f32 %v5348_v41, %v2204_v8  ;;  %v2515_v10 = vsel %vm2339_vm11, %v2251_v39, %v2427_v45  ;;  %v2727_v9 = vadd.f32 %v2726_v16, %v2725_v57  ;;  %v2728_v35 = vsel %vm198_vm0, %v2601_v13, 0.0  ;;  %v105_v59 = vld [vmem:[%s6426_s2 + $0x2b8] sm:$0xff]  ;;  %s3679_s2 = smov [#allocation2]  }
 0x368   :  { %v2068_v4 = vmul.f32 %v3653_v53, %v6785_v43  ;;  %v3005_v25 = vadd.f32 %v3004_v48, %v3003_v29  ;;  %v3098_v47 = vadd.f32 %v3097_v42, %v3096_v34  ;;  %v2816_v0 = vadd.f32 %v6291_v49, %v6332_v21  ;;  %s3149_s7 = sshll.u32 %s3679_s2, 4  ;;  %s3150_s7 = int_to_ptr.vmem [resolvable:$true] %s3149_s7 }
 0x369   :  { %v2472_v63 = vmul.f32 0.15, %v2296_v36  ;;  %vm2384_vm12 = vcmp.ge.f32.partialorder %v2296_v36, 0.0  ;;  %v3006_v22 = vsel %vm198_vm0, %v2877_v58, 0.0  ;;  %v2729_v24 = vadd.f32 %v2728_v35, %v2727_v9  ;;  %s3655_s8 = scalar_lea.vmem %s3150_s7, 32  ;;  %p3660_p1 = scmp.lt.s32.totalorder %s3150_s7, %s3150_s7 }
 0x36a   :  { %v2160_v56 = vmul.f32 %v5300_v19, %v2068_v4  ;;  %v3099_v6 = vsel %vm198_vm0, %v2921_v14, 0.0  ;;  %v2603_v5 = vmul.f32 %v2515_v10, %v60_v12  ;;  %v2818_v40 = vadd.f32 %v2817_v54, %v2816_v0  ;;  %p3656_p0 = scmp.ne.s32.totalorder %s3150_s7, %s3655_s8  ;;  %p3661_p2 = scmp.lt.s32.totalorder %s3655_s8, %s3655_s8 }
 0x36b   :  { %v2560_v49 = vsel %vm2384_vm12, %v2296_v36, %v2472_v63  ;;  %v2647_v21 = vmul.f32 %v2515_v10, %v104_v26  ;;  %v2730_v33 = vsel %vm198_vm0, %v2602_v50, 0.0  ;;  %v2819_v46 = vsel %vm198_vm0, %v6338_v27, 0.0 }
 0x36c   :  { %v2252_v20 = vadd.f32 %v5348_v41, %v2160_v56  ;;  %v2878_v38 = vmul.f32 %v2560_v49, %v61_v11  ;;  %v2922_v44 = vmul.f32 %v2560_v49, %v105_v59  ;;  %v2821_v62 = vsel %vm198_vm0, %v2645_v7, 0.0  ;;  %p3662_p3 = por %p3661_p2, %p3660_p1 }
 0x36d   :  { %v3007_v3 = vadd.f32 %v3006_v22, %v3005_v25  ;;  %v3100_v31 = vadd.f32 %v3099_v6, %v3098_v47  ;;  %v2731_v19 = vadd.f32 %v2730_v33, %v2729_v24  ;;  %v2820_v18 = vadd.f32 %v2819_v46, %v2818_v40  ;;  %v6787_v40 = vld [vmem:[#allocation5_spill] sm:$0xff] }
 0x36e   :  { %v2428_v32 = vmul.f32 0.15, %v2252_v20  ;;  %v3008_v54 = vsel %vm198_vm0, %v2878_v38, 0.0  ;;  %v3101_v28 = vsel %vm198_vm0, %v2922_v44, 0.0  ;;  %vm2340_vm13 = vcmp.ge.f32.partialorder %v2252_v20, 0.0  ;;  %p3663_p4 = pnand %p3662_p3, %p3656_p0 }
 0x36f   :  { %v3009_v2 = vadd.f32 %v3008_v54, %v3007_v3  ;;  %v3102_v39 = vadd.f32 %v3101_v28, %v3100_v31  ;;  %v2732_v27 = vsel %vm198_vm0, %v2603_v5, 0.0  ;;  %v2822_v30 = vadd.f32 %v2821_v62, %v2820_v18 }
 0x370   :  { %v2516_v41 = vsel %vm2340_vm13, %v2252_v20, %v2428_v32  ;;  %v2823_v1 = vsel %vm198_vm0, %v2646_v60, 0.0  ;;  %v2825_v51 = vsel %vm198_vm0, %v2647_v21, 0.0  ;;  %v2733_v23 = vadd.f32 %v2732_v27, %v2731_v19 }
 0x371   :  { %v3010_v15 = vrot.slane %v3009_v2, 4  ;;  %v3103_v12 = vrot.slane %v3102_v39, 4  ;;  %v2604_v55 = vmul.f32 %v2516_v41, %v61_v11  ;;  %v2648_v37 = vmul.f32 %v2516_v41, %v105_v59 }
 0x372   :  { %v2824_v61 = vadd.f32 %v2823_v1, %v2822_v30  ;;  %vm3114_vm14 = vcmask 1041409   ;;  %v6786_v6 = vlaneseq  ;;  %vm3141_vm15 = vcmask 9216  }
 0x373   :  { %v3011_v13 = vadd.f32 %v3010_v15, %v3009_v2  ;;  %v3104_v45 = vadd.f32 %v3103_v12, %v3102_v39  ;;  %v2734_v17 = vsel %vm198_vm0, %v2604_v55, 0.0  ;;  %v2827_v52 = vsel %vm198_vm0, %v2648_v37, 0.0 }
 0x374   :  { %v2735_v26 = vadd.f32 %v2734_v17, %v2733_v23  ;;  %v2826_v48 = vadd.f32 %v2825_v51, %v2824_v61  ;;  %vm3120_vm0 = vcmask 123904   ;;  %v3130_v5 = vand.u32 127, %v6786_v6 }
 0x375   :  { %v3012_v29 = vrot.slane %v3011_v13, 2  ;;  %v3105_v34 = vrot.slane %v3104_v45, 2 }
 0x376   :  { %v2736_v57 = vrot.slane %v2735_v26, 4  ;;  %v2828_v7 = vadd.f32 %v2827_v52, %v2826_v48  ;;  %v3133_v49 = vsub.s32 %v3130_v5, %v6787_v40 }
 0x377   :  { %v3013_v8 = vadd.f32 %v3012_v29, %v3011_v13  ;;  %v3106_v58 = vadd.f32 %v3105_v34, %v3104_v45 }
 0x378   :  { %v2737_v42 = vadd.f32 %v2736_v57, %v2735_v26  ;;  %v2829_v14 = vrot.slane %v2828_v7, 4 }
 0x379   :  { %v3014_v50 = vrot.slane %v3013_v8, 1  ;;  %v3107_v60 = vrot.slane %v3106_v58, 1 }
 0x37a   :  { %v2738_v16 = vrot.slane %v2737_v42, 2  ;;  %v2830_v53 = vadd.f32 %v2829_v14, %v2828_v7 }
 0x37b   :  { %v3108_v36 = vadd.f32 %v3107_v60, %v3106_v58  ;;  %v3015_v35 = vadd.f32 %v3014_v50, %v3013_v8 }
 0x37c   :  { %v2739_v10 = vadd.f32 %v2738_v16, %v2737_v42  ;;  %v2831_v9 = vrot.slane %v2830_v53, 2 }
 0x37d   :  { %v3116_v43 = vrot.slane %v3108_v36, 7 }
 0x37e   :  { %v2832_v4 = vadd.f32 %v2831_v9, %v2830_v53  ;;  %v2740_v0 = vrot.slane %v2739_v10, 1 }
 0x37f   :  { %v3117_v25 = vsel %vm3114_vm14, %v3116_v43, %v3015_v35 }
 0x380   :  { %v3124_v47 = vsel %vm3120_vm0, %v3117_v25, 0.0  ;;  %v2833_v63 = vrot.slane %v2832_v4, 1  ;;  %v2741_v59 = vadd.f32 %v2740_v0, %v2739_v10 }
 0x381   :  { %3125 = vadd.xlane.f32.xlu1 %v3124_v47 }
 0x382   :  { %v2834_v11 = vadd.f32 %v2833_v63, %v2832_v4 }
 0x384   :  { %v3113_v22 = vrot.slane %v2834_v11, 7 }
 0x386   :  { %v3115_v24 = vsel %vm3114_vm14, %v3113_v22, %v2741_v59 }
 0x387   :  { %v3121_v56 = vsel %vm3120_vm0, %v3115_v24, 0.0 }
 0x388   :  { %3122 = vadd.xlane.f32.xlu0 %v3121_v56 }
 0x40e   :  { %v3126_v21 = vpop.xlane.xlu1 %3125 }
 0x40f   :  { %v3138_v33 = vrot.slane %v3126_v21, %v3133_v49 }
 0x415   :  { %v3123_v46 = vpop.xlane.xlu0 %3122 }
 0x416   :  { %v3134_v20 = vrot.slane %v3123_v46, %v3133_v49 }
 0x418   :  { %v3139_v38 = vsel %vm3114_vm14, %v3138_v33, %v3134_v20 }
 0x419   :  { %3142 = vst.msk [vmem:[#allocation2] sm:$0x3] %vm3141_vm15, %v3139_v38 }
 0x41a   :  { %3666 = shalt.err (!%p3663_p4)
}
 0x41b   :  { %s3667_s11 = scalar_lea.hbm %s6427_s3, 32 }
 0x41c   :  { %p3668_p5 = scmp.ne.s32.totalorder %s6427_s3, %s3667_s11  ;;  %p3671_p6 = scmp.lt.u32.totalorder %s3667_s11, %s6427_s3 }
 0x41e   :  { %p3673_p7 = pnand %p3671_p6, %p3668_p5 }
 0x420   :  { %3676 = shalt.err (!%p3673_p7)
}
 0x421   :  { %3152 = dma.vmem_to_hbm [thread:$0]  %s3150_s7, 32, %s6427_s3, [#allocation3]  }
 0x422   :  { %3677 = dma.done.wait [#allocation3], 32  }
 0x423   :  { %3678 = vsyncadd [#allocation3], 4294967264 }
 0x424   :  { %3156 = vsyncpa [#allocation3], 1 }

</bundles_post_ra>
